<compile_context>
chip_gen: v7x
topology: tpu7x:2x2x1
jax: 0.10.0
libtpu: 0.0.40
codegen_flags: <defaults>
</compile_context>

<pallas_src>
import jax
import jax.numpy as jnp
from jax import lax
from jax.experimental import pallas as pl
from jax.experimental.pallas import tpu as pltpu

EPS = 1e-5
NEG_MASK = -1e9          # finite "-inf": keeps softmax NaN-free for all-padding rows
_VMEM = pl.BlockSpec(memory_space=pltpu.MemorySpace.VMEM)


def _softmax_last(z):
    zm = jnp.max(z, axis=-1, keepdims=True)
    e = jnp.exp(z - zm)
    return e * pl.reciprocal(jnp.sum(e, axis=-1, keepdims=True), approx=True)


# ----------------------------------------------------------------------------
# Fully fused ESIM kernel
# ----------------------------------------------------------------------------
def _esim_kernel(
    # inputs
    ids_ref,                      # (2*B*T, 1) int32  [seq1 rows | seq2 rows] token ids
    emb_ref,                      # (V, E)     f32    embedding table
    seq1_ref, seq2_ref,           # (B, T)     int32  token ids (0 == pad) for masks
    bng_ref, bnb_ref,             # (1, E)     f32    embedding BatchNorm affine
    wih1_ref, whh1_ref, bl1_ref,  # LSTM1: (E,8H) bf16, (2H,8H) bf16 block-diag, (1,8H) f32
    wih2_ref, whh2_ref, bl2_ref,  # LSTM2: (8H,8H) bf16, (2H,8H) bf16,           (1,8H) f32
    g0_ref, be0_ref, w1_ref, b1_ref, g1_ref, be1_ref,
    w2_ref, b2_ref, g2_ref, be2_ref, w3_ref, b3_ref,
    # output
    out_ref,                      # (B, 2) f32
):
    B, T = seq1_ref.shape
    V, E = emb_ref.shape
    H = whh1_ref.shape[0] // 2
    H4 = 4 * H
    BB = 2 * B                    # stacked batch: [seq1 rows | seq2 rows]
    f32, bf16 = jnp.float32, jnp.bfloat16

    # ---- embedding lookup in-kernel: one-hot (2BT,V) @ (V,E) on the MXU (exact in f32) ----
    iota_v = lax.broadcasted_iota(jnp.int32, (BB * T, V), 1)
    onehot = (ids_ref[...] == iota_v).astype(f32)
    emb_all = jnp.dot(onehot, emb_ref[...],
                      preferred_element_type=f32).reshape(BB, T, E)     # (2B, T, E)

    # ---- nn.BatchNorm1d(E): training-mode stats, one independent call per sequence ----
    def bn_seq(x):                # x: (B, T, E), stats over (batch, time) per channel
        n = x.shape[0] * x.shape[1]
        mean = jnp.sum(x, axis=(0, 1), keepdims=True) * (1.0 / n)
        d = x - mean
        var = jnp.sum(d * d, axis=(0, 1), keepdims=True) * (1.0 / n)
        return d * lax.rsqrt(var + EPS) * bng_ref[...][None] + bnb_ref[...][None]

    x_all = jnp.concatenate([bn_seq(emb_all[:B]), bn_seq(emb_all[B:])], axis=0)  # (2B,T,E)

    # ---- bidirectional LSTM: hoisted input projection (1 matmul/layer), block-diag
    #      recurrent weights (1 matmul/step for both directions), static T unroll,
    #      hidden states kept as values (no scratch round-trips).
    def bilstm(x, wih_ref, whh_ref, b_ref):
        din = x.shape[-1]
        gx = jnp.dot(x.reshape(BB * T, din).astype(bf16), wih_ref[...],
                     preferred_element_type=f32) + b_ref[...]
        gx = gx.reshape(BB, T, 2 * H4)          # columns: [fwd i,f,g,o | bwd i,f,g,o]
        whh = whh_ref[...]                      # load recurrent weights once
        hf = hb = jnp.zeros((BB, H), f32)
        cf = cb = jnp.zeros((BB, H), f32)
        hfs, hbs = [None] * T, [None] * T
        for t in range(T):                      # static unroll: T is small and fixed
            rt = T - 1 - t
            pre = jnp.concatenate([gx[:, t, :H4], gx[:, rt, H4:]], axis=-1)   # (2B, 8H)
            rec = jnp.dot(jnp.concatenate([hf, hb], axis=-1).astype(bf16), whh,
                          preferred_element_type=f32)                          # (2B, 8H)
            g = pre + rec
            sg = jax.nn.sigmoid(g)              # one EUP slab; tanh only on g-gates below
            cf = sg[:, H:2 * H] * cf + sg[:, :H] * jnp.tanh(g[:, 2 * H:3 * H])
            hf = sg[:, 3 * H:H4] * jnp.tanh(cf)
            cb = (sg[:, H4 + H:H4 + 2 * H] * cb
                  + sg[:, H4:H4 + H] * jnp.tanh(g[:, H4 + 2 * H:H4 + 3 * H]))
            hb = sg[:, H4 + 3 * H:] * jnp.tanh(cb)
            hfs[t], hbs[rt] = hf, hb
        return hfs, hbs

    def stack_time(hfs, hbs):                   # -> (2B, T, 2H), single value build
        rows = [jnp.concatenate([hfs[t], hbs[t]], axis=-1).reshape(BB, 1, 2 * H)
                for t in range(T)]
        return jnp.concatenate(rows, axis=1)

    hfs1, hbs1 = bilstm(x_all, wih1_ref, whh1_ref, bl1_ref)
    o1 = stack_time(hfs1, hbs1)                 # (2B, T, 2H)

    # ---- soft attention alignment (batched over B) + [x, a, x-a, x*a] combine ----------
    m1 = jnp.where(seq1_ref[...] == 0, NEG_MASK, 0.0).astype(f32)     # (B, T)
    m2 = jnp.where(seq2_ref[...] == 0, NEG_MASK, 0.0).astype(f32)
    x1 = o1[:B].astype(bf16)                    # (B, T1, 2H) sentence-1
    x2 = o1[B:].astype(bf16)                    # (B, T2, 2H) sentence-2
    s12 = jnp.einsum('bth,bsh->bts', x1, x2, preferred_element_type=f32)   # (B,T1,T2)
    s21 = jnp.einsum('bsh,bth->bst', x2, x1, preferred_element_type=f32)   # (B,T2,T1)
    w12 = _softmax_last(s12 + m2[:, None, :])
    w21 = _softmax_last(s21 + m1[:, None, :])
    a1 = jnp.einsum('bts,bsh->bth', w12.astype(bf16), x2, preferred_element_type=f32)
    a2 = jnp.einsum('bst,bth->bsh', w21.astype(bf16), x1, preferred_element_type=f32)
    a_all = jnp.concatenate([a1, a2], axis=0)                              # (2B, T, 2H)
    comb = jnp.concatenate([o1, a_all, o1 - a_all, o1 * a_all], axis=-1)   # (2B, T, 8H)

    # ---- composition BiLSTM + mean/max pooling over time (register accumulation) ------
    hfs2, hbs2 = bilstm(comb, wih2_ref, whh2_ref, bl2_ref)
    sf, mf, sb, mb = hfs2[0], hfs2[0], hbs2[0], hbs2[0]
    for t in range(1, T):
        sf = sf + hfs2[t]
        mf = jnp.maximum(mf, hfs2[t])
        sb = sb + hbs2[t]
        mb = jnp.maximum(mb, hbs2[t])
    q = jnp.concatenate([sf * (1.0 / T), sb * (1.0 / T), mf, mb], axis=-1)  # (2B, 4H)
    x = jnp.concatenate([q[:B], q[B:]], axis=-1)                            # (B, 8H)

    # ---- FC head: BN -> Linear -> ELU -> BN -> Linear -> ELU -> BN -> Linear -> Softmax
    def bn(h, g_ref, b_ref):      # training-mode batch statistics over the batch dim
        n = h.shape[0]
        mean = jnp.sum(h, axis=0, keepdims=True) * (1.0 / n)
        d = h - mean
        var = jnp.sum(d * d, axis=0, keepdims=True) * (1.0 / n)
        return d * lax.rsqrt(var + EPS) * g_ref[...] + b_ref[...]

    def elu(h):
        return jnp.where(h > 0, h, jnp.exp(jnp.minimum(h, 0.0)) - 1.0)

    h = bn(x, g0_ref, be0_ref)
    h = elu(jnp.dot(h.astype(bf16), w1_ref[...], preferred_element_type=f32) + b1_ref[...])
    h = bn(h, g1_ref, be1_ref)
    # TODO(synk): nn.Dropout(p=config.dropout) with dropout=0.0 is identity -> omitted.
    h = elu(jnp.dot(h.astype(bf16), w2_ref[...], preferred_element_type=f32) + b2_ref[...])
    h = bn(h, g2_ref, be2_ref)
    logits = jnp.dot(h.astype(bf16), w3_ref[...], preferred_element_type=f32) + b3_ref[...]
    out_ref[...] = _softmax_last(logits)


# ----------------------------------------------------------------------------
# One-time weight packing (outside the per-call jit path)
# ----------------------------------------------------------------------------
def pack_params(params):
    H = params["lstm1"]["whh_f"].shape[0]
    bf16 = jnp.bfloat16

    def pack_lstm(p):
        wih = jnp.concatenate([p["wih_f"], p["wih_b"]], axis=1).astype(bf16)    # (Din, 8H)
        z = jnp.zeros((H, 4 * H), jnp.float32)
        whh = jnp.concatenate(                                                  # block-diag
            [jnp.concatenate([p["whh_f"], z], axis=1),
             jnp.concatenate([z, p["whh_b"]], axis=1)], axis=0).astype(bf16)    # (2H, 8H)
        bias = jnp.concatenate([p["b_f"], p["b_b"]]).reshape(1, -1)             # (1, 8H)
        return wih, whh, bias

    wih1, whh1, bl1 = pack_lstm(params["lstm1"])
    wih2, whh2, bl2 = pack_lstm(params["lstm2"])
    fc = params["fc"]
    r = lambda a: a.reshape(1, -1)
    return dict(
        emb=params["embedding"].astype(jnp.float32),
        bng=r(params["bn_g"]), bnb=r(params["bn_b"]),
        wih1=wih1, whh1=whh1, bl1=bl1, wih2=wih2, whh2=whh2, bl2=bl2,
        g0=r(fc["g0"]), be0=r(fc["be0"]), w1=fc["w1"].astype(bf16), b1=r(fc["b1"]),
        g1=r(fc["g1"]), be1=r(fc["be1"]), w2=fc["w2"].astype(bf16), b2=r(fc["b2"]),
        g2=r(fc["g2"]), be2=r(fc["be2"]), w3=fc["w3"].astype(bf16), b3=r(fc["b3"]))


# ----------------------------------------------------------------------------
# Wrapper: one pallas_call (only int32 id glue stays in XLA)
# ----------------------------------------------------------------------------
def esim_forward(seq1, seq2, kp):
    B, T = seq1.shape
    seq1 = seq1.astype(jnp.int32)
    seq2 = seq2.astype(jnp.int32)
    ids = jnp.concatenate([seq1, seq2], axis=0).reshape(2 * B * T, 1)   # tiny int32 glue

    sim = pl.pallas_call(
        _esim_kernel,
        out_shape=jax.ShapeDtypeStruct((B, 2), jnp.float32),
        in_specs=[_VMEM] * 24,
        out_specs=_VMEM,
    )(ids, kp["emb"], seq1, seq2, kp["bng"], kp["bnb"],
      kp["wih1"], kp["whh1"], kp["bl1"], kp["wih2"], kp["whh2"], kp["bl2"],
      kp["g0"], kp["be0"], kp["w1"], kp["b1"], kp["g1"], kp["be1"],
      kp["w2"], kp["b2"], kp["g2"], kp["be2"], kp["w3"], kp["b3"])
    return sim, sim


# ----------------------------------------------------------------------------
# Deterministic parameter initialization (shapes follow the PyTorch __init__)
# ----------------------------------------------------------------------------
def _uniform(key, shape, scale):
    return jax.random.uniform(key, shape, jnp.float32, -scale, scale)


def _lstm_params(key, din, hidden):
    ks = jax.random.split(key, 8)
    s = hidden ** -0.5
    return {
        "wih_f": _uniform(ks[0], (din, 4 * hidden), s),
        "whh_f": _uniform(ks[1], (hidden, 4 * hidden), s),
        "b_f": _uniform(ks[2], (4 * hidden,), s) + _uniform(ks[3], (4 * hidden,), s),
        "wih_b": _uniform(ks[4], (din, 4 * hidden), s),
        "whh_b": _uniform(ks[5], (hidden, 4 * hidden), s),
        "b_b": _uniform(ks[6], (4 * hidden,), s) + _uniform(ks[7], (4 * hidden,), s),
    }


def _linear_params(key, din, dout):
    k1, k2 = jax.random.split(key)
    s = din ** -0.5
    return _uniform(k1, (din, dout), s), _uniform(k2, (dout,), s)


def init_params(key, vocab, embed_dim, hidden, linear_size):
    k_emb, k_l1, k_l2, k_f1, k_f2, k_f3 = jax.random.split(key, 6)
    w1, b1 = _linear_params(k_f1, 8 * hidden, linear_size)
    w2, b2 = _linear_params(k_f2, linear_size, linear_size)
    w3, b3 = _linear_params(k_f3, linear_size, 2)
    return {
        "embedding": jax.random.normal(k_emb, (vocab, embed_dim), jnp.float32),
        "bn_g": jnp.ones((embed_dim,), jnp.float32),
        "bn_b": jnp.zeros((embed_dim,), jnp.float32),
        "lstm1": _lstm_params(k_l1, embed_dim, hidden),
        "lstm2": _lstm_params(k_l2, 8 * hidden, hidden),
        "fc": {
            "g0": jnp.ones((8 * hidden,), jnp.float32), "be0": jnp.zeros((8 * hidden,), jnp.float32),
            "w1": w1, "b1": b1,
            "g1": jnp.ones((linear_size,), jnp.float32), "be1": jnp.zeros((linear_size,), jnp.float32),
            "w2": w2, "b2": b2,
            "g2": jnp.ones((linear_size,), jnp.float32), "be2": jnp.zeros((linear_size,), jnp.float32),
            "w3": w3, "b3": b3,
        },
    }


if __name__ == "__main__":
    B, T, VOCAB, E, H, L = 2, 8, 50, 32, 32, 64
    key = jax.random.PRNGKey(0)
    k_params, k_s1, k_s2 = jax.random.split(key, 3)

    params = init_params(k_params, VOCAB, E, H, L)
    kp = pack_params(params)        # one-time packing, outside the jitted call path

    # Token sequences; trailing zeros exercise the padding-mask path.
    seq1 = jax.random.randint(k_s1, (B, T), 1, VOCAB).astype(jnp.int32)
    seq2 = jax.random.randint(k_s2, (B, T), 1, VOCAB).astype(jnp.int32)
    seq1 = seq1.at[:, -2:].set(0)
    seq2 = seq2.at[:, -1:].set(0)

    fwd = jax.jit(esim_forward)
    sim, _ = fwd(seq1, seq2, kp)
    sim = jax.block_until_ready(sim)
    assert sim.shape == (B, 2)
    assert bool(jnp.all(jnp.isfinite(sim)))
    print("KERNEL_OK")
</pallas_src>

<mosaic_0001>
module attributes {stable_mosaic.version = 11 : i64} {
  func.func @_esim_kernel(%arg0: memref<32x1xi32, #tpu.memory_space<vmem>>, %arg1: memref<50x32xf32, #tpu.memory_space<vmem>>, %arg2: memref<2x8xi32, #tpu.memory_space<vmem>>, %arg3: memref<2x8xi32, #tpu.memory_space<vmem>>, %arg4: memref<1x32xf32, #tpu.memory_space<vmem>>, %arg5: memref<1x32xf32, #tpu.memory_space<vmem>>, %arg6: memref<32x256xbf16, #tpu.memory_space<vmem>>, %arg7: memref<64x256xbf16, #tpu.memory_space<vmem>>, %arg8: memref<1x256xf32, #tpu.memory_space<vmem>>, %arg9: memref<256x256xbf16, #tpu.memory_space<vmem>>, %arg10: memref<64x256xbf16, #tpu.memory_space<vmem>>, %arg11: memref<1x256xf32, #tpu.memory_space<vmem>>, %arg12: memref<1x256xf32, #tpu.memory_space<vmem>>, %arg13: memref<1x256xf32, #tpu.memory_space<vmem>>, %arg14: memref<256x64xbf16, #tpu.memory_space<vmem>>, %arg15: memref<1x64xf32, #tpu.memory_space<vmem>>, %arg16: memref<1x64xf32, #tpu.memory_space<vmem>>, %arg17: memref<1x64xf32, #tpu.memory_space<vmem>>, %arg18: memref<64x64xbf16, #tpu.memory_space<vmem>>, %arg19: memref<1x64xf32, #tpu.memory_space<vmem>>, %arg20: memref<1x64xf32, #tpu.memory_space<vmem>>, %arg21: memref<1x64xf32, #tpu.memory_space<vmem>>, %arg22: memref<64x2xbf16, #tpu.memory_space<vmem>>, %arg23: memref<1x2xf32, #tpu.memory_space<vmem>>, %arg24: memref<2x2xf32, #tpu.memory_space<vmem>>) attributes {dimension_semantics = [], scalar_prefetch = 0 : i64, scratch_operands = 0 : i64, tpu.core_type = #tpu.core_type<tc>} {
    %0 = tpu.iota {dimensions = array<i32: 1>} : vector<32x50xi32>
    %c0 = arith.constant 0 : index
    %c0_0 = arith.constant 0 : index
    %1 = vector.load %arg0[%c0, %c0_0] : memref<32x1xi32, #tpu.memory_space<vmem>>, vector<32x1xi32>
    %2 = vector.broadcast %1 : vector<32x1xi32> to vector<32x50xi32>
    %3 = arith.cmpi eq, %2, %0 : vector<32x50xi32>
    %4 = arith.extui %3 : vector<32x50xi1> to vector<32x50xi32>
    %5 = arith.sitofp %4 : vector<32x50xi32> to vector<32x50xf32>
    %c0_1 = arith.constant 0 : index
    %c0_2 = arith.constant 0 : index
    %6 = vector.load %arg1[%c0_1, %c0_2] : memref<50x32xf32, #tpu.memory_space<vmem>>, vector<50x32xf32>
    %cst = arith.constant dense<0.000000e+00> : vector<32x32xf32>
    %7 = tpu.matmul %5, %6, %cst {dimension_numbers = #tpu.dot_dimension_numbers<[1], [0], [0], [1], [0, 0, 1, 1], [], []>} : vector<32x50xf32>, vector<50x32xf32>, vector<32x32xf32> -> vector<32x32xf32>
    %8 = vector.shape_cast %7 : vector<32x32xf32> to vector<4x8x32xf32>
    %9 = vector.extract_strided_slice %8 {offsets = [0, 0, 0], sizes = [2, 8, 32], strides = [1, 1, 1]} : vector<4x8x32xf32> to vector<2x8x32xf32>
    %cst_3 = arith.constant dense<0.000000e+00> : vector<32xf32>
    %10 = vector.multi_reduction <add>, %9, %cst_3 [0, 1] : vector<2x8x32xf32> to vector<32xf32>
    %11 = vector.shape_cast %10 : vector<32xf32> to vector<1x1x32xf32>
    %cst_4 = arith.constant 6.250000e-02 : f32
    %12 = vector.broadcast %cst_4 : f32 to vector<1x1x32xf32>
    %13 = arith.mulf %11, %12 : vector<1x1x32xf32>
    %14 = vector.broadcast %13 : vector<1x1x32xf32> to vector<2x8x32xf32>
    %15 = arith.subf %9, %14 : vector<2x8x32xf32>
    %16 = arith.mulf %15, %15 : vector<2x8x32xf32>
    %cst_5 = arith.constant dense<0.000000e+00> : vector<32xf32>
    %17 = vector.multi_reduction <add>, %16, %cst_5 [0, 1] : vector<2x8x32xf32> to vector<32xf32>
    %18 = vector.shape_cast %17 : vector<32xf32> to vector<1x1x32xf32>
    %cst_6 = arith.constant 6.250000e-02 : f32
    %19 = vector.broadcast %cst_6 : f32 to vector<1x1x32xf32>
    %20 = arith.mulf %18, %19 : vector<1x1x32xf32>
    %cst_7 = arith.constant 9.99999974E-6 : f32
    %21 = vector.broadcast %cst_7 : f32 to vector<1x1x32xf32>
    %22 = arith.addf %20, %21 : vector<1x1x32xf32>
    %23 = math.rsqrt %22 : vector<1x1x32xf32>
    %24 = vector.broadcast %23 : vector<1x1x32xf32> to vector<2x8x32xf32>
    %25 = arith.mulf %15, %24 : vector<2x8x32xf32>
    %c0_8 = arith.constant 0 : index
    %c0_9 = arith.constant 0 : index
    %26 = vector.load %arg4[%c0_8, %c0_9] : memref<1x32xf32, #tpu.memory_space<vmem>>, vector<1x32xf32>
    %27 = vector.shape_cast %26 : vector<1x32xf32> to vector<1x1x32xf32>
    %28 = vector.broadcast %27 : vector<1x1x32xf32> to vector<2x8x32xf32>
    %29 = arith.mulf %25, %28 : vector<2x8x32xf32>
    %c0_10 = arith.constant 0 : index
    %c0_11 = arith.constant 0 : index
    %30 = vector.load %arg5[%c0_10, %c0_11] : memref<1x32xf32, #tpu.memory_space<vmem>>, vector<1x32xf32>
    %31 = vector.shape_cast %30 : vector<1x32xf32> to vector<1x1x32xf32>
    %32 = vector.broadcast %31 : vector<1x1x32xf32> to vector<2x8x32xf32>
    %33 = arith.addf %29, %32 : vector<2x8x32xf32>
    %34 = vector.extract_strided_slice %8 {offsets = [2, 0, 0], sizes = [2, 8, 32], strides = [1, 1, 1]} : vector<4x8x32xf32> to vector<2x8x32xf32>
    %cst_12 = arith.constant dense<0.000000e+00> : vector<32xf32>
    %35 = vector.multi_reduction <add>, %34, %cst_12 [0, 1] : vector<2x8x32xf32> to vector<32xf32>
    %36 = vector.shape_cast %35 : vector<32xf32> to vector<1x1x32xf32>
    %cst_13 = arith.constant 6.250000e-02 : f32
    %37 = vector.broadcast %cst_13 : f32 to vector<1x1x32xf32>
    %38 = arith.mulf %36, %37 : vector<1x1x32xf32>
    %39 = vector.broadcast %38 : vector<1x1x32xf32> to vector<2x8x32xf32>
    %40 = arith.subf %34, %39 : vector<2x8x32xf32>
    %41 = arith.mulf %40, %40 : vector<2x8x32xf32>
    %cst_14 = arith.constant dense<0.000000e+00> : vector<32xf32>
    %42 = vector.multi_reduction <add>, %41, %cst_14 [0, 1] : vector<2x8x32xf32> to vector<32xf32>
    %43 = vector.shape_cast %42 : vector<32xf32> to vector<1x1x32xf32>
    %cst_15 = arith.constant 6.250000e-02 : f32
    %44 = vector.broadcast %cst_15 : f32 to vector<1x1x32xf32>
    %45 = arith.mulf %43, %44 : vector<1x1x32xf32>
    %cst_16 = arith.constant 9.99999974E-6 : f32
    %46 = vector.broadcast %cst_16 : f32 to vector<1x1x32xf32>
    %47 = arith.addf %45, %46 : vector<1x1x32xf32>
    %48 = math.rsqrt %47 : vector<1x1x32xf32>
    %49 = vector.broadcast %48 : vector<1x1x32xf32> to vector<2x8x32xf32>
    %50 = arith.mulf %40, %49 : vector<2x8x32xf32>
    %c0_17 = arith.constant 0 : index
    %c0_18 = arith.constant 0 : index
    %51 = vector.load %arg4[%c0_17, %c0_18] : memref<1x32xf32, #tpu.memory_space<vmem>>, vector<1x32xf32>
    %52 = vector.shape_cast %51 : vector<1x32xf32> to vector<1x1x32xf32>
    %53 = vector.broadcast %52 : vector<1x1x32xf32> to vector<2x8x32xf32>
    %54 = arith.mulf %50, %53 : vector<2x8x32xf32>
    %c0_19 = arith.constant 0 : index
    %c0_20 = arith.constant 0 : index
    %55 = vector.load %arg5[%c0_19, %c0_20] : memref<1x32xf32, #tpu.memory_space<vmem>>, vector<1x32xf32>
    %56 = vector.shape_cast %55 : vector<1x32xf32> to vector<1x1x32xf32>
    %57 = vector.broadcast %56 : vector<1x1x32xf32> to vector<2x8x32xf32>
    %58 = arith.addf %54, %57 : vector<2x8x32xf32>
    %59 = tpu.concatenate %33, %58 in 0 : vector<2x8x32xf32>, vector<2x8x32xf32> -> vector<4x8x32xf32>
    %60 = vector.shape_cast %59 : vector<4x8x32xf32> to vector<32x32xf32>
    %61 = arith.truncf %60 : vector<32x32xf32> to vector<32x32xbf16>
    %c0_21 = arith.constant 0 : index
    %c0_22 = arith.constant 0 : index
    %62 = vector.load %arg6[%c0_21, %c0_22] : memref<32x256xbf16, #tpu.memory_space<vmem>>, vector<32x256xbf16>
    %cst_23 = arith.constant dense<0.000000e+00> : vector<32x256xf32>
    %63 = tpu.matmul %61, %62, %cst_23 {dimension_numbers = #tpu.dot_dimension_numbers<[1], [0], [0], [1], [0, 0, 1, 1], [], []>} : vector<32x32xbf16>, vector<32x256xbf16>, vector<32x256xf32> -> vector<32x256xf32>
    %c0_24 = arith.constant 0 : index
    %c0_25 = arith.constant 0 : index
    %64 = vector.load %arg8[%c0_24, %c0_25] : memref<1x256xf32, #tpu.memory_space<vmem>>, vector<1x256xf32>
    %65 = vector.broadcast %64 : vector<1x256xf32> to vector<32x256xf32>
    %66 = arith.addf %63, %65 : vector<32x256xf32>
    %67 = vector.shape_cast %66 : vector<32x256xf32> to vector<4x8x256xf32>
    %c0_26 = arith.constant 0 : index
    %c0_27 = arith.constant 0 : index
    %68 = vector.load %arg7[%c0_26, %c0_27] : memref<64x256xbf16, #tpu.memory_space<vmem>>, vector<64x256xbf16>
    %cst_28 = arith.constant 0.000000e+00 : f32
    %69 = vector.broadcast %cst_28 : f32 to vector<4x32xf32>
    %cst_29 = arith.constant 0.000000e+00 : f32
    %70 = vector.broadcast %cst_29 : f32 to vector<4x32xf32>
    %71 = vector.extract_strided_slice %67 {offsets = [0, 0, 0], sizes = [4, 1, 128], strides = [1, 1, 1]} : vector<4x8x256xf32> to vector<4x1x128xf32>
    %72 = vector.shape_cast %71 : vector<4x1x128xf32> to vector<4x128xf32>
    %73 = vector.extract_strided_slice %67 {offsets = [0, 7, 128], sizes = [4, 1, 128], strides = [1, 1, 1]} : vector<4x8x256xf32> to vector<4x1x128xf32>
    %74 = vector.shape_cast %73 : vector<4x1x128xf32> to vector<4x128xf32>
    %75 = tpu.concatenate %72, %74 in 1 : vector<4x128xf32>, vector<4x128xf32> -> vector<4x256xf32>
    %76 = tpu.concatenate %69, %69 in 1 : vector<4x32xf32>, vector<4x32xf32> -> vector<4x64xf32>
    %77 = arith.truncf %76 : vector<4x64xf32> to vector<4x64xbf16>
    %cst_30 = arith.constant dense<0.000000e+00> : vector<4x256xf32>
    %78 = tpu.matmul %77, %68, %cst_30 {dimension_numbers = #tpu.dot_dimension_numbers<[1], [0], [0], [1], [0, 0, 1, 1], [], []>} : vector<4x64xbf16>, vector<64x256xbf16>, vector<4x256xf32> -> vector<4x256xf32>
    %79 = arith.addf %75, %78 : vector<4x256xf32>
    %80 = arith.negf %79 : vector<4x256xf32>
    %81 = math.exp %80 : vector<4x256xf32>
    %cst_31 = arith.constant 1.000000e+00 : f32
    %82 = vector.broadcast %cst_31 : f32 to vector<4x256xf32>
    %83 = arith.addf %82, %81 : vector<4x256xf32>
    %84 = arith.divf %82, %83 : vector<4x256xf32>
    %85 = vector.extract_strided_slice %84 {offsets = [0, 32], sizes = [4, 32], strides = [1, 1]} : vector<4x256xf32> to vector<4x32xf32>
    %86 = arith.mulf %85, %70 : vector<4x32xf32>
    %87 = vector.extract_strided_slice %84 {offsets = [0, 0], sizes = [4, 32], strides = [1, 1]} : vector<4x256xf32> to vector<4x32xf32>
    %88 = vector.extract_strided_slice %79 {offsets = [0, 64], sizes = [4, 32], strides = [1, 1]} : vector<4x256xf32> to vector<4x32xf32>
    %89 = math.tanh %88 : vector<4x32xf32>
    %90 = arith.mulf %87, %89 : vector<4x32xf32>
    %91 = arith.addf %86, %90 : vector<4x32xf32>
    %92 = vector.extract_strided_slice %84 {offsets = [0, 96], sizes = [4, 32], strides = [1, 1]} : vector<4x256xf32> to vector<4x32xf32>
    %93 = math.tanh %91 : vector<4x32xf32>
    %94 = arith.mulf %92, %93 : vector<4x32xf32>
    %95 = vector.extract_strided_slice %84 {offsets = [0, 160], sizes = [4, 32], strides = [1, 1]} : vector<4x256xf32> to vector<4x32xf32>
    %96 = arith.mulf %95, %70 : vector<4x32xf32>
    %97 = vector.extract_strided_slice %84 {offsets = [0, 128], sizes = [4, 32], strides = [1, 1]} : vector<4x256xf32> to vector<4x32xf32>
    %98 = vector.extract_strided_slice %79 {offsets = [0, 192], sizes = [4, 32], strides = [1, 1]} : vector<4x256xf32> to vector<4x32xf32>
    %99 = math.tanh %98 : vector<4x32xf32>
    %100 = arith.mulf %97, %99 : vector<4x32xf32>
    %101 = arith.addf %96, %100 : vector<4x32xf32>
    %102 = vector.extract_strided_slice %84 {offsets = [0, 224], sizes = [4, 32], strides = [1, 1]} : vector<4x256xf32> to vector<4x32xf32>
    %103 = math.tanh %101 : vector<4x32xf32>
    %104 = arith.mulf %102, %103 : vector<4x32xf32>
    %105 = vector.extract_strided_slice %67 {offsets = [0, 1, 0], sizes = [4, 1, 128], strides = [1, 1, 1]} : vector<4x8x256xf32> to vector<4x1x128xf32>
    %106 = vector.shape_cast %105 : vector<4x1x128xf32> to vector<4x128xf32>
    %107 = vector.extract_strided_slice %67 {offsets = [0, 6, 128], sizes = [4, 1, 128], strides = [1, 1, 1]} : vector<4x8x256xf32> to vector<4x1x128xf32>
    %108 = vector.shape_cast %107 : vector<4x1x128xf32> to vector<4x128xf32>
    %109 = tpu.concatenate %106, %108 in 1 : vector<4x128xf32>, vector<4x128xf32> -> vector<4x256xf32>
    %110 = tpu.concatenate %94, %104 in 1 : vector<4x32xf32>, vector<4x32xf32> -> vector<4x64xf32>
    %111 = arith.truncf %110 : vector<4x64xf32> to vector<4x64xbf16>
    %cst_32 = arith.constant dense<0.000000e+00> : vector<4x256xf32>
    %112 = tpu.matmul %111, %68, %cst_32 {dimension_numbers = #tpu.dot_dimension_numbers<[1], [0], [0], [1], [0, 0, 1, 1], [], []>} : vector<4x64xbf16>, vector<64x256xbf16>, vector<4x256xf32> -> vector<4x256xf32>
    %113 = arith.addf %109, %112 : vector<4x256xf32>
    %114 = arith.negf %113 : vector<4x256xf32>
    %115 = math.exp %114 : vector<4x256xf32>
    %cst_33 = arith.constant 1.000000e+00 : f32
    %116 = vector.broadcast %cst_33 : f32 to vector<4x256xf32>
    %117 = arith.addf %116, %115 : vector<4x256xf32>
    %118 = arith.divf %116, %117 : vector<4x256xf32>
    %119 = vector.extract_strided_slice %118 {offsets = [0, 32], sizes = [4, 32], strides = [1, 1]} : vector<4x256xf32> to vector<4x32xf32>
    %120 = arith.mulf %119, %91 : vector<4x32xf32>
    %121 = vector.extract_strided_slice %118 {offsets = [0, 0], sizes = [4, 32], strides = [1, 1]} : vector<4x256xf32> to vector<4x32xf32>
    %122 = vector.extract_strided_slice %113 {offsets = [0, 64], sizes = [4, 32], strides = [1, 1]} : vector<4x256xf32> to vector<4x32xf32>
    %123 = math.tanh %122 : vector<4x32xf32>
    %124 = arith.mulf %121, %123 : vector<4x32xf32>
    %125 = arith.addf %120, %124 : vector<4x32xf32>
    %126 = vector.extract_strided_slice %118 {offsets = [0, 96], sizes = [4, 32], strides = [1, 1]} : vector<4x256xf32> to vector<4x32xf32>
    %127 = math.tanh %125 : vector<4x32xf32>
    %128 = arith.mulf %126, %127 : vector<4x32xf32>
    %129 = vector.extract_strided_slice %118 {offsets = [0, 160], sizes = [4, 32], strides = [1, 1]} : vector<4x256xf32> to vector<4x32xf32>
    %130 = arith.mulf %129, %101 : vector<4x32xf32>
    %131 = vector.extract_strided_slice %118 {offsets = [0, 128], sizes = [4, 32], strides = [1, 1]} : vector<4x256xf32> to vector<4x32xf32>
    %132 = vector.extract_strided_slice %113 {offsets = [0, 192], sizes = [4, 32], strides = [1, 1]} : vector<4x256xf32> to vector<4x32xf32>
    %133 = math.tanh %132 : vector<4x32xf32>
    %134 = arith.mulf %131, %133 : vector<4x32xf32>
    %135 = arith.addf %130, %134 : vector<4x32xf32>
    %136 = vector.extract_strided_slice %118 {offsets = [0, 224], sizes = [4, 32], strides = [1, 1]} : vector<4x256xf32> to vector<4x32xf32>
    %137 = math.tanh %135 : vector<4x32xf32>
    %138 = arith.mulf %136, %137 : vector<4x32xf32>
    %139 = vector.extract_strided_slice %67 {offsets = [0, 2, 0], sizes = [4, 1, 128], strides = [1, 1, 1]} : vector<4x8x256xf32> to vector<4x1x128xf32>
    %140 = vector.shape_cast %139 : vector<4x1x128xf32> to vector<4x128xf32>
    %141 = vector.extract_strided_slice %67 {offsets = [0, 5, 128], sizes = [4, 1, 128], strides = [1, 1, 1]} : vector<4x8x256xf32> to vector<4x1x128xf32>
    %142 = vector.shape_cast %141 : vector<4x1x128xf32> to vector<4x128xf32>
    %143 = tpu.concatenate %140, %142 in 1 : vector<4x128xf32>, vector<4x128xf32> -> vector<4x256xf32>
    %144 = tpu.concatenate %128, %138 in 1 : vector<4x32xf32>, vector<4x32xf32> -> vector<4x64xf32>
    %145 = arith.truncf %144 : vector<4x64xf32> to vector<4x64xbf16>
    %cst_34 = arith.constant dense<0.000000e+00> : vector<4x256xf32>
    %146 = tpu.matmul %145, %68, %cst_34 {dimension_numbers = #tpu.dot_dimension_numbers<[1], [0], [0], [1], [0, 0, 1, 1], [], []>} : vector<4x64xbf16>, vector<64x256xbf16>, vector<4x256xf32> -> vector<4x256xf32>
    %147 = arith.addf %143, %146 : vector<4x256xf32>
    %148 = arith.negf %147 : vector<4x256xf32>
    %149 = math.exp %148 : vector<4x256xf32>
    %cst_35 = arith.constant 1.000000e+00 : f32
    %150 = vector.broadcast %cst_35 : f32 to vector<4x256xf32>
    %151 = arith.addf %150, %149 : vector<4x256xf32>
    %152 = arith.divf %150, %151 : vector<4x256xf32>
    %153 = vector.extract_strided_slice %152 {offsets = [0, 32], sizes = [4, 32], strides = [1, 1]} : vector<4x256xf32> to vector<4x32xf32>
    %154 = arith.mulf %153, %125 : vector<4x32xf32>
    %155 = vector.extract_strided_slice %152 {offsets = [0, 0], sizes = [4, 32], strides = [1, 1]} : vector<4x256xf32> to vector<4x32xf32>
    %156 = vector.extract_strided_slice %147 {offsets = [0, 64], sizes = [4, 32], strides = [1, 1]} : vector<4x256xf32> to vector<4x32xf32>
    %157 = math.tanh %156 : vector<4x32xf32>
    %158 = arith.mulf %155, %157 : vector<4x32xf32>
    %159 = arith.addf %154, %158 : vector<4x32xf32>
    %160 = vector.extract_strided_slice %152 {offsets = [0, 96], sizes = [4, 32], strides = [1, 1]} : vector<4x256xf32> to vector<4x32xf32>
    %161 = math.tanh %159 : vector<4x32xf32>
    %162 = arith.mulf %160, %161 : vector<4x32xf32>
    %163 = vector.extract_strided_slice %152 {offsets = [0, 160], sizes = [4, 32], strides = [1, 1]} : vector<4x256xf32> to vector<4x32xf32>
    %164 = arith.mulf %163, %135 : vector<4x32xf32>
    %165 = vector.extract_strided_slice %152 {offsets = [0, 128], sizes = [4, 32], strides = [1, 1]} : vector<4x256xf32> to vector<4x32xf32>
    %166 = vector.extract_strided_slice %147 {offsets = [0, 192], sizes = [4, 32], strides = [1, 1]} : vector<4x256xf32> to vector<4x32xf32>
    %167 = math.tanh %166 : vector<4x32xf32>
    %168 = arith.mulf %165, %167 : vector<4x32xf32>
    %169 = arith.addf %164, %168 : vector<4x32xf32>
    %170 = vector.extract_strided_slice %152 {offsets = [0, 224], sizes = [4, 32], strides = [1, 1]} : vector<4x256xf32> to vector<4x32xf32>
    %171 = math.tanh %169 : vector<4x32xf32>
    %172 = arith.mulf %170, %171 : vector<4x32xf32>
    %173 = vector.extract_strided_slice %67 {offsets = [0, 3, 0], sizes = [4, 1, 128], strides = [1, 1, 1]} : vector<4x8x256xf32> to vector<4x1x128xf32>
    %174 = vector.shape_cast %173 : vector<4x1x128xf32> to vector<4x128xf32>
    %175 = vector.extract_strided_slice %67 {offsets = [0, 4, 128], sizes = [4, 1, 128], strides = [1, 1, 1]} : vector<4x8x256xf32> to vector<4x1x128xf32>
    %176 = vector.shape_cast %175 : vector<4x1x128xf32> to vector<4x128xf32>
    %177 = tpu.concatenate %174, %176 in 1 : vector<4x128xf32>, vector<4x128xf32> -> vector<4x256xf32>
    %178 = tpu.concatenate %162, %172 in 1 : vector<4x32xf32>, vector<4x32xf32> -> vector<4x64xf32>
    %179 = arith.truncf %178 : vector<4x64xf32> to vector<4x64xbf16>
    %cst_36 = arith.constant dense<0.000000e+00> : vector<4x256xf32>
    %180 = tpu.matmul %179, %68, %cst_36 {dimension_numbers = #tpu.dot_dimension_numbers<[1], [0], [0], [1], [0, 0, 1, 1], [], []>} : vector<4x64xbf16>, vector<64x256xbf16>, vector<4x256xf32> -> vector<4x256xf32>
    %181 = arith.addf %177, %180 : vector<4x256xf32>
    %182 = arith.negf %181 : vector<4x256xf32>
    %183 = math.exp %182 : vector<4x256xf32>
    %cst_37 = arith.constant 1.000000e+00 : f32
    %184 = vector.broadcast %cst_37 : f32 to vector<4x256xf32>
    %185 = arith.addf %184, %183 : vector<4x256xf32>
    %186 = arith.divf %184, %185 : vector<4x256xf32>
    %187 = vector.extract_strided_slice %186 {offsets = [0, 32], sizes = [4, 32], strides = [1, 1]} : vector<4x256xf32> to vector<4x32xf32>
    %188 = arith.mulf %187, %159 : vector<4x32xf32>
    %189 = vector.extract_strided_slice %186 {offsets = [0, 0], sizes = [4, 32], strides = [1, 1]} : vector<4x256xf32> to vector<4x32xf32>
    %190 = vector.extract_strided_slice %181 {offsets = [0, 64], sizes = [4, 32], strides = [1, 1]} : vector<4x256xf32> to vector<4x32xf32>
    %191 = math.tanh %190 : vector<4x32xf32>
    %192 = arith.mulf %189, %191 : vector<4x32xf32>
    %193 = arith.addf %188, %192 : vector<4x32xf32>
    %194 = vector.extract_strided_slice %186 {offsets = [0, 96], sizes = [4, 32], strides = [1, 1]} : vector<4x256xf32> to vector<4x32xf32>
    %195 = math.tanh %193 : vector<4x32xf32>
    %196 = arith.mulf %194, %195 : vector<4x32xf32>
    %197 = vector.extract_strided_slice %186 {offsets = [0, 160], sizes = [4, 32], strides = [1, 1]} : vector<4x256xf32> to vector<4x32xf32>
    %198 = arith.mulf %197, %169 : vector<4x32xf32>
    %199 = vector.extract_strided_slice %186 {offsets = [0, 128], sizes = [4, 32], strides = [1, 1]} : vector<4x256xf32> to vector<4x32xf32>
    %200 = vector.extract_strided_slice %181 {offsets = [0, 192], sizes = [4, 32], strides = [1, 1]} : vector<4x256xf32> to vector<4x32xf32>
    %201 = math.tanh %200 : vector<4x32xf32>
    %202 = arith.mulf %199, %201 : vector<4x32xf32>
    %203 = arith.addf %198, %202 : vector<4x32xf32>
    %204 = vector.extract_strided_slice %186 {offsets = [0, 224], sizes = [4, 32], strides = [1, 1]} : vector<4x256xf32> to vector<4x32xf32>
    %205 = math.tanh %203 : vector<4x32xf32>
    %206 = arith.mulf %204, %205 : vector<4x32xf32>
    %207 = vector.extract_strided_slice %67 {offsets = [0, 4, 0], sizes = [4, 1, 128], strides = [1, 1, 1]} : vector<4x8x256xf32> to vector<4x1x128xf32>
    %208 = vector.shape_cast %207 : vector<4x1x128xf32> to vector<4x128xf32>
    %209 = vector.extract_strided_slice %67 {offsets = [0, 3, 128], sizes = [4, 1, 128], strides = [1, 1, 1]} : vector<4x8x256xf32> to vector<4x1x128xf32>
    %210 = vector.shape_cast %209 : vector<4x1x128xf32> to vector<4x128xf32>
    %211 = tpu.concatenate %208, %210 in 1 : vector<4x128xf32>, vector<4x128xf32> -> vector<4x256xf32>
    %212 = tpu.concatenate %196, %206 in 1 : vector<4x32xf32>, vector<4x32xf32> -> vector<4x64xf32>
    %213 = arith.truncf %212 : vector<4x64xf32> to vector<4x64xbf16>
    %cst_38 = arith.constant dense<0.000000e+00> : vector<4x256xf32>
    %214 = tpu.matmul %213, %68, %cst_38 {dimension_numbers = #tpu.dot_dimension_numbers<[1], [0], [0], [1], [0, 0, 1, 1], [], []>} : vector<4x64xbf16>, vector<64x256xbf16>, vector<4x256xf32> -> vector<4x256xf32>
    %215 = arith.addf %211, %214 : vector<4x256xf32>
    %216 = arith.negf %215 : vector<4x256xf32>
    %217 = math.exp %216 : vector<4x256xf32>
    %cst_39 = arith.constant 1.000000e+00 : f32
    %218 = vector.broadcast %cst_39 : f32 to vector<4x256xf32>
    %219 = arith.addf %218, %217 : vector<4x256xf32>
    %220 = arith.divf %218, %219 : vector<4x256xf32>
    %221 = vector.extract_strided_slice %220 {offsets = [0, 32], sizes = [4, 32], strides = [1, 1]} : vector<4x256xf32> to vector<4x32xf32>
    %222 = arith.mulf %221, %193 : vector<4x32xf32>
    %223 = vector.extract_strided_slice %220 {offsets = [0, 0], sizes = [4, 32], strides = [1, 1]} : vector<4x256xf32> to vector<4x32xf32>
    %224 = vector.extract_strided_slice %215 {offsets = [0, 64], sizes = [4, 32], strides = [1, 1]} : vector<4x256xf32> to vector<4x32xf32>
    %225 = math.tanh %224 : vector<4x32xf32>
    %226 = arith.mulf %223, %225 : vector<4x32xf32>
    %227 = arith.addf %222, %226 : vector<4x32xf32>
    %228 = vector.extract_strided_slice %220 {offsets = [0, 96], sizes = [4, 32], strides = [1, 1]} : vector<4x256xf32> to vector<4x32xf32>
    %229 = math.tanh %227 : vector<4x32xf32>
    %230 = arith.mulf %228, %229 : vector<4x32xf32>
    %231 = vector.extract_strided_slice %220 {offsets = [0, 160], sizes = [4, 32], strides = [1, 1]} : vector<4x256xf32> to vector<4x32xf32>
    %232 = arith.mulf %231, %203 : vector<4x32xf32>
    %233 = vector.extract_strided_slice %220 {offsets = [0, 128], sizes = [4, 32], strides = [1, 1]} : vector<4x256xf32> to vector<4x32xf32>
    %234 = vector.extract_strided_slice %215 {offsets = [0, 192], sizes = [4, 32], strides = [1, 1]} : vector<4x256xf32> to vector<4x32xf32>
    %235 = math.tanh %234 : vector<4x32xf32>
    %236 = arith.mulf %233, %235 : vector<4x32xf32>
    %237 = arith.addf %232, %236 : vector<4x32xf32>
    %238 = vector.extract_strided_slice %220 {offsets = [0, 224], sizes = [4, 32], strides = [1, 1]} : vector<4x256xf32> to vector<4x32xf32>
    %239 = math.tanh %237 : vector<4x32xf32>
    %240 = arith.mulf %238, %239 : vector<4x32xf32>
    %241 = vector.extract_strided_slice %67 {offsets = [0, 5, 0], sizes = [4, 1, 128], strides = [1, 1, 1]} : vector<4x8x256xf32> to vector<4x1x128xf32>
    %242 = vector.shape_cast %241 : vector<4x1x128xf32> to vector<4x128xf32>
    %243 = vector.extract_strided_slice %67 {offsets = [0, 2, 128], sizes = [4, 1, 128], strides = [1, 1, 1]} : vector<4x8x256xf32> to vector<4x1x128xf32>
    %244 = vector.shape_cast %243 : vector<4x1x128xf32> to vector<4x128xf32>
    %245 = tpu.concatenate %242, %244 in 1 : vector<4x128xf32>, vector<4x128xf32> -> vector<4x256xf32>
    %246 = tpu.concatenate %230, %240 in 1 : vector<4x32xf32>, vector<4x32xf32> -> vector<4x64xf32>
    %247 = arith.truncf %246 : vector<4x64xf32> to vector<4x64xbf16>
    %cst_40 = arith.constant dense<0.000000e+00> : vector<4x256xf32>
    %248 = tpu.matmul %247, %68, %cst_40 {dimension_numbers = #tpu.dot_dimension_numbers<[1], [0], [0], [1], [0, 0, 1, 1], [], []>} : vector<4x64xbf16>, vector<64x256xbf16>, vector<4x256xf32> -> vector<4x256xf32>
    %249 = arith.addf %245, %248 : vector<4x256xf32>
    %250 = arith.negf %249 : vector<4x256xf32>
    %251 = math.exp %250 : vector<4x256xf32>
    %cst_41 = arith.constant 1.000000e+00 : f32
    %252 = vector.broadcast %cst_41 : f32 to vector<4x256xf32>
    %253 = arith.addf %252, %251 : vector<4x256xf32>
    %254 = arith.divf %252, %253 : vector<4x256xf32>
    %255 = vector.extract_strided_slice %254 {offsets = [0, 32], sizes = [4, 32], strides = [1, 1]} : vector<4x256xf32> to vector<4x32xf32>
    %256 = arith.mulf %255, %227 : vector<4x32xf32>
    %257 = vector.extract_strided_slice %254 {offsets = [0, 0], sizes = [4, 32], strides = [1, 1]} : vector<4x256xf32> to vector<4x32xf32>
    %258 = vector.extract_strided_slice %249 {offsets = [0, 64], sizes = [4, 32], strides = [1, 1]} : vector<4x256xf32> to vector<4x32xf32>
    %259 = math.tanh %258 : vector<4x32xf32>
    %260 = arith.mulf %257, %259 : vector<4x32xf32>
    %261 = arith.addf %256, %260 : vector<4x32xf32>
    %262 = vector.extract_strided_slice %254 {offsets = [0, 96], sizes = [4, 32], strides = [1, 1]} : vector<4x256xf32> to vector<4x32xf32>
    %263 = math.tanh %261 : vector<4x32xf32>
    %264 = arith.mulf %262, %263 : vector<4x32xf32>
    %265 = vector.extract_strided_slice %254 {offsets = [0, 160], sizes = [4, 32], strides = [1, 1]} : vector<4x256xf32> to vector<4x32xf32>
    %266 = arith.mulf %265, %237 : vector<4x32xf32>
    %267 = vector.extract_strided_slice %254 {offsets = [0, 128], sizes = [4, 32], strides = [1, 1]} : vector<4x256xf32> to vector<4x32xf32>
    %268 = vector.extract_strided_slice %249 {offsets = [0, 192], sizes = [4, 32], strides = [1, 1]} : vector<4x256xf32> to vector<4x32xf32>
    %269 = math.tanh %268 : vector<4x32xf32>
    %270 = arith.mulf %267, %269 : vector<4x32xf32>
    %271 = arith.addf %266, %270 : vector<4x32xf32>
    %272 = vector.extract_strided_slice %254 {offsets = [0, 224], sizes = [4, 32], strides = [1, 1]} : vector<4x256xf32> to vector<4x32xf32>
    %273 = math.tanh %271 : vector<4x32xf32>
    %274 = arith.mulf %272, %273 : vector<4x32xf32>
    %275 = vector.extract_strided_slice %67 {offsets = [0, 6, 0], sizes = [4, 1, 128], strides = [1, 1, 1]} : vector<4x8x256xf32> to vector<4x1x128xf32>
    %276 = vector.shape_cast %275 : vector<4x1x128xf32> to vector<4x128xf32>
    %277 = vector.extract_strided_slice %67 {offsets = [0, 1, 128], sizes = [4, 1, 128], strides = [1, 1, 1]} : vector<4x8x256xf32> to vector<4x1x128xf32>
    %278 = vector.shape_cast %277 : vector<4x1x128xf32> to vector<4x128xf32>
    %279 = tpu.concatenate %276, %278 in 1 : vector<4x128xf32>, vector<4x128xf32> -> vector<4x256xf32>
    %280 = tpu.concatenate %264, %274 in 1 : vector<4x32xf32>, vector<4x32xf32> -> vector<4x64xf32>
    %281 = arith.truncf %280 : vector<4x64xf32> to vector<4x64xbf16>
    %cst_42 = arith.constant dense<0.000000e+00> : vector<4x256xf32>
    %282 = tpu.matmul %281, %68, %cst_42 {dimension_numbers = #tpu.dot_dimension_numbers<[1], [0], [0], [1], [0, 0, 1, 1], [], []>} : vector<4x64xbf16>, vector<64x256xbf16>, vector<4x256xf32> -> vector<4x256xf32>
    %283 = arith.addf %279, %282 : vector<4x256xf32>
    %284 = arith.negf %283 : vector<4x256xf32>
    %285 = math.exp %284 : vector<4x256xf32>
    %cst_43 = arith.constant 1.000000e+00 : f32
    %286 = vector.broadcast %cst_43 : f32 to vector<4x256xf32>
    %287 = arith.addf %286, %285 : vector<4x256xf32>
    %288 = arith.divf %286, %287 : vector<4x256xf32>
    %289 = vector.extract_strided_slice %288 {offsets = [0, 32], sizes = [4, 32], strides = [1, 1]} : vector<4x256xf32> to vector<4x32xf32>
    %290 = arith.mulf %289, %261 : vector<4x32xf32>
    %291 = vector.extract_strided_slice %288 {offsets = [0, 0], sizes = [4, 32], strides = [1, 1]} : vector<4x256xf32> to vector<4x32xf32>
    %292 = vector.extract_strided_slice %283 {offsets = [0, 64], sizes = [4, 32], strides = [1, 1]} : vector<4x256xf32> to vector<4x32xf32>
    %293 = math.tanh %292 : vector<4x32xf32>
    %294 = arith.mulf %291, %293 : vector<4x32xf32>
    %295 = arith.addf %290, %294 : vector<4x32xf32>
    %296 = vector.extract_strided_slice %288 {offsets = [0, 96], sizes = [4, 32], strides = [1, 1]} : vector<4x256xf32> to vector<4x32xf32>
    %297 = math.tanh %295 : vector<4x32xf32>
    %298 = arith.mulf %296, %297 : vector<4x32xf32>
    %299 = vector.extract_strided_slice %288 {offsets = [0, 160], sizes = [4, 32], strides = [1, 1]} : vector<4x256xf32> to vector<4x32xf32>
    %300 = arith.mulf %299, %271 : vector<4x32xf32>
    %301 = vector.extract_strided_slice %288 {offsets = [0, 128], sizes = [4, 32], strides = [1, 1]} : vector<4x256xf32> to vector<4x32xf32>
    %302 = vector.extract_strided_slice %283 {offsets = [0, 192], sizes = [4, 32], strides = [1, 1]} : vector<4x256xf32> to vector<4x32xf32>
    %303 = math.tanh %302 : vector<4x32xf32>
    %304 = arith.mulf %301, %303 : vector<4x32xf32>
    %305 = arith.addf %300, %304 : vector<4x32xf32>
    %306 = vector.extract_strided_slice %288 {offsets = [0, 224], sizes = [4, 32], strides = [1, 1]} : vector<4x256xf32> to vector<4x32xf32>
    %307 = math.tanh %305 : vector<4x32xf32>
    %308 = arith.mulf %306, %307 : vector<4x32xf32>
    %309 = vector.extract_strided_slice %67 {offsets = [0, 7, 0], sizes = [4, 1, 128], strides = [1, 1, 1]} : vector<4x8x256xf32> to vector<4x1x128xf32>
    %310 = vector.shape_cast %309 : vector<4x1x128xf32> to vector<4x128xf32>
    %311 = vector.extract_strided_slice %67 {offsets = [0, 0, 128], sizes = [4, 1, 128], strides = [1, 1, 1]} : vector<4x8x256xf32> to vector<4x1x128xf32>
    %312 = vector.shape_cast %311 : vector<4x1x128xf32> to vector<4x128xf32>
    %313 = tpu.concatenate %310, %312 in 1 : vector<4x128xf32>, vector<4x128xf32> -> vector<4x256xf32>
    %314 = tpu.concatenate %298, %308 in 1 : vector<4x32xf32>, vector<4x32xf32> -> vector<4x64xf32>
    %315 = arith.truncf %314 : vector<4x64xf32> to vector<4x64xbf16>
    %cst_44 = arith.constant dense<0.000000e+00> : vector<4x256xf32>
    %316 = tpu.matmul %315, %68, %cst_44 {dimension_numbers = #tpu.dot_dimension_numbers<[1], [0], [0], [1], [0, 0, 1, 1], [], []>} : vector<4x64xbf16>, vector<64x256xbf16>, vector<4x256xf32> -> vector<4x256xf32>
    %317 = arith.addf %313, %316 : vector<4x256xf32>
    %318 = arith.negf %317 : vector<4x256xf32>
    %319 = math.exp %318 : vector<4x256xf32>
    %cst_45 = arith.constant 1.000000e+00 : f32
    %320 = vector.broadcast %cst_45 : f32 to vector<4x256xf32>
    %321 = arith.addf %320, %319 : vector<4x256xf32>
    %322 = arith.divf %320, %321 : vector<4x256xf32>
    %323 = vector.extract_strided_slice %322 {offsets = [0, 32], sizes = [4, 32], strides = [1, 1]} : vector<4x256xf32> to vector<4x32xf32>
    %324 = arith.mulf %323, %295 : vector<4x32xf32>
    %325 = vector.extract_strided_slice %322 {offsets = [0, 0], sizes = [4, 32], strides = [1, 1]} : vector<4x256xf32> to vector<4x32xf32>
    %326 = vector.extract_strided_slice %317 {offsets = [0, 64], sizes = [4, 32], strides = [1, 1]} : vector<4x256xf32> to vector<4x32xf32>
    %327 = math.tanh %326 : vector<4x32xf32>
    %328 = arith.mulf %325, %327 : vector<4x32xf32>
    %329 = arith.addf %324, %328 : vector<4x32xf32>
    %330 = vector.extract_strided_slice %322 {offsets = [0, 96], sizes = [4, 32], strides = [1, 1]} : vector<4x256xf32> to vector<4x32xf32>
    %331 = math.tanh %329 : vector<4x32xf32>
    %332 = arith.mulf %330, %331 : vector<4x32xf32>
    %333 = vector.extract_strided_slice %322 {offsets = [0, 160], sizes = [4, 32], strides = [1, 1]} : vector<4x256xf32> to vector<4x32xf32>
    %334 = arith.mulf %333, %305 : vector<4x32xf32>
    %335 = vector.extract_strided_slice %322 {offsets = [0, 128], sizes = [4, 32], strides = [1, 1]} : vector<4x256xf32> to vector<4x32xf32>
    %336 = vector.extract_strided_slice %317 {offsets = [0, 192], sizes = [4, 32], strides = [1, 1]} : vector<4x256xf32> to vector<4x32xf32>
    %337 = math.tanh %336 : vector<4x32xf32>
    %338 = arith.mulf %335, %337 : vector<4x32xf32>
    %339 = arith.addf %334, %338 : vector<4x32xf32>
    %340 = vector.extract_strided_slice %322 {offsets = [0, 224], sizes = [4, 32], strides = [1, 1]} : vector<4x256xf32> to vector<4x32xf32>
    %341 = math.tanh %339 : vector<4x32xf32>
    %342 = arith.mulf %340, %341 : vector<4x32xf32>
    %343 = tpu.concatenate %94, %342 in 1 : vector<4x32xf32>, vector<4x32xf32> -> vector<4x64xf32>
    %344 = vector.shape_cast %343 : vector<4x64xf32> to vector<4x1x64xf32>
    %345 = tpu.concatenate %128, %308 in 1 : vector<4x32xf32>, vector<4x32xf32> -> vector<4x64xf32>
    %346 = vector.shape_cast %345 : vector<4x64xf32> to vector<4x1x64xf32>
    %347 = tpu.concatenate %162, %274 in 1 : vector<4x32xf32>, vector<4x32xf32> -> vector<4x64xf32>
    %348 = vector.shape_cast %347 : vector<4x64xf32> to vector<4x1x64xf32>
    %349 = tpu.concatenate %196, %240 in 1 : vector<4x32xf32>, vector<4x32xf32> -> vector<4x64xf32>
    %350 = vector.shape_cast %349 : vector<4x64xf32> to vector<4x1x64xf32>
    %351 = tpu.concatenate %230, %206 in 1 : vector<4x32xf32>, vector<4x32xf32> -> vector<4x64xf32>
    %352 = vector.shape_cast %351 : vector<4x64xf32> to vector<4x1x64xf32>
    %353 = tpu.concatenate %264, %172 in 1 : vector<4x32xf32>, vector<4x32xf32> -> vector<4x64xf32>
    %354 = vector.shape_cast %353 : vector<4x64xf32> to vector<4x1x64xf32>
    %355 = tpu.concatenate %298, %138 in 1 : vector<4x32xf32>, vector<4x32xf32> -> vector<4x64xf32>
    %356 = vector.shape_cast %355 : vector<4x64xf32> to vector<4x1x64xf32>
    %357 = tpu.concatenate %332, %104 in 1 : vector<4x32xf32>, vector<4x32xf32> -> vector<4x64xf32>
    %358 = vector.shape_cast %357 : vector<4x64xf32> to vector<4x1x64xf32>
    %359 = tpu.concatenate %344, %346, %348, %350, %352, %354, %356, %358 in 1 : vector<4x1x64xf32>, vector<4x1x64xf32>, vector<4x1x64xf32>, vector<4x1x64xf32>, vector<4x1x64xf32>, vector<4x1x64xf32>, vector<4x1x64xf32>, vector<4x1x64xf32> -> vector<4x8x64xf32>
    %c0_46 = arith.constant 0 : index
    %c0_47 = arith.constant 0 : index
    %360 = vector.load %arg2[%c0_46, %c0_47] : memref<2x8xi32, #tpu.memory_space<vmem>>, vector<2x8xi32>
    %c0_i32 = arith.constant 0 : i32
    %361 = vector.broadcast %c0_i32 : i32 to vector<2x8xi32>
    %362 = arith.cmpi eq, %360, %361 : vector<2x8xi32>
    %cst_48 = arith.constant -1.000000e+09 : f32
    %cst_49 = arith.constant 0.000000e+00 : f32
    %363 = vector.broadcast %cst_48 : f32 to vector<2x8xf32>
    %364 = vector.broadcast %cst_49 : f32 to vector<2x8xf32>
    %365 = arith.select %362, %363, %364 : vector<2x8xi1>, vector<2x8xf32>
    %c0_50 = arith.constant 0 : index
    %c0_51 = arith.constant 0 : index
    %366 = vector.load %arg3[%c0_50, %c0_51] : memref<2x8xi32, #tpu.memory_space<vmem>>, vector<2x8xi32>
    %c0_i32_52 = arith.constant 0 : i32
    %367 = vector.broadcast %c0_i32_52 : i32 to vector<2x8xi32>
    %368 = arith.cmpi eq, %366, %367 : vector<2x8xi32>
    %cst_53 = arith.constant -1.000000e+09 : f32
    %cst_54 = arith.constant 0.000000e+00 : f32
    %369 = vector.broadcast %cst_53 : f32 to vector<2x8xf32>
    %370 = vector.broadcast %cst_54 : f32 to vector<2x8xf32>
    %371 = arith.select %368, %369, %370 : vector<2x8xi1>, vector<2x8xf32>
    %372 = vector.extract_strided_slice %359 {offsets = [0, 0, 0], sizes = [2, 8, 64], strides = [1, 1, 1]} : vector<4x8x64xf32> to vector<2x8x64xf32>
    %373 = arith.truncf %372 : vector<2x8x64xf32> to vector<2x8x64xbf16>
    %374 = vector.extract_strided_slice %359 {offsets = [2, 0, 0], sizes = [2, 8, 64], strides = [1, 1, 1]} : vector<4x8x64xf32> to vector<2x8x64xf32>
    %375 = arith.truncf %374 : vector<2x8x64xf32> to vector<2x8x64xbf16>
    "tpu.trace_start"() <{level = 10 : i32, message = "bth,bsh->bts"}> : () -> ()
    %cst_55 = arith.constant dense<0.000000e+00> : vector<2x8x8xf32>
    %376 = tpu.matmul %373, %375, %cst_55 {dimension_numbers = #tpu.dot_dimension_numbers<[2], [2], [1], [1], [0, 0, 0, 1, 1, 1], [0], [0]>} : vector<2x8x64xbf16>, vector<2x8x64xbf16>, vector<2x8x8xf32> -> vector<2x8x8xf32>
    "tpu.trace_stop"() : () -> ()
    "tpu.trace_start"() <{level = 10 : i32, message = "bsh,bth->bst"}> : () -> ()
    %cst_56 = arith.constant dense<0.000000e+00> : vector<2x8x8xf32>
    %377 = tpu.matmul %375, %373, %cst_56 {dimension_numbers = #tpu.dot_dimension_numbers<[2], [2], [1], [1], [0, 0, 0, 1, 1, 1], [0], [0]>} : vector<2x8x64xbf16>, vector<2x8x64xbf16>, vector<2x8x8xf32> -> vector<2x8x8xf32>
    "tpu.trace_stop"() : () -> ()
    %378 = vector.shape_cast %371 : vector<2x8xf32> to vector<2x1x8xf32>
    %379 = vector.broadcast %378 : vector<2x1x8xf32> to vector<2x8x8xf32>
    %380 = arith.addf %376, %379 : vector<2x8x8xf32>
    %cst_57 = arith.constant dense<0xFF800000> : vector<2x8xf32>
    %381 = vector.multi_reduction <maximumf>, %380, %cst_57 [2] : vector<2x8x8xf32> to vector<2x8xf32>
    %382 = vector.shape_cast %381 : vector<2x8xf32> to vector<2x8x1xf32>
    %383 = vector.broadcast %382 : vector<2x8x1xf32> to vector<2x8x8xf32>
    %384 = arith.subf %380, %383 : vector<2x8x8xf32>
    %385 = math.exp %384 : vector<2x8x8xf32>
    %cst_58 = arith.constant dense<0.000000e+00> : vector<2x8xf32>
    %386 = vector.multi_reduction <add>, %385, %cst_58 [2] : vector<2x8x8xf32> to vector<2x8xf32>
    %387 = vector.shape_cast %386 : vector<2x8xf32> to vector<2x8x1xf32>
    %388 = tpu.reciprocal %387 {approx = true} : vector<2x8x1xf32> -> vector<2x8x1xf32>
    %389 = vector.broadcast %388 : vector<2x8x1xf32> to vector<2x8x8xf32>
    %390 = arith.mulf %385, %389 : vector<2x8x8xf32>
    %391 = vector.shape_cast %365 : vector<2x8xf32> to vector<2x1x8xf32>
    %392 = vector.broadcast %391 : vector<2x1x8xf32> to vector<2x8x8xf32>
    %393 = arith.addf %377, %392 : vector<2x8x8xf32>
    %cst_59 = arith.constant dense<0xFF800000> : vector<2x8xf32>
    %394 = vector.multi_reduction <maximumf>, %393, %cst_59 [2] : vector<2x8x8xf32> to vector<2x8xf32>
    %395 = vector.shape_cast %394 : vector<2x8xf32> to vector<2x8x1xf32>
    %396 = vector.broadcast %395 : vector<2x8x1xf32> to vector<2x8x8xf32>
    %397 = arith.subf %393, %396 : vector<2x8x8xf32>
    %398 = math.exp %397 : vector<2x8x8xf32>
    %cst_60 = arith.constant dense<0.000000e+00> : vector<2x8xf32>
    %399 = vector.multi_reduction <add>, %398, %cst_60 [2] : vector<2x8x8xf32> to vector<2x8xf32>
    %400 = vector.shape_cast %399 : vector<2x8xf32> to vector<2x8x1xf32>
    %401 = tpu.reciprocal %400 {approx = true} : vector<2x8x1xf32> -> vector<2x8x1xf32>
    %402 = vector.broadcast %401 : vector<2x8x1xf32> to vector<2x8x8xf32>
    %403 = arith.mulf %398, %402 : vector<2x8x8xf32>
    %404 = arith.truncf %390 : vector<2x8x8xf32> to vector<2x8x8xbf16>
    "tpu.trace_start"() <{level = 10 : i32, message = "bts,bsh->bth"}> : () -> ()
    %cst_61 = arith.constant dense<0.000000e+00> : vector<2x8x64xf32>
    %405 = tpu.matmul %404, %375, %cst_61 {dimension_numbers = #tpu.dot_dimension_numbers<[2], [1], [1], [2], [0, 0, 0, 1, 1, 2], [0], [0]>} : vector<2x8x8xbf16>, vector<2x8x64xbf16>, vector<2x8x64xf32> -> vector<2x8x64xf32>
    "tpu.trace_stop"() : () -> ()
    %406 = arith.truncf %403 : vector<2x8x8xf32> to vector<2x8x8xbf16>
    "tpu.trace_start"() <{level = 10 : i32, message = "bst,bth->bsh"}> : () -> ()
    %cst_62 = arith.constant dense<0.000000e+00> : vector<2x8x64xf32>
    %407 = tpu.matmul %406, %373, %cst_62 {dimension_numbers = #tpu.dot_dimension_numbers<[2], [1], [1], [2], [0, 0, 0, 1, 1, 2], [0], [0]>} : vector<2x8x8xbf16>, vector<2x8x64xbf16>, vector<2x8x64xf32> -> vector<2x8x64xf32>
    "tpu.trace_stop"() : () -> ()
    %408 = tpu.concatenate %405, %407 in 0 : vector<2x8x64xf32>, vector<2x8x64xf32> -> vector<4x8x64xf32>
    %409 = arith.subf %359, %408 : vector<4x8x64xf32>
    %410 = arith.mulf %359, %408 : vector<4x8x64xf32>
    %411 = tpu.concatenate %359, %408, %409, %410 in 2 : vector<4x8x64xf32>, vector<4x8x64xf32>, vector<4x8x64xf32>, vector<4x8x64xf32> -> vector<4x8x256xf32>
    %412 = vector.shape_cast %411 : vector<4x8x256xf32> to vector<32x256xf32>
    %413 = arith.truncf %412 : vector<32x256xf32> to vector<32x256xbf16>
    %c0_63 = arith.constant 0 : index
    %c0_64 = arith.constant 0 : index
    %414 = vector.load %arg9[%c0_63, %c0_64] : memref<256x256xbf16, #tpu.memory_space<vmem>>, vector<256x256xbf16>
    %cst_65 = arith.constant dense<0.000000e+00> : vector<32x256xf32>
    %415 = tpu.matmul %413, %414, %cst_65 {dimension_numbers = #tpu.dot_dimension_numbers<[1], [0], [0], [1], [0, 0, 1, 1], [], []>} : vector<32x256xbf16>, vector<256x256xbf16>, vector<32x256xf32> -> vector<32x256xf32>
    %c0_66 = arith.constant 0 : index
    %c0_67 = arith.constant 0 : index
    %416 = vector.load %arg11[%c0_66, %c0_67] : memref<1x256xf32, #tpu.memory_space<vmem>>, vector<1x256xf32>
    %417 = vector.broadcast %416 : vector<1x256xf32> to vector<32x256xf32>
    %418 = arith.addf %415, %417 : vector<32x256xf32>
    %419 = vector.shape_cast %418 : vector<32x256xf32> to vector<4x8x256xf32>
    %c0_68 = arith.constant 0 : index
    %c0_69 = arith.constant 0 : index
    %420 = vector.load %arg10[%c0_68, %c0_69] : memref<64x256xbf16, #tpu.memory_space<vmem>>, vector<64x256xbf16>
    %cst_70 = arith.constant 0.000000e+00 : f32
    %421 = vector.broadcast %cst_70 : f32 to vector<4x32xf32>
    %cst_71 = arith.constant 0.000000e+00 : f32
    %422 = vector.broadcast %cst_71 : f32 to vector<4x32xf32>
    %423 = vector.extract_strided_slice %419 {offsets = [0, 0, 0], sizes = [4, 1, 128], strides = [1, 1, 1]} : vector<4x8x256xf32> to vector<4x1x128xf32>
    %424 = vector.shape_cast %423 : vector<4x1x128xf32> to vector<4x128xf32>
    %425 = vector.extract_strided_slice %419 {offsets = [0, 7, 128], sizes = [4, 1, 128], strides = [1, 1, 1]} : vector<4x8x256xf32> to vector<4x1x128xf32>
    %426 = vector.shape_cast %425 : vector<4x1x128xf32> to vector<4x128xf32>
    %427 = tpu.concatenate %424, %426 in 1 : vector<4x128xf32>, vector<4x128xf32> -> vector<4x256xf32>
    %428 = tpu.concatenate %421, %421 in 1 : vector<4x32xf32>, vector<4x32xf32> -> vector<4x64xf32>
    %429 = arith.truncf %428 : vector<4x64xf32> to vector<4x64xbf16>
    %cst_72 = arith.constant dense<0.000000e+00> : vector<4x256xf32>
    %430 = tpu.matmul %429, %420, %cst_72 {dimension_numbers = #tpu.dot_dimension_numbers<[1], [0], [0], [1], [0, 0, 1, 1], [], []>} : vector<4x64xbf16>, vector<64x256xbf16>, vector<4x256xf32> -> vector<4x256xf32>
    %431 = arith.addf %427, %430 : vector<4x256xf32>
    %432 = arith.negf %431 : vector<4x256xf32>
    %433 = math.exp %432 : vector<4x256xf32>
    %cst_73 = arith.constant 1.000000e+00 : f32
    %434 = vector.broadcast %cst_73 : f32 to vector<4x256xf32>
    %435 = arith.addf %434, %433 : vector<4x256xf32>
    %436 = arith.divf %434, %435 : vector<4x256xf32>
    %437 = vector.extract_strided_slice %436 {offsets = [0, 32], sizes = [4, 32], strides = [1, 1]} : vector<4x256xf32> to vector<4x32xf32>
    %438 = arith.mulf %437, %422 : vector<4x32xf32>
    %439 = vector.extract_strided_slice %436 {offsets = [0, 0], sizes = [4, 32], strides = [1, 1]} : vector<4x256xf32> to vector<4x32xf32>
    %440 = vector.extract_strided_slice %431 {offsets = [0, 64], sizes = [4, 32], strides = [1, 1]} : vector<4x256xf32> to vector<4x32xf32>
    %441 = math.tanh %440 : vector<4x32xf32>
    %442 = arith.mulf %439, %441 : vector<4x32xf32>
    %443 = arith.addf %438, %442 : vector<4x32xf32>
    %444 = vector.extract_strided_slice %436 {offsets = [0, 96], sizes = [4, 32], strides = [1, 1]} : vector<4x256xf32> to vector<4x32xf32>
    %445 = math.tanh %443 : vector<4x32xf32>
    %446 = arith.mulf %444, %445 : vector<4x32xf32>
    %447 = vector.extract_strided_slice %436 {offsets = [0, 160], sizes = [4, 32], strides = [1, 1]} : vector<4x256xf32> to vector<4x32xf32>
    %448 = arith.mulf %447, %422 : vector<4x32xf32>
    %449 = vector.extract_strided_slice %436 {offsets = [0, 128], sizes = [4, 32], strides = [1, 1]} : vector<4x256xf32> to vector<4x32xf32>
    %450 = vector.extract_strided_slice %431 {offsets = [0, 192], sizes = [4, 32], strides = [1, 1]} : vector<4x256xf32> to vector<4x32xf32>
    %451 = math.tanh %450 : vector<4x32xf32>
    %452 = arith.mulf %449, %451 : vector<4x32xf32>
    %453 = arith.addf %448, %452 : vector<4x32xf32>
    %454 = vector.extract_strided_slice %436 {offsets = [0, 224], sizes = [4, 32], strides = [1, 1]} : vector<4x256xf32> to vector<4x32xf32>
    %455 = math.tanh %453 : vector<4x32xf32>
    %456 = arith.mulf %454, %455 : vector<4x32xf32>
    %457 = vector.extract_strided_slice %419 {offsets = [0, 1, 0], sizes = [4, 1, 128], strides = [1, 1, 1]} : vector<4x8x256xf32> to vector<4x1x128xf32>
    %458 = vector.shape_cast %457 : vector<4x1x128xf32> to vector<4x128xf32>
    %459 = vector.extract_strided_slice %419 {offsets = [0, 6, 128], sizes = [4, 1, 128], strides = [1, 1, 1]} : vector<4x8x256xf32> to vector<4x1x128xf32>
    %460 = vector.shape_cast %459 : vector<4x1x128xf32> to vector<4x128xf32>
    %461 = tpu.concatenate %458, %460 in 1 : vector<4x128xf32>, vector<4x128xf32> -> vector<4x256xf32>
    %462 = tpu.concatenate %446, %456 in 1 : vector<4x32xf32>, vector<4x32xf32> -> vector<4x64xf32>
    %463 = arith.truncf %462 : vector<4x64xf32> to vector<4x64xbf16>
    %cst_74 = arith.constant dense<0.000000e+00> : vector<4x256xf32>
    %464 = tpu.matmul %463, %420, %cst_74 {dimension_numbers = #tpu.dot_dimension_numbers<[1], [0], [0], [1], [0, 0, 1, 1], [], []>} : vector<4x64xbf16>, vector<64x256xbf16>, vector<4x256xf32> -> vector<4x256xf32>
    %465 = arith.addf %461, %464 : vector<4x256xf32>
    %466 = arith.negf %465 : vector<4x256xf32>
    %467 = math.exp %466 : vector<4x256xf32>
    %cst_75 = arith.constant 1.000000e+00 : f32
    %468 = vector.broadcast %cst_75 : f32 to vector<4x256xf32>
    %469 = arith.addf %468, %467 : vector<4x256xf32>
    %470 = arith.divf %468, %469 : vector<4x256xf32>
    %471 = vector.extract_strided_slice %470 {offsets = [0, 32], sizes = [4, 32], strides = [1, 1]} : vector<4x256xf32> to vector<4x32xf32>
    %472 = arith.mulf %471, %443 : vector<4x32xf32>
    %473 = vector.extract_strided_slice %470 {offsets = [0, 0], sizes = [4, 32], strides = [1, 1]} : vector<4x256xf32> to vector<4x32xf32>
    %474 = vector.extract_strided_slice %465 {offsets = [0, 64], sizes = [4, 32], strides = [1, 1]} : vector<4x256xf32> to vector<4x32xf32>
    %475 = math.tanh %474 : vector<4x32xf32>
    %476 = arith.mulf %473, %475 : vector<4x32xf32>
    %477 = arith.addf %472, %476 : vector<4x32xf32>
    %478 = vector.extract_strided_slice %470 {offsets = [0, 96], sizes = [4, 32], strides = [1, 1]} : vector<4x256xf32> to vector<4x32xf32>
    %479 = math.tanh %477 : vector<4x32xf32>
    %480 = arith.mulf %478, %479 : vector<4x32xf32>
    %481 = vector.extract_strided_slice %470 {offsets = [0, 160], sizes = [4, 32], strides = [1, 1]} : vector<4x256xf32> to vector<4x32xf32>
    %482 = arith.mulf %481, %453 : vector<4x32xf32>
    %483 = vector.extract_strided_slice %470 {offsets = [0, 128], sizes = [4, 32], strides = [1, 1]} : vector<4x256xf32> to vector<4x32xf32>
    %484 = vector.extract_strided_slice %465 {offsets = [0, 192], sizes = [4, 32], strides = [1, 1]} : vector<4x256xf32> to vector<4x32xf32>
    %485 = math.tanh %484 : vector<4x32xf32>
    %486 = arith.mulf %483, %485 : vector<4x32xf32>
    %487 = arith.addf %482, %486 : vector<4x32xf32>
    %488 = vector.extract_strided_slice %470 {offsets = [0, 224], sizes = [4, 32], strides = [1, 1]} : vector<4x256xf32> to vector<4x32xf32>
    %489 = math.tanh %487 : vector<4x32xf32>
    %490 = arith.mulf %488, %489 : vector<4x32xf32>
    %491 = vector.extract_strided_slice %419 {offsets = [0, 2, 0], sizes = [4, 1, 128], strides = [1, 1, 1]} : vector<4x8x256xf32> to vector<4x1x128xf32>
    %492 = vector.shape_cast %491 : vector<4x1x128xf32> to vector<4x128xf32>
    %493 = vector.extract_strided_slice %419 {offsets = [0, 5, 128], sizes = [4, 1, 128], strides = [1, 1, 1]} : vector<4x8x256xf32> to vector<4x1x128xf32>
    %494 = vector.shape_cast %493 : vector<4x1x128xf32> to vector<4x128xf32>
    %495 = tpu.concatenate %492, %494 in 1 : vector<4x128xf32>, vector<4x128xf32> -> vector<4x256xf32>
    %496 = tpu.concatenate %480, %490 in 1 : vector<4x32xf32>, vector<4x32xf32> -> vector<4x64xf32>
    %497 = arith.truncf %496 : vector<4x64xf32> to vector<4x64xbf16>
    %cst_76 = arith.constant dense<0.000000e+00> : vector<4x256xf32>
    %498 = tpu.matmul %497, %420, %cst_76 {dimension_numbers = #tpu.dot_dimension_numbers<[1], [0], [0], [1], [0, 0, 1, 1], [], []>} : vector<4x64xbf16>, vector<64x256xbf16>, vector<4x256xf32> -> vector<4x256xf32>
    %499 = arith.addf %495, %498 : vector<4x256xf32>
    %500 = arith.negf %499 : vector<4x256xf32>
    %501 = math.exp %500 : vector<4x256xf32>
    %cst_77 = arith.constant 1.000000e+00 : f32
    %502 = vector.broadcast %cst_77 : f32 to vector<4x256xf32>
    %503 = arith.addf %502, %501 : vector<4x256xf32>
    %504 = arith.divf %502, %503 : vector<4x256xf32>
    %505 = vector.extract_strided_slice %504 {offsets = [0, 32], sizes = [4, 32], strides = [1, 1]} : vector<4x256xf32> to vector<4x32xf32>
    %506 = arith.mulf %505, %477 : vector<4x32xf32>
    %507 = vector.extract_strided_slice %504 {offsets = [0, 0], sizes = [4, 32], strides = [1, 1]} : vector<4x256xf32> to vector<4x32xf32>
    %508 = vector.extract_strided_slice %499 {offsets = [0, 64], sizes = [4, 32], strides = [1, 1]} : vector<4x256xf32> to vector<4x32xf32>
    %509 = math.tanh %508 : vector<4x32xf32>
    %510 = arith.mulf %507, %509 : vector<4x32xf32>
    %511 = arith.addf %506, %510 : vector<4x32xf32>
    %512 = vector.extract_strided_slice %504 {offsets = [0, 96], sizes = [4, 32], strides = [1, 1]} : vector<4x256xf32> to vector<4x32xf32>
    %513 = math.tanh %511 : vector<4x32xf32>
    %514 = arith.mulf %512, %513 : vector<4x32xf32>
    %515 = vector.extract_strided_slice %504 {offsets = [0, 160], sizes = [4, 32], strides = [1, 1]} : vector<4x256xf32> to vector<4x32xf32>
    %516 = arith.mulf %515, %487 : vector<4x32xf32>
    %517 = vector.extract_strided_slice %504 {offsets = [0, 128], sizes = [4, 32], strides = [1, 1]} : vector<4x256xf32> to vector<4x32xf32>
    %518 = vector.extract_strided_slice %499 {offsets = [0, 192], sizes = [4, 32], strides = [1, 1]} : vector<4x256xf32> to vector<4x32xf32>
    %519 = math.tanh %518 : vector<4x32xf32>
    %520 = arith.mulf %517, %519 : vector<4x32xf32>
    %521 = arith.addf %516, %520 : vector<4x32xf32>
    %522 = vector.extract_strided_slice %504 {offsets = [0, 224], sizes = [4, 32], strides = [1, 1]} : vector<4x256xf32> to vector<4x32xf32>
    %523 = math.tanh %521 : vector<4x32xf32>
    %524 = arith.mulf %522, %523 : vector<4x32xf32>
    %525 = vector.extract_strided_slice %419 {offsets = [0, 3, 0], sizes = [4, 1, 128], strides = [1, 1, 1]} : vector<4x8x256xf32> to vector<4x1x128xf32>
    %526 = vector.shape_cast %525 : vector<4x1x128xf32> to vector<4x128xf32>
    %527 = vector.extract_strided_slice %419 {offsets = [0, 4, 128], sizes = [4, 1, 128], strides = [1, 1, 1]} : vector<4x8x256xf32> to vector<4x1x128xf32>
    %528 = vector.shape_cast %527 : vector<4x1x128xf32> to vector<4x128xf32>
    %529 = tpu.concatenate %526, %528 in 1 : vector<4x128xf32>, vector<4x128xf32> -> vector<4x256xf32>
    %530 = tpu.concatenate %514, %524 in 1 : vector<4x32xf32>, vector<4x32xf32> -> vector<4x64xf32>
    %531 = arith.truncf %530 : vector<4x64xf32> to vector<4x64xbf16>
    %cst_78 = arith.constant dense<0.000000e+00> : vector<4x256xf32>
    %532 = tpu.matmul %531, %420, %cst_78 {dimension_numbers = #tpu.dot_dimension_numbers<[1], [0], [0], [1], [0, 0, 1, 1], [], []>} : vector<4x64xbf16>, vector<64x256xbf16>, vector<4x256xf32> -> vector<4x256xf32>
    %533 = arith.addf %529, %532 : vector<4x256xf32>
    %534 = arith.negf %533 : vector<4x256xf32>
    %535 = math.exp %534 : vector<4x256xf32>
    %cst_79 = arith.constant 1.000000e+00 : f32
    %536 = vector.broadcast %cst_79 : f32 to vector<4x256xf32>
    %537 = arith.addf %536, %535 : vector<4x256xf32>
    %538 = arith.divf %536, %537 : vector<4x256xf32>
    %539 = vector.extract_strided_slice %538 {offsets = [0, 32], sizes = [4, 32], strides = [1, 1]} : vector<4x256xf32> to vector<4x32xf32>
    %540 = arith.mulf %539, %511 : vector<4x32xf32>
    %541 = vector.extract_strided_slice %538 {offsets = [0, 0], sizes = [4, 32], strides = [1, 1]} : vector<4x256xf32> to vector<4x32xf32>
    %542 = vector.extract_strided_slice %533 {offsets = [0, 64], sizes = [4, 32], strides = [1, 1]} : vector<4x256xf32> to vector<4x32xf32>
    %543 = math.tanh %542 : vector<4x32xf32>
    %544 = arith.mulf %541, %543 : vector<4x32xf32>
    %545 = arith.addf %540, %544 : vector<4x32xf32>
    %546 = vector.extract_strided_slice %538 {offsets = [0, 96], sizes = [4, 32], strides = [1, 1]} : vector<4x256xf32> to vector<4x32xf32>
    %547 = math.tanh %545 : vector<4x32xf32>
    %548 = arith.mulf %546, %547 : vector<4x32xf32>
    %549 = vector.extract_strided_slice %538 {offsets = [0, 160], sizes = [4, 32], strides = [1, 1]} : vector<4x256xf32> to vector<4x32xf32>
    %550 = arith.mulf %549, %521 : vector<4x32xf32>
    %551 = vector.extract_strided_slice %538 {offsets = [0, 128], sizes = [4, 32], strides = [1, 1]} : vector<4x256xf32> to vector<4x32xf32>
    %552 = vector.extract_strided_slice %533 {offsets = [0, 192], sizes = [4, 32], strides = [1, 1]} : vector<4x256xf32> to vector<4x32xf32>
    %553 = math.tanh %552 : vector<4x32xf32>
    %554 = arith.mulf %551, %553 : vector<4x32xf32>
    %555 = arith.addf %550, %554 : vector<4x32xf32>
    %556 = vector.extract_strided_slice %538 {offsets = [0, 224], sizes = [4, 32], strides = [1, 1]} : vector<4x256xf32> to vector<4x32xf32>
    %557 = math.tanh %555 : vector<4x32xf32>
    %558 = arith.mulf %556, %557 : vector<4x32xf32>
    %559 = vector.extract_strided_slice %419 {offsets = [0, 4, 0], sizes = [4, 1, 128], strides = [1, 1, 1]} : vector<4x8x256xf32> to vector<4x1x128xf32>
    %560 = vector.shape_cast %559 : vector<4x1x128xf32> to vector<4x128xf32>
    %561 = vector.extract_strided_slice %419 {offsets = [0, 3, 128], sizes = [4, 1, 128], strides = [1, 1, 1]} : vector<4x8x256xf32> to vector<4x1x128xf32>
    %562 = vector.shape_cast %561 : vector<4x1x128xf32> to vector<4x128xf32>
    %563 = tpu.concatenate %560, %562 in 1 : vector<4x128xf32>, vector<4x128xf32> -> vector<4x256xf32>
    %564 = tpu.concatenate %548, %558 in 1 : vector<4x32xf32>, vector<4x32xf32> -> vector<4x64xf32>
    %565 = arith.truncf %564 : vector<4x64xf32> to vector<4x64xbf16>
    %cst_80 = arith.constant dense<0.000000e+00> : vector<4x256xf32>
    %566 = tpu.matmul %565, %420, %cst_80 {dimension_numbers = #tpu.dot_dimension_numbers<[1], [0], [0], [1], [0, 0, 1, 1], [], []>} : vector<4x64xbf16>, vector<64x256xbf16>, vector<4x256xf32> -> vector<4x256xf32>
    %567 = arith.addf %563, %566 : vector<4x256xf32>
    %568 = arith.negf %567 : vector<4x256xf32>
    %569 = math.exp %568 : vector<4x256xf32>
    %cst_81 = arith.constant 1.000000e+00 : f32
    %570 = vector.broadcast %cst_81 : f32 to vector<4x256xf32>
    %571 = arith.addf %570, %569 : vector<4x256xf32>
    %572 = arith.divf %570, %571 : vector<4x256xf32>
    %573 = vector.extract_strided_slice %572 {offsets = [0, 32], sizes = [4, 32], strides = [1, 1]} : vector<4x256xf32> to vector<4x32xf32>
    %574 = arith.mulf %573, %545 : vector<4x32xf32>
    %575 = vector.extract_strided_slice %572 {offsets = [0, 0], sizes = [4, 32], strides = [1, 1]} : vector<4x256xf32> to vector<4x32xf32>
    %576 = vector.extract_strided_slice %567 {offsets = [0, 64], sizes = [4, 32], strides = [1, 1]} : vector<4x256xf32> to vector<4x32xf32>
    %577 = math.tanh %576 : vector<4x32xf32>
    %578 = arith.mulf %575, %577 : vector<4x32xf32>
    %579 = arith.addf %574, %578 : vector<4x32xf32>
    %580 = vector.extract_strided_slice %572 {offsets = [0, 96], sizes = [4, 32], strides = [1, 1]} : vector<4x256xf32> to vector<4x32xf32>
    %581 = math.tanh %579 : vector<4x32xf32>
    %582 = arith.mulf %580, %581 : vector<4x32xf32>
    %583 = vector.extract_strided_slice %572 {offsets = [0, 160], sizes = [4, 32], strides = [1, 1]} : vector<4x256xf32> to vector<4x32xf32>
    %584 = arith.mulf %583, %555 : vector<4x32xf32>
    %585 = vector.extract_strided_slice %572 {offsets = [0, 128], sizes = [4, 32], strides = [1, 1]} : vector<4x256xf32> to vector<4x32xf32>
    %586 = vector.extract_strided_slice %567 {offsets = [0, 192], sizes = [4, 32], strides = [1, 1]} : vector<4x256xf32> to vector<4x32xf32>
    %587 = math.tanh %586 : vector<4x32xf32>
    %588 = arith.mulf %585, %587 : vector<4x32xf32>
    %589 = arith.addf %584, %588 : vector<4x32xf32>
    %590 = vector.extract_strided_slice %572 {offsets = [0, 224], sizes = [4, 32], strides = [1, 1]} : vector<4x256xf32> to vector<4x32xf32>
    %591 = math.tanh %589 : vector<4x32xf32>
    %592 = arith.mulf %590, %591 : vector<4x32xf32>
    %593 = vector.extract_strided_slice %419 {offsets = [0, 5, 0], sizes = [4, 1, 128], strides = [1, 1, 1]} : vector<4x8x256xf32> to vector<4x1x128xf32>
    %594 = vector.shape_cast %593 : vector<4x1x128xf32> to vector<4x128xf32>
    %595 = vector.extract_strided_slice %419 {offsets = [0, 2, 128], sizes = [4, 1, 128], strides = [1, 1, 1]} : vector<4x8x256xf32> to vector<4x1x128xf32>
    %596 = vector.shape_cast %595 : vector<4x1x128xf32> to vector<4x128xf32>
    %597 = tpu.concatenate %594, %596 in 1 : vector<4x128xf32>, vector<4x128xf32> -> vector<4x256xf32>
    %598 = tpu.concatenate %582, %592 in 1 : vector<4x32xf32>, vector<4x32xf32> -> vector<4x64xf32>
    %599 = arith.truncf %598 : vector<4x64xf32> to vector<4x64xbf16>
    %cst_82 = arith.constant dense<0.000000e+00> : vector<4x256xf32>
    %600 = tpu.matmul %599, %420, %cst_82 {dimension_numbers = #tpu.dot_dimension_numbers<[1], [0], [0], [1], [0, 0, 1, 1], [], []>} : vector<4x64xbf16>, vector<64x256xbf16>, vector<4x256xf32> -> vector<4x256xf32>
    %601 = arith.addf %597, %600 : vector<4x256xf32>
    %602 = arith.negf %601 : vector<4x256xf32>
    %603 = math.exp %602 : vector<4x256xf32>
    %cst_83 = arith.constant 1.000000e+00 : f32
    %604 = vector.broadcast %cst_83 : f32 to vector<4x256xf32>
    %605 = arith.addf %604, %603 : vector<4x256xf32>
    %606 = arith.divf %604, %605 : vector<4x256xf32>
    %607 = vector.extract_strided_slice %606 {offsets = [0, 32], sizes = [4, 32], strides = [1, 1]} : vector<4x256xf32> to vector<4x32xf32>
    %608 = arith.mulf %607, %579 : vector<4x32xf32>
    %609 = vector.extract_strided_slice %606 {offsets = [0, 0], sizes = [4, 32], strides = [1, 1]} : vector<4x256xf32> to vector<4x32xf32>
    %610 = vector.extract_strided_slice %601 {offsets = [0, 64], sizes = [4, 32], strides = [1, 1]} : vector<4x256xf32> to vector<4x32xf32>
    %611 = math.tanh %610 : vector<4x32xf32>
    %612 = arith.mulf %609, %611 : vector<4x32xf32>
    %613 = arith.addf %608, %612 : vector<4x32xf32>
    %614 = vector.extract_strided_slice %606 {offsets = [0, 96], sizes = [4, 32], strides = [1, 1]} : vector<4x256xf32> to vector<4x32xf32>
    %615 = math.tanh %613 : vector<4x32xf32>
    %616 = arith.mulf %614, %615 : vector<4x32xf32>
    %617 = vector.extract_strided_slice %606 {offsets = [0, 160], sizes = [4, 32], strides = [1, 1]} : vector<4x256xf32> to vector<4x32xf32>
    %618 = arith.mulf %617, %589 : vector<4x32xf32>
    %619 = vector.extract_strided_slice %606 {offsets = [0, 128], sizes = [4, 32], strides = [1, 1]} : vector<4x256xf32> to vector<4x32xf32>
    %620 = vector.extract_strided_slice %601 {offsets = [0, 192], sizes = [4, 32], strides = [1, 1]} : vector<4x256xf32> to vector<4x32xf32>
    %621 = math.tanh %620 : vector<4x32xf32>
    %622 = arith.mulf %619, %621 : vector<4x32xf32>
    %623 = arith.addf %618, %622 : vector<4x32xf32>
    %624 = vector.extract_strided_slice %606 {offsets = [0, 224], sizes = [4, 32], strides = [1, 1]} : vector<4x256xf32> to vector<4x32xf32>
    %625 = math.tanh %623 : vector<4x32xf32>
    %626 = arith.mulf %624, %625 : vector<4x32xf32>
    %627 = vector.extract_strided_slice %419 {offsets = [0, 6, 0], sizes = [4, 1, 128], strides = [1, 1, 1]} : vector<4x8x256xf32> to vector<4x1x128xf32>
    %628 = vector.shape_cast %627 : vector<4x1x128xf32> to vector<4x128xf32>
    %629 = vector.extract_strided_slice %419 {offsets = [0, 1, 128], sizes = [4, 1, 128], strides = [1, 1, 1]} : vector<4x8x256xf32> to vector<4x1x128xf32>
    %630 = vector.shape_cast %629 : vector<4x1x128xf32> to vector<4x128xf32>
    %631 = tpu.concatenate %628, %630 in 1 : vector<4x128xf32>, vector<4x128xf32> -> vector<4x256xf32>
    %632 = tpu.concatenate %616, %626 in 1 : vector<4x32xf32>, vector<4x32xf32> -> vector<4x64xf32>
    %633 = arith.truncf %632 : vector<4x64xf32> to vector<4x64xbf16>
    %cst_84 = arith.constant dense<0.000000e+00> : vector<4x256xf32>
    %634 = tpu.matmul %633, %420, %cst_84 {dimension_numbers = #tpu.dot_dimension_numbers<[1], [0], [0], [1], [0, 0, 1, 1], [], []>} : vector<4x64xbf16>, vector<64x256xbf16>, vector<4x256xf32> -> vector<4x256xf32>
    %635 = arith.addf %631, %634 : vector<4x256xf32>
    %636 = arith.negf %635 : vector<4x256xf32>
    %637 = math.exp %636 : vector<4x256xf32>
    %cst_85 = arith.constant 1.000000e+00 : f32
    %638 = vector.broadcast %cst_85 : f32 to vector<4x256xf32>
    %639 = arith.addf %638, %637 : vector<4x256xf32>
    %640 = arith.divf %638, %639 : vector<4x256xf32>
    %641 = vector.extract_strided_slice %640 {offsets = [0, 32], sizes = [4, 32], strides = [1, 1]} : vector<4x256xf32> to vector<4x32xf32>
    %642 = arith.mulf %641, %613 : vector<4x32xf32>
    %643 = vector.extract_strided_slice %640 {offsets = [0, 0], sizes = [4, 32], strides = [1, 1]} : vector<4x256xf32> to vector<4x32xf32>
    %644 = vector.extract_strided_slice %635 {offsets = [0, 64], sizes = [4, 32], strides = [1, 1]} : vector<4x256xf32> to vector<4x32xf32>
    %645 = math.tanh %644 : vector<4x32xf32>
    %646 = arith.mulf %643, %645 : vector<4x32xf32>
    %647 = arith.addf %642, %646 : vector<4x32xf32>
    %648 = vector.extract_strided_slice %640 {offsets = [0, 96], sizes = [4, 32], strides = [1, 1]} : vector<4x256xf32> to vector<4x32xf32>
    %649 = math.tanh %647 : vector<4x32xf32>
    %650 = arith.mulf %648, %649 : vector<4x32xf32>
    %651 = vector.extract_strided_slice %640 {offsets = [0, 160], sizes = [4, 32], strides = [1, 1]} : vector<4x256xf32> to vector<4x32xf32>
    %652 = arith.mulf %651, %623 : vector<4x32xf32>
    %653 = vector.extract_strided_slice %640 {offsets = [0, 128], sizes = [4, 32], strides = [1, 1]} : vector<4x256xf32> to vector<4x32xf32>
    %654 = vector.extract_strided_slice %635 {offsets = [0, 192], sizes = [4, 32], strides = [1, 1]} : vector<4x256xf32> to vector<4x32xf32>
    %655 = math.tanh %654 : vector<4x32xf32>
    %656 = arith.mulf %653, %655 : vector<4x32xf32>
    %657 = arith.addf %652, %656 : vector<4x32xf32>
    %658 = vector.extract_strided_slice %640 {offsets = [0, 224], sizes = [4, 32], strides = [1, 1]} : vector<4x256xf32> to vector<4x32xf32>
    %659 = math.tanh %657 : vector<4x32xf32>
    %660 = arith.mulf %658, %659 : vector<4x32xf32>
    %661 = vector.extract_strided_slice %419 {offsets = [0, 7, 0], sizes = [4, 1, 128], strides = [1, 1, 1]} : vector<4x8x256xf32> to vector<4x1x128xf32>
    %662 = vector.shape_cast %661 : vector<4x1x128xf32> to vector<4x128xf32>
    %663 = vector.extract_strided_slice %419 {offsets = [0, 0, 128], sizes = [4, 1, 128], strides = [1, 1, 1]} : vector<4x8x256xf32> to vector<4x1x128xf32>
    %664 = vector.shape_cast %663 : vector<4x1x128xf32> to vector<4x128xf32>
    %665 = tpu.concatenate %662, %664 in 1 : vector<4x128xf32>, vector<4x128xf32> -> vector<4x256xf32>
    %666 = tpu.concatenate %650, %660 in 1 : vector<4x32xf32>, vector<4x32xf32> -> vector<4x64xf32>
    %667 = arith.truncf %666 : vector<4x64xf32> to vector<4x64xbf16>
    %cst_86 = arith.constant dense<0.000000e+00> : vector<4x256xf32>
    %668 = tpu.matmul %667, %420, %cst_86 {dimension_numbers = #tpu.dot_dimension_numbers<[1], [0], [0], [1], [0, 0, 1, 1], [], []>} : vector<4x64xbf16>, vector<64x256xbf16>, vector<4x256xf32> -> vector<4x256xf32>
    %669 = arith.addf %665, %668 : vector<4x256xf32>
    %670 = arith.negf %669 : vector<4x256xf32>
    %671 = math.exp %670 : vector<4x256xf32>
    %cst_87 = arith.constant 1.000000e+00 : f32
    %672 = vector.broadcast %cst_87 : f32 to vector<4x256xf32>
    %673 = arith.addf %672, %671 : vector<4x256xf32>
    %674 = arith.divf %672, %673 : vector<4x256xf32>
    %675 = vector.extract_strided_slice %674 {offsets = [0, 32], sizes = [4, 32], strides = [1, 1]} : vector<4x256xf32> to vector<4x32xf32>
    %676 = arith.mulf %675, %647 : vector<4x32xf32>
    %677 = vector.extract_strided_slice %674 {offsets = [0, 0], sizes = [4, 32], strides = [1, 1]} : vector<4x256xf32> to vector<4x32xf32>
    %678 = vector.extract_strided_slice %669 {offsets = [0, 64], sizes = [4, 32], strides = [1, 1]} : vector<4x256xf32> to vector<4x32xf32>
    %679 = math.tanh %678 : vector<4x32xf32>
    %680 = arith.mulf %677, %679 : vector<4x32xf32>
    %681 = arith.addf %676, %680 : vector<4x32xf32>
    %682 = vector.extract_strided_slice %674 {offsets = [0, 96], sizes = [4, 32], strides = [1, 1]} : vector<4x256xf32> to vector<4x32xf32>
    %683 = math.tanh %681 : vector<4x32xf32>
    %684 = arith.mulf %682, %683 : vector<4x32xf32>
    %685 = vector.extract_strided_slice %674 {offsets = [0, 160], sizes = [4, 32], strides = [1, 1]} : vector<4x256xf32> to vector<4x32xf32>
    %686 = arith.mulf %685, %657 : vector<4x32xf32>
    %687 = vector.extract_strided_slice %674 {offsets = [0, 128], sizes = [4, 32], strides = [1, 1]} : vector<4x256xf32> to vector<4x32xf32>
    %688 = vector.extract_strided_slice %669 {offsets = [0, 192], sizes = [4, 32], strides = [1, 1]} : vector<4x256xf32> to vector<4x32xf32>
    %689 = math.tanh %688 : vector<4x32xf32>
    %690 = arith.mulf %687, %689 : vector<4x32xf32>
    %691 = arith.addf %686, %690 : vector<4x32xf32>
    %692 = vector.extract_strided_slice %674 {offsets = [0, 224], sizes = [4, 32], strides = [1, 1]} : vector<4x256xf32> to vector<4x32xf32>
    %693 = math.tanh %691 : vector<4x32xf32>
    %694 = arith.mulf %692, %693 : vector<4x32xf32>
    %695 = arith.addf %446, %480 : vector<4x32xf32>
    %696 = arith.maximumf %446, %480 : vector<4x32xf32>
    %697 = arith.addf %694, %660 : vector<4x32xf32>
    %698 = arith.maximumf %694, %660 : vector<4x32xf32>
    %699 = arith.addf %695, %514 : vector<4x32xf32>
    %700 = arith.maximumf %696, %514 : vector<4x32xf32>
    %701 = arith.addf %697, %626 : vector<4x32xf32>
    %702 = arith.maximumf %698, %626 : vector<4x32xf32>
    %703 = arith.addf %699, %548 : vector<4x32xf32>
    %704 = arith.maximumf %700, %548 : vector<4x32xf32>
    %705 = arith.addf %701, %592 : vector<4x32xf32>
    %706 = arith.maximumf %702, %592 : vector<4x32xf32>
    %707 = arith.addf %703, %582 : vector<4x32xf32>
    %708 = arith.maximumf %704, %582 : vector<4x32xf32>
    %709 = arith.addf %705, %558 : vector<4x32xf32>
    %710 = arith.maximumf %706, %558 : vector<4x32xf32>
    %711 = arith.addf %707, %616 : vector<4x32xf32>
    %712 = arith.maximumf %708, %616 : vector<4x32xf32>
    %713 = arith.addf %709, %524 : vector<4x32xf32>
    %714 = arith.maximumf %710, %524 : vector<4x32xf32>
    %715 = arith.addf %711, %650 : vector<4x32xf32>
    %716 = arith.maximumf %712, %650 : vector<4x32xf32>
    %717 = arith.addf %713, %490 : vector<4x32xf32>
    %718 = arith.maximumf %714, %490 : vector<4x32xf32>
    %719 = arith.addf %715, %684 : vector<4x32xf32>
    %720 = arith.maximumf %716, %684 : vector<4x32xf32>
    %721 = arith.addf %717, %456 : vector<4x32xf32>
    %722 = arith.maximumf %718, %456 : vector<4x32xf32>
    %cst_88 = arith.constant 1.250000e-01 : f32
    %723 = vector.broadcast %cst_88 : f32 to vector<4x32xf32>
    %724 = arith.mulf %719, %723 : vector<4x32xf32>
    %cst_89 = arith.constant 1.250000e-01 : f32
    %725 = vector.broadcast %cst_89 : f32 to vector<4x32xf32>
    %726 = arith.mulf %721, %725 : vector<4x32xf32>
    %727 = tpu.concatenate %724, %726, %720, %722 in 1 : vector<4x32xf32>, vector<4x32xf32>, vector<4x32xf32>, vector<4x32xf32> -> vector<4x128xf32>
    %728 = vector.extract_strided_slice %727 {offsets = [0, 0], sizes = [2, 128], strides = [1, 1]} : vector<4x128xf32> to vector<2x128xf32>
    %729 = vector.extract_strided_slice %727 {offsets = [2, 0], sizes = [2, 128], strides = [1, 1]} : vector<4x128xf32> to vector<2x128xf32>
    %730 = tpu.concatenate %728, %729 in 1 : vector<2x128xf32>, vector<2x128xf32> -> vector<2x256xf32>
    %cst_90 = arith.constant dense<0.000000e+00> : vector<256xf32>
    %731 = vector.multi_reduction <add>, %730, %cst_90 [0] : vector<2x256xf32> to vector<256xf32>
    %732 = vector.shape_cast %731 : vector<256xf32> to vector<1x256xf32>
    %cst_91 = arith.constant 5.000000e-01 : f32
    %733 = vector.broadcast %cst_91 : f32 to vector<1x256xf32>
    %734 = arith.mulf %732, %733 : vector<1x256xf32>
    %735 = vector.broadcast %734 : vector<1x256xf32> to vector<2x256xf32>
    %736 = arith.subf %730, %735 : vector<2x256xf32>
    %737 = arith.mulf %736, %736 : vector<2x256xf32>
    %cst_92 = arith.constant dense<0.000000e+00> : vector<256xf32>
    %738 = vector.multi_reduction <add>, %737, %cst_92 [0] : vector<2x256xf32> to vector<256xf32>
    %739 = vector.shape_cast %738 : vector<256xf32> to vector<1x256xf32>
    %cst_93 = arith.constant 5.000000e-01 : f32
    %740 = vector.broadcast %cst_93 : f32 to vector<1x256xf32>
    %741 = arith.mulf %739, %740 : vector<1x256xf32>
    %cst_94 = arith.constant 9.99999974E-6 : f32
    %742 = vector.broadcast %cst_94 : f32 to vector<1x256xf32>
    %743 = arith.addf %741, %742 : vector<1x256xf32>
    %744 = math.rsqrt %743 : vector<1x256xf32>
    %745 = vector.broadcast %744 : vector<1x256xf32> to vector<2x256xf32>
    %746 = arith.mulf %736, %745 : vector<2x256xf32>
    %c0_95 = arith.constant 0 : index
    %c0_96 = arith.constant 0 : index
    %747 = vector.load %arg12[%c0_95, %c0_96] : memref<1x256xf32, #tpu.memory_space<vmem>>, vector<1x256xf32>
    %748 = vector.broadcast %747 : vector<1x256xf32> to vector<2x256xf32>
    %749 = arith.mulf %746, %748 : vector<2x256xf32>
    %c0_97 = arith.constant 0 : index
    %c0_98 = arith.constant 0 : index
    %750 = vector.load %arg13[%c0_97, %c0_98] : memref<1x256xf32, #tpu.memory_space<vmem>>, vector<1x256xf32>
    %751 = vector.broadcast %750 : vector<1x256xf32> to vector<2x256xf32>
    %752 = arith.addf %749, %751 : vector<2x256xf32>
    %753 = arith.truncf %752 : vector<2x256xf32> to vector<2x256xbf16>
    %c0_99 = arith.constant 0 : index
    %c0_100 = arith.constant 0 : index
    %754 = vector.load %arg14[%c0_99, %c0_100] : memref<256x64xbf16, #tpu.memory_space<vmem>>, vector<256x64xbf16>
    %cst_101 = arith.constant dense<0.000000e+00> : vector<2x64xf32>
    %755 = tpu.matmul %753, %754, %cst_101 {dimension_numbers = #tpu.dot_dimension_numbers<[1], [0], [0], [1], [0, 0, 1, 1], [], []>} : vector<2x256xbf16>, vector<256x64xbf16>, vector<2x64xf32> -> vector<2x64xf32>
    %c0_102 = arith.constant 0 : index
    %c0_103 = arith.constant 0 : index
    %756 = vector.load %arg15[%c0_102, %c0_103] : memref<1x64xf32, #tpu.memory_space<vmem>>, vector<1x64xf32>
    %757 = vector.broadcast %756 : vector<1x64xf32> to vector<2x64xf32>
    %758 = arith.addf %755, %757 : vector<2x64xf32>
    %cst_104 = arith.constant 0.000000e+00 : f32
    %759 = vector.broadcast %cst_104 : f32 to vector<2x64xf32>
    %760 = arith.cmpf ogt, %758, %759 : vector<2x64xf32>
    %cst_105 = arith.constant 0.000000e+00 : f32
    %761 = vector.broadcast %cst_105 : f32 to vector<2x64xf32>
    %762 = arith.minimumf %758, %761 : vector<2x64xf32>
    %763 = math.exp %762 : vector<2x64xf32>
    %cst_106 = arith.constant 1.000000e+00 : f32
    %764 = vector.broadcast %cst_106 : f32 to vector<2x64xf32>
    %765 = arith.subf %763, %764 : vector<2x64xf32>
    %766 = arith.select %760, %758, %765 : vector<2x64xi1>, vector<2x64xf32>
    %cst_107 = arith.constant dense<0.000000e+00> : vector<64xf32>
    %767 = vector.multi_reduction <add>, %766, %cst_107 [0] : vector<2x64xf32> to vector<64xf32>
    %768 = vector.shape_cast %767 : vector<64xf32> to vector<1x64xf32>
    %cst_108 = arith.constant 5.000000e-01 : f32
    %769 = vector.broadcast %cst_108 : f32 to vector<1x64xf32>
    %770 = arith.mulf %768, %769 : vector<1x64xf32>
    %771 = vector.broadcast %770 : vector<1x64xf32> to vector<2x64xf32>
    %772 = arith.subf %766, %771 : vector<2x64xf32>
    %773 = arith.mulf %772, %772 : vector<2x64xf32>
    %cst_109 = arith.constant dense<0.000000e+00> : vector<64xf32>
    %774 = vector.multi_reduction <add>, %773, %cst_109 [0] : vector<2x64xf32> to vector<64xf32>
    %775 = vector.shape_cast %774 : vector<64xf32> to vector<1x64xf32>
    %cst_110 = arith.constant 5.000000e-01 : f32
    %776 = vector.broadcast %cst_110 : f32 to vector<1x64xf32>
    %777 = arith.mulf %775, %776 : vector<1x64xf32>
    %cst_111 = arith.constant 9.99999974E-6 : f32
    %778 = vector.broadcast %cst_111 : f32 to vector<1x64xf32>
    %779 = arith.addf %777, %778 : vector<1x64xf32>
    %780 = math.rsqrt %779 : vector<1x64xf32>
    %781 = vector.broadcast %780 : vector<1x64xf32> to vector<2x64xf32>
    %782 = arith.mulf %772, %781 : vector<2x64xf32>
    %c0_112 = arith.constant 0 : index
    %c0_113 = arith.constant 0 : index
    %783 = vector.load %arg16[%c0_112, %c0_113] : memref<1x64xf32, #tpu.memory_space<vmem>>, vector<1x64xf32>
    %784 = vector.broadcast %783 : vector<1x64xf32> to vector<2x64xf32>
    %785 = arith.mulf %782, %784 : vector<2x64xf32>
    %c0_114 = arith.constant 0 : index
    %c0_115 = arith.constant 0 : index
    %786 = vector.load %arg17[%c0_114, %c0_115] : memref<1x64xf32, #tpu.memory_space<vmem>>, vector<1x64xf32>
    %787 = vector.broadcast %786 : vector<1x64xf32> to vector<2x64xf32>
    %788 = arith.addf %785, %787 : vector<2x64xf32>
    %789 = arith.truncf %788 : vector<2x64xf32> to vector<2x64xbf16>
    %c0_116 = arith.constant 0 : index
    %c0_117 = arith.constant 0 : index
    %790 = vector.load %arg18[%c0_116, %c0_117] : memref<64x64xbf16, #tpu.memory_space<vmem>>, vector<64x64xbf16>
    %cst_118 = arith.constant dense<0.000000e+00> : vector<2x64xf32>
    %791 = tpu.matmul %789, %790, %cst_118 {dimension_numbers = #tpu.dot_dimension_numbers<[1], [0], [0], [1], [0, 0, 1, 1], [], []>} : vector<2x64xbf16>, vector<64x64xbf16>, vector<2x64xf32> -> vector<2x64xf32>
    %c0_119 = arith.constant 0 : index
    %c0_120 = arith.constant 0 : index
    %792 = vector.load %arg19[%c0_119, %c0_120] : memref<1x64xf32, #tpu.memory_space<vmem>>, vector<1x64xf32>
    %793 = vector.broadcast %792 : vector<1x64xf32> to vector<2x64xf32>
    %794 = arith.addf %791, %793 : vector<2x64xf32>
    %cst_121 = arith.constant 0.000000e+00 : f32
    %795 = vector.broadcast %cst_121 : f32 to vector<2x64xf32>
    %796 = arith.cmpf ogt, %794, %795 : vector<2x64xf32>
    %cst_122 = arith.constant 0.000000e+00 : f32
    %797 = vector.broadcast %cst_122 : f32 to vector<2x64xf32>
    %798 = arith.minimumf %794, %797 : vector<2x64xf32>
    %799 = math.exp %798 : vector<2x64xf32>
    %cst_123 = arith.constant 1.000000e+00 : f32
    %800 = vector.broadcast %cst_123 : f32 to vector<2x64xf32>
    %801 = arith.subf %799, %800 : vector<2x64xf32>
    %802 = arith.select %796, %794, %801 : vector<2x64xi1>, vector<2x64xf32>
    %cst_124 = arith.constant dense<0.000000e+00> : vector<64xf32>
    %803 = vector.multi_reduction <add>, %802, %cst_124 [0] : vector<2x64xf32> to vector<64xf32>
    %804 = vector.shape_cast %803 : vector<64xf32> to vector<1x64xf32>
    %cst_125 = arith.constant 5.000000e-01 : f32
    %805 = vector.broadcast %cst_125 : f32 to vector<1x64xf32>
    %806 = arith.mulf %804, %805 : vector<1x64xf32>
    %807 = vector.broadcast %806 : vector<1x64xf32> to vector<2x64xf32>
    %808 = arith.subf %802, %807 : vector<2x64xf32>
    %809 = arith.mulf %808, %808 : vector<2x64xf32>
    %cst_126 = arith.constant dense<0.000000e+00> : vector<64xf32>
    %810 = vector.multi_reduction <add>, %809, %cst_126 [0] : vector<2x64xf32> to vector<64xf32>
    %811 = vector.shape_cast %810 : vector<64xf32> to vector<1x64xf32>
    %cst_127 = arith.constant 5.000000e-01 : f32
    %812 = vector.broadcast %cst_127 : f32 to vector<1x64xf32>
    %813 = arith.mulf %811, %812 : vector<1x64xf32>
    %cst_128 = arith.constant 9.99999974E-6 : f32
    %814 = vector.broadcast %cst_128 : f32 to vector<1x64xf32>
    %815 = arith.addf %813, %814 : vector<1x64xf32>
    %816 = math.rsqrt %815 : vector<1x64xf32>
    %817 = vector.broadcast %816 : vector<1x64xf32> to vector<2x64xf32>
    %818 = arith.mulf %808, %817 : vector<2x64xf32>
    %c0_129 = arith.constant 0 : index
    %c0_130 = arith.constant 0 : index
    %819 = vector.load %arg20[%c0_129, %c0_130] : memref<1x64xf32, #tpu.memory_space<vmem>>, vector<1x64xf32>
    %820 = vector.broadcast %819 : vector<1x64xf32> to vector<2x64xf32>
    %821 = arith.mulf %818, %820 : vector<2x64xf32>
    %c0_131 = arith.constant 0 : index
    %c0_132 = arith.constant 0 : index
    %822 = vector.load %arg21[%c0_131, %c0_132] : memref<1x64xf32, #tpu.memory_space<vmem>>, vector<1x64xf32>
    %823 = vector.broadcast %822 : vector<1x64xf32> to vector<2x64xf32>
    %824 = arith.addf %821, %823 : vector<2x64xf32>
    %825 = arith.truncf %824 : vector<2x64xf32> to vector<2x64xbf16>
    %c0_133 = arith.constant 0 : index
    %c0_134 = arith.constant 0 : index
    %826 = vector.load %arg22[%c0_133, %c0_134] : memref<64x2xbf16, #tpu.memory_space<vmem>>, vector<64x2xbf16>
    %cst_135 = arith.constant dense<0.000000e+00> : vector<2x2xf32>
    %827 = tpu.matmul %825, %826, %cst_135 {dimension_numbers = #tpu.dot_dimension_numbers<[1], [0], [0], [1], [0, 0, 1, 1], [], []>} : vector<2x64xbf16>, vector<64x2xbf16>, vector<2x2xf32> -> vector<2x2xf32>
    %c0_136 = arith.constant 0 : index
    %c0_137 = arith.constant 0 : index
    %828 = vector.load %arg23[%c0_136, %c0_137] : memref<1x2xf32, #tpu.memory_space<vmem>>, vector<1x2xf32>
    %829 = vector.broadcast %828 : vector<1x2xf32> to vector<2x2xf32>
    %830 = arith.addf %827, %829 : vector<2x2xf32>
    %cst_138 = arith.constant dense<0xFF800000> : vector<2xf32>
    %831 = vector.multi_reduction <maximumf>, %830, %cst_138 [1] : vector<2x2xf32> to vector<2xf32>
    %832 = vector.shape_cast %831 : vector<2xf32> to vector<2x1xf32>
    %833 = vector.broadcast %832 : vector<2x1xf32> to vector<2x2xf32>
    %834 = arith.subf %830, %833 : vector<2x2xf32>
    %835 = math.exp %834 : vector<2x2xf32>
    %cst_139 = arith.constant dense<0.000000e+00> : vector<2xf32>
    %836 = vector.multi_reduction <add>, %835, %cst_139 [1] : vector<2x2xf32> to vector<2xf32>
    %837 = vector.shape_cast %836 : vector<2xf32> to vector<2x1xf32>
    %838 = tpu.reciprocal %837 {approx = true} : vector<2x1xf32> -> vector<2x1xf32>
    %839 = vector.broadcast %838 : vector<2x1xf32> to vector<2x2xf32>
    %840 = arith.mulf %835, %839 : vector<2x2xf32>
    %c0_140 = arith.constant 0 : index
    %c0_141 = arith.constant 0 : index
    %841 = vector.load %arg24[%c0_140, %c0_141] : memref<2x2xf32, #tpu.memory_space<vmem>>, vector<2x2xf32>
    tpu.vector_store %arg24[%c0_140, %c0_141], %840 {strides = array<i32>} : memref<2x2xf32, #tpu.memory_space<vmem>>, vector<2x2xf32>,
    return
  }
}

</mosaic_0001>

<bundles_post_ra>
// kernel: esim_forward.1
= control target key start
LH: loop header
LB: loop body
LE: loop exit
PB: predicated region body
PF: predicated region fallthrough
CT: control target
= control target key end

     0   :  { %s7653_s0 = inlined_call_operand.vmem [shape: s32[32,1], index: 0, kind: input, shape index: {}]   ;;  %s7654_s1 = inlined_call_operand.vmem [shape: f32[50,32], index: 1, kind: input, shape index: {}]   ;;  %s7655_s2 = inlined_call_operand.vmem [shape: s32[2,8], index: 2, kind: input, shape index: {}]   ;;  %s7656_s3 = inlined_call_operand.vmem [shape: s32[2,8], index: 3, kind: input, shape index: {}]   ;;  %s7657_s4 = inlined_call_operand.vmem [shape: f32[1,32], index: 4, kind: input, shape index: {}]   ;;  %s7658_s5 = inlined_call_operand.vmem [shape: f32[1,32], index: 5, kind: input, shape index: {}]   ;;  %s7659_s6 = inlined_call_operand.vmem [shape: bf16[32,256], index: 6, kind: input, shape index: {}]   ;;  %s7660_s7 = inlined_call_operand.vmem [shape: bf16[64,256], index: 7, kind: input, shape index: {}]   ;;  %s7661_s8 = inlined_call_operand.vmem [shape: f32[1,256], index: 8, kind: input, shape index: {}]   ;;  %s7662_s9 = inlined_call_operand.vmem [shape: bf16[256,256], index: 9, kind: input, shape index: {}]   ;;  %s7663_s10 = inlined_call_operand.vmem [shape: bf16[64,256], index: 10, kind: input, shape index: {}]   ;;  %s7664_s11 = inlined_call_operand.vmem [shape: f32[1,256], index: 11, kind: input, shape index: {}]   ;;  %s7665_s12 = inlined_call_operand.vmem [shape: f32[1,256], index: 12, kind: input, shape index: {}]   ;;  %s7666_s13 = inlined_call_operand.vmem [shape: f32[1,256], index: 13, kind: input, shape index: {}]   ;;  %s7667_s14 = inlined_call_operand.vmem [shape: bf16[256,64], index: 14, kind: input, shape index: {}]   ;;  %s7668_s15 = inlined_call_operand.vmem [shape: f32[1,64], index: 15, kind: input, shape index: {}]   ;;  %s7669_s16 = inlined_call_operand.vmem [shape: f32[1,64], index: 16, kind: input, shape index: {}]   ;;  %s7670_s17 = inlined_call_operand.vmem [shape: f32[1,64], index: 17, kind: input, shape index: {}]   ;;  %s7671_s18 = inlined_call_operand.hbm [shape: bf16[64,64], index: 18, kind: input, shape index: {}]   ;;  %s7672_s19 = inlined_call_operand.vmem [shape: f32[1,64], index: 19, kind: input, shape index: {}]   ;;  %s7673_s20 = inlined_call_operand.vmem [shape: f32[1,64], index: 20, kind: input, shape index: {}]   ;;  %s7674_s21 = inlined_call_operand.vmem [shape: f32[1,64], index: 21, kind: input, shape index: {}]   ;;  %s7675_s22 = inlined_call_operand.vmem [shape: bf16[64,2], index: 22, kind: input, shape index: {}]   ;;  %s7676_s23 = inlined_call_operand.hbm [shape: f32[1,2], index: 23, kind: input, shape index: {}]   ;;  %s7677_s24 = inlined_call_operand.vmem [shape: f32[2,2], index: 24, kind: output, shape index: {}]  }
   0x1   :  { %7683 = sst [smem:[#allocation8_spill]] %s7653_s0 }
   0x2   :  { %7684 = sst [smem:[#allocation9_spill]] %s7654_s1 }
   0x3   :  { %7685 = sst [smem:[#allocation10_spill]] %s7655_s2 }
   0x4   :  { %7686 = sst [smem:[#allocation11_spill]] %s7656_s3 }
   0x5   :  { %7687 = sst [smem:[#allocation12_spill]] %s7657_s4 }
   0x6   :  { %7688 = sst [smem:[#allocation13_spill]] %s7658_s5 }
   0x7   :  { %7689 = sst [smem:[#allocation14_spill]] %s7659_s6 }
   0x8   :  { %7690 = sst [smem:[#allocation15_spill]] %s7660_s7 }
   0x9   :  { %7691 = sst [smem:[#allocation16_spill]] %s7661_s8 }
   0xa   :  { %29 = vsyncpa [#allocation3], 0 }
   0xb   :  { %30 = vsyncpa [#allocation5], 0  ;;  %s5844_s5 = smov [#allocation2]   ;;  %s5796_s6 = scalar_lea.hbm %s7671_s18, 512 }
   0xc   :  { %s72_s26 = sshll.u32 %s5844_s5, 4  ;;  %p5797_p0 = scmp.ne.s32.totalorder %s7671_s18, %s5796_s6  ;;  %s73_s26 = int_to_ptr.vmem [resolvable:$true] %s72_s26 }
   0xd   :  { %p5800_p1 = scmp.lt.u32.totalorder %s5796_s6, %s7671_s18 }
   0xf   :  { %p5802_p2 = pnand %p5800_p1, %p5797_p0 }
  0x11   :  { %5805 = shalt.err (!%p5802_p2)
}
  0x12   :  { %s5806_s30 = scalar_lea.vmem %s73_s26, 512  ;;  %p5811_p4 = scmp.lt.s32.totalorder %s73_s26, %s73_s26 }
  0x13   :  { %p5807_p3 = scmp.ne.s32.totalorder %s73_s26, %s5806_s30  ;;  %p5812_p5 = scmp.lt.s32.totalorder %s5806_s30, %s5806_s30 }
  0x15   :  { %p5813_p6 = por %p5812_p5, %p5811_p4 }
  0x17   :  { %p5814_p7 = pnand %p5813_p6, %p5807_p3 }
  0x19   :  { %5817 = shalt.err (!%p5814_p7)
}
  0x1a   :  { %s5845_s3 = smov 64   ;;  %s5846_s25 = smov 4  }
  0x1b   :  { %78 = dma.hbm_to_vmem [thread:$0]  %s7671_s18, 512, %s73_s26, [#allocation3], %s5845_s3, %s5845_s3, %s5846_s25  }
  0x1c   :  { %s5847_s1 = smov [#allocation4]   ;;  %s5818_s6 = scalar_lea.hbm %s7676_s23, 16 }
  0x1d   :  { %s93_s5 = sshll.u32 %s5847_s1, 4  ;;  %p5819_p8 = scmp.ne.s32.totalorder %s7676_s23, %s5818_s6  ;;  %s94_s5 = int_to_ptr.vmem [resolvable:$true] %s93_s5 }
  0x1e   :  { %p5822_p9 = scmp.lt.u32.totalorder %s5818_s6, %s7676_s23 }
  0x20   :  { %p5824_p10 = pnand %p5822_p9, %p5819_p8 }
  0x22   :  { %5827 = shalt.err (!%p5824_p10)
}
  0x23   :  { %s5828_s30 = scalar_lea.vmem %s94_s5, 16  ;;  %s5832_s18 = scalar_lea.vmem %s94_s5, 32 }
  0x24   :  { %p5829_p11 = scmp.ne.s32.totalorder %s94_s5, %s5828_s30  ;;  %p5833_p12 = scmp.lt.s32.totalorder %s94_s5, %s94_s5 }
  0x25   :  { %p5834_p13 = scmp.lt.s32.totalorder %s5832_s18, %s5828_s30 }
  0x27   :  { %p5835_p0 = por %p5834_p13, %p5833_p12 }
  0x29   :  { %p5836_p1 = pnand %p5835_p0, %p5829_p11 }
  0x2b   :  { %5839 = shalt.err (!%p5836_p1)
}
  0x2c   :  { %96 = dma.hbm_to_vmem [thread:$0]  %s7676_s23, 16, %s94_s5, [#allocation5]  }
  0x2d   :  { %5840 = dma.done.wait [#allocation3], 512  }
  0x2e   :  { %5841 = vsyncadd [#allocation3], 4294966784 }
  0x2f   :  { %5842 = dma.done.wait [#allocation5], 16  }
  0x30   :  { %5843 = vsyncadd [#allocation5], 4294967280  ;;  %v5848_v0 = vmov 0   ;;  %s7692_s1 = sld [smem:[#allocation8_spill]]  ;;  %s7693_s29 = sld [smem:[#allocation9_spill]]  ;;  %vm154_vm0 = vcmask 1041408   ;;  %v104_v15 = vlaneseq }
  0x31   :  { %5247 = vset.pattern.permute.xlu0 %v5848_v0  ;;  %5248 = vset.pattern.permute.xlu1 %v5848_v0  ;;  %vm141_vm1 = vcmask 408576   ;;  %v5849_v19 = vmov 0.0   ;;  %s7694_s0 = sld [smem:[#allocation14_spill]]  ;;  %s7695_s28 = sld [smem:[#allocation15_spill]]  ;;  %vm243_vm6 = vcmask 261120   ;;  %vm432_vm7 = vcmask 1041409  }
  0x32   :  { %398 = vmatprep.mubr.bf16.mxu1 %v5848_v0  ;;  %v105_v16 = vand.u32 127, %v104_v15  ;;  %s7696_s5 = sld [smem:[#allocation12_spill]]  ;;  %s7697_s2 = sld [smem:[#allocation13_spill]]  ;;  %vm7682_vm8 = vcmask 1044484   ;;  %vm435_vm9 = vcmask 1042434   ;;  %vm438_vm10 = vcmask 1043459  }
  0x33   :  { %s7698_s7 = sld [smem:[#allocation16_spill]]  ;;  %vm720_vm11 = vcmask 1045509   ;;  %vm855_vm12 = vcmask 1046534   ;;  %vm985_vm13 = vcmask 1047559   ;;  %s5851_s30 = smov 32   ;;  %vm494_vm14 = vcmask 523264  }
  0x34   :  { %vm1407_vm15 = vcmask 1040384   ;;  %s7699_s26 = sld [smem:[#allocation11_spill]]  ;;  %s7700_s4 = sld [smem:[#allocation10_spill]] }
  0x36   :  { %v106_v1 = vld [vmem:[%s7692_s1] sm:$0xff]  ;;  %v108_v2 = vld [vmem:[%s7692_s1 + $0x10] sm:$0xff]  ;;  %v107_v3 = vld [vmem:[%s7692_s1 + $0x8] sm:$0xff] }
  0x37   :  { %111 = vperm.xlu0 %5247, %v106_v1   ;;  %117 = vperm.xlu1 %5248, %v108_v2   ;;  %v134_v4 = vld [vmem:[%s7693_s29] sm:$0xff]  ;;  %v135_v5 = vld [vmem:[%s7693_s29 + $0x8] sm:$0xff]  ;;  %v109_v6 = vld [vmem:[%s7692_s1 + $0x18] sm:$0xff] }
  0x38   :  { %v5224_v7 = vpack.c.bf16 %v135_v5, %v134_v4  ;;  %v136_v8 = vld [vmem:[%s7693_s29 + $0x10] sm:$0xff]  ;;  %v137_v9 = vld [vmem:[%s7693_s29 + $0x18] sm:$0xff]  ;;  %v138_v11 = vld [vmem:[%s7693_s29 + $0x20] sm:$0xff] }
  0x39   :  { %v5228_v10 = vpack.c.bf16 %v137_v9, %v136_v8  ;;  %v139_v12 = vld [vmem:[%s7693_s29 + $0x28] sm:$0xff]  ;;  %v140_v14 = vld [vmem:[%s7693_s29 + $0x30] sm:$0x3]  ;;  %v5302_v28 = vld [vmem:[%s7694_s0 + $0x14] ss:$8 sps:$4 sm:$0xff]  }
  0x3a   :  { %5225 = vmatprep.subr.bf16.mxu0 %v5224_v7  ;;  %v5232_v13 = vpack.c.bf16 %v139_v12, %v138_v11  ;;  %v5299_v26 = vld [vmem:[%s7694_s0 + $0x4] ss:$8 sps:$4 sm:$0xff]   ;;  %v5301_v27 = vld [vmem:[%s7694_s0] ss:$8 sps:$4 sm:$0xff]   ;;  %v5304_v29 = vld [vmem:[%s7694_s0 + $0x10] ss:$8 sps:$4 sm:$0xff]  }
  0x3b   :  { %114 = vperm.xlu0 %5247, %v107_v3   ;;  %120 = vperm.xlu1 %5248, %v109_v6   ;;  %v6069_v30 = vld [vmem:[%s7695_s28 + $0x4] ss:$8 sps:$4 sm:$0xff]   ;;  %v6074_v31 = vld [vmem:[%s7695_s28] ss:$8 sps:$4 sm:$0xff]   ;;  %v6081_v32 = vld [vmem:[%s7695_s28 + $0x14] ss:$8 sps:$4 sm:$0xff]  }
  0x3c   :  { %5227 = vmatpush3.bf16.msra.mxu0 %v5224_v7  ;;  %366 = vmatprep.subr.bf16.mxu1 %v5299_v26  ;;  %v6087_v33 = vld [vmem:[%s7695_s28 + $0x10] ss:$8 sps:$4 sm:$0xff]   ;;  %v6094_v34 = vld [vmem:[%s7695_s28 + $0x24] ss:$8 sps:$4 sm:$0xff]   ;;  %v6099_v35 = vld [vmem:[%s7695_s28 + $0x20] ss:$8 sps:$4 sm:$0xff]  }
  0x3d   :  { %5229 = vmatprep.subr.bf16.mxu0 %v5228_v10  ;;  %367 = vmatpush1.bf16.msra.mxu1 %v5301_v27  ;;  %v6105_v36 = vld [vmem:[%s7695_s28 + $0x34] ss:$8 sps:$4 sm:$0xff]   ;;  %v6111_v37 = vld [vmem:[%s7695_s28 + $0x30] ss:$8 sps:$4 sm:$0xff]  }
  0x3e   :  { %368 = vmatprep.subr.bf16.mxu1 %v5302_v28 }
  0x40   :  { %5231 = vmatpush3.bf16.msra.mxu0 %v5228_v10 }
  0x41   :  { %5233 = vmatprep.subr.bf16.mxu0 %v5232_v13  ;;  %369 = vmatpush1.bf16.msra.mxu1 %v5304_v29 }
  0x42   :  { %498 = vmatprep.subr.bf16.mxu1 %v6069_v30 }
  0x44   :  { %5235 = vmatpush3.bf16.msra.mxu0 %v5232_v13 }
  0x45   :  { %5144 = vmatprep.subr.msk.mxu0 %vm154_vm0, %v140_v14 }
  0x48   :  { %5145 = vmatpush3.msk.msra.mxu0 %vm154_vm0, %v140_v14 }
  0x49   :  { %615 = vmatprep.subr.bf16.mxu0 %v6069_v30 }
  0xb6   :  { %v112_v17 = vpop.permute.xlu0 %111  ;;  %v118_v18 = vpop.permute.xlu1 %117 }
  0xb7   :  { %vm122_vm2 = vcmp.eq.s32.totalorder %v112_v17, %v105_v16  ;;  %vm124_vm3 = vcmp.eq.s32.totalorder %v118_v18, %v105_v16 }
  0xb8   :  { %v4907_v20 = vsel %vm122_vm2, 1.0, %v5849_v19  ;;  %v4909_v23 = vsel %vm124_vm3, 1.0, %v5849_v19  ;;  %vm1723_vm2 = vcmask 1042432   ;;  %vm5852_vm3 = vmmov 0  }
  0xb9   :  { %5146 = vmatprep.mubr.msk.f32.mxu0 %vm141_vm1, %v4907_v20 }
  0xba   :  { %v115_v21 = vpop.permute.xlu0 %114  ;;  %v121_v22 = vpop.permute.xlu1 %120 }
  0xbb   :  { %vm123_vm4 = vcmp.eq.s32.totalorder %v115_v21, %v105_v16  ;;  %vm125_vm5 = vcmp.eq.s32.totalorder %v121_v22, %v105_v16 }
  0xbc   :  { %v4908_v24 = vsel %vm123_vm4, 1.0, %v5849_v19  ;;  %v4910_v25 = vsel %vm125_vm5, 1.0, %v5849_v19  ;;  %vm2214_vm4 = vcmask 1043456   ;;  %vm2223_vm5 = vcmask 1045504  }
  0xbd   :  { %5147 = vmatmul.mubr.msk.f32.vlgmr.msra.gmra.mrb[0].mxu0 %vm141_vm1, %v4908_v24 }
  0xbe   :  { %5149 = vmatprep.mubr.msk.f32.mxu0 %vm141_vm1, %v4909_v23  ;;  %616 = vmatpush1.bf16.msra.mxu0 %v6074_v31 }
  0xbf   :  { %617 = vmatprep.subr.bf16.mxu0 %v6081_v32 }
  0xc1   :  { %5150 = vmatmul.mubr.msk.f32.gmra.mrb[2].mxu0 %vm141_vm1, %v4910_v25  ;;  %vm1771_vm1 = vcmask 1044480  }
  0xc2   :  { %647 = vmatprep.mubr.bf16.mxu0 %v5848_v0  ;;  %618 = vmatpush1.bf16.msra.mxu0 %v6087_v33 }
  0xc3   :  { %619 = vmatprep.subr.bf16.mxu0 %v6094_v34 }
  0xc6   :  { %620 = vmatpush1.bf16.msra.mxu0 %v6099_v35 }
  0xc7   :  { %621 = vmatprep.subr.bf16.mxu0 %v6105_v36 }
  0xca   :  { %622 = vmatpush1.bf16.msra.mxu0 %v6111_v37 }
  0xcb   :  { %880 = vmatprep.subr.bf16.mxu0 %v6069_v30 }
 0x190   :  { %v5148_v38 = vpop.f32.mrb[0].mxu0 }
 0x191   :  { %v245_v39 = vsel %vm243_vm6, %v5148_v38, 0.0  ;;  %v224_v40 = vpop.f32.mrb[1].mxu0 }
 0x192   :  { %v244_v41 = vsel %vm243_vm6, %v224_v40, 0.0 }
 0x193   :  { %v246_v42 = vadd.f32 %v245_v39, %v244_v41 }
 0x194   :  { %v5151_v43 = vpop.f32.mrb[2].mxu0 }
 0x195   :  { %v247_v44 = vrot.slane %v246_v42, 4  ;;  %v291_v45 = vsel %vm243_vm6, %v5151_v43, 0.0  ;;  %v234_v46 = vpop.f32.mrb[3].mxu0 }
 0x196   :  { %v290_v47 = vsel %vm243_vm6, %v234_v46, 0.0 }
 0x197   :  { %v248_v48 = vadd.f32 %v247_v44, %v246_v42  ;;  %v292_v49 = vadd.f32 %v291_v45, %v290_v47 }
 0x199   :  { %v249_v50 = vrot.slane %v248_v48, 2  ;;  %v293_v51 = vrot.slane %v292_v49, 4 }
 0x19b   :  { %v250_v52 = vadd.f32 %v249_v50, %v248_v48  ;;  %v294_v53 = vadd.f32 %v293_v51, %v292_v49 }
 0x19d   :  { %v251_v54 = vrot.slane %v250_v52, 1  ;;  %v295_v55 = vrot.slane %v294_v53, 2 }
 0x19f   :  { %v252_v56 = vadd.f32 %v251_v54, %v250_v52  ;;  %v296_v57 = vadd.f32 %v295_v55, %v294_v53 }
 0x1a1   :  { %v253_v58 = vmul.f32 0.0625, %v252_v56  ;;  %v297_v59 = vrot.slane %v296_v57, 1 }
 0x1a3   :  { %v254_v60 = vsub.f32 %v224_v40, %v253_v58  ;;  %v255_v61 = vsub.f32 %v5148_v38, %v253_v58  ;;  %v298_v62 = vadd.f32 %v297_v59, %v296_v57  ;;  %v4916_v40 = vld [vmem:[%s7696_s5] ss:$0 sm:$0xff]  ;;  %v5850_v57 = vmov 0.0|0.0  }
 0x1a4   :  { %v6153_v58 = vshrl.u32 %v104_v15, 7 }
 0x1a5   :  { %v256_v63 = vmul.f32 %v254_v60, %v254_v60  ;;  %v257_v1 = vmul.f32 %v255_v61, %v255_v61  ;;  %v299_v2 = vmul.f32 0.0625, %v298_v62 }
 0x1a6   :  { %v6156_v59 = vsub.s32 1, %v6153_v58 }
 0x1a7   :  { %v258_v3 = vsel %vm243_vm6, %v256_v63, 0.0  ;;  %v259_v4 = vsel %vm243_vm6, %v257_v1, 0.0  ;;  %v300_v5 = vsub.f32 %v234_v46, %v299_v2  ;;  %v301_v6 = vsub.f32 %v5151_v43, %v299_v2  ;;  %v4917_v43 = vld [vmem:[%s7697_s2] ss:$0 sm:$0xff] }
 0x1a8   :  { %v260_v7 = vadd.f32 %v259_v4, %v258_v3 }
 0x1a9   :  { %v302_v8 = vmul.f32 %v300_v5, %v300_v5  ;;  %v303_v9 = vmul.f32 %v301_v6, %v301_v6 }
 0x1aa   :  { %v261_v10 = vrot.slane %v260_v7, 4 }
 0x1ab   :  { %v304_v11 = vsel %vm243_vm6, %v302_v8, 0.0  ;;  %v305_v12 = vsel %vm243_vm6, %v303_v9, 0.0 }
 0x1ac   :  { %v262_v13 = vadd.f32 %v261_v10, %v260_v7  ;;  %v306_v14 = vadd.f32 %v305_v12, %v304_v11 }
 0x1ae   :  { %v263_v16 = vrot.slane %v262_v13, 2  ;;  %v307_v17 = vrot.slane %v306_v14, 4 }
 0x1b0   :  { %v264_v18 = vadd.f32 %v263_v16, %v262_v13  ;;  %v308_v20 = vadd.f32 %v307_v17, %v306_v14 }
 0x1b2   :  { %v265_v21 = vrot.slane %v264_v18, 1  ;;  %v309_v22 = vrot.slane %v308_v20, 2 }
 0x1b4   :  { %v266_v23 = vadd.f32 %v265_v21, %v264_v18  ;;  %v310_v24 = vadd.f32 %v309_v22, %v308_v20 }
 0x1b6   :  { %v267_v25 = vmul.f32 0.0625, %v266_v23  ;;  %v311_v26 = vrot.slane %v310_v24, 1 }
 0x1b8   :  { %v268_v27 = vadd.f32 1e-05, %v267_v25  ;;  %v312_v28 = vadd.f32 %v311_v26, %v310_v24 }
 0x1ba   :  { %5401 = vrsqrt.f32 %v268_v27  ;;  %v313_v29 = vmul.f32 0.0625, %v312_v28 }
 0x1bc   :  { %v314_v38 = vadd.f32 1e-05, %v313_v29 }
 0x1be   :  { %5403 = vrsqrt.f32 %v314_v38 }
 0x1c4   :  { %v5402_v39 = vpop.eup %5401 }
 0x1c5   :  { %v270_v41 = vmul.f32 %v5402_v39, %v254_v60  ;;  %v271_v42 = vmul.f32 %v5402_v39, %v255_v61  ;;  %v328_v60 = vld [vmem:[%s7698_s7] sm:$0x3]  ;;  %v6162_v61 = vsub.s32 0, %v6153_v58 }
 0x1c6   :  { %v337_v62 = vrot.slane %v328_v60, %v6156_v59 }
 0x1c7   :  { %v279_v44 = vmul.f32 %v4916_v40, %v270_v41  ;;  %v280_v45 = vmul.f32 %v4916_v40, %v271_v42  ;;  %v333_v1 = vrot.slane %v328_v60, %v6162_v61 }
 0x1c8   :  { %v5404_v46 = vpop.eup %5403 }
 0x1c9   :  { %v288_v47 = vadd.f32 %v4917_v43, %v279_v44  ;;  %v316_v48 = vmul.f32 %v5404_v46, %v300_v5  ;;  %v317_v49 = vmul.f32 %v5404_v46, %v301_v6  ;;  %v289_v50 = vadd.f32 %v4917_v43, %v280_v45 }
 0x1cb   :  { %v318_v51 = vmul.f32 %v4916_v40, %v316_v48  ;;  %v319_v52 = vmul.f32 %v4916_v40, %v317_v49  ;;  %v322_v53 = vpack.c.bf16 %v289_v50, %v288_v47 }
 0x1cd   :  { %v320_v54 = vadd.f32 %v4917_v43, %v318_v51  ;;  %4922 = vmatmul.mubr.msk.bf16.vlgmr.msra.gmra.mrb[0].mxu1 %vm243_vm6, %v322_v53  ;;  %v321_v55 = vadd.f32 %v4917_v43, %v319_v52 }
 0x1ce   :  { %499 = vmatpush1.bf16.msra.mxu1 %v6074_v31  ;;  %408 = vmatprep.mubr.bf16.mxu1 %v5848_v0 }
 0x1cf   :  { %500 = vmatprep.subr.bf16.mxu1 %v6081_v32  ;;  %v323_v56 = vpack.c.bf16 %v321_v55, %v320_v54 }
 0x1d2   :  { %501 = vmatpush1.bf16.msra.mxu1 %v6087_v33 }
 0x1d3   :  { %502 = vmatprep.subr.bf16.mxu1 %v6094_v34 }
 0x1d5   :  { %4923 = vmatmul.mubr.msk.bf16.gmra.mrb[4].mxu1 %vm243_vm6, %v323_v56 }
 0x1d6   :  { %503 = vmatpush1.bf16.msra.mxu1 %v6099_v35  ;;  %530 = vmatprep.mubr.bf16.mxu1 %v5848_v0 }
 0x1d7   :  { %504 = vmatprep.subr.bf16.mxu1 %v6105_v36 }
 0x1da   :  { %505 = vmatpush1.bf16.msra.mxu1 %v6111_v37 }
 0x1db   :  { %750 = vmatprep.subr.bf16.mxu1 %v6069_v30 }
 0x1dd   :  { %531 = vmatmul.mubr.bf16.vlgmr.msra.gmra.mrb[8].mxu1 %v5850_v57 }
 0x1de   :  { %751 = vmatpush1.bf16.msra.mxu1 %v6074_v31  ;;  %782 = vmatprep.mubr.bf16.mxu1 %v5848_v0 }
 0x1df   :  { %752 = vmatprep.subr.bf16.mxu1 %v6081_v32 }
 0x1e2   :  { %753 = vmatpush1.bf16.msra.mxu1 %v6087_v33 }
 0x1e3   :  { %754 = vmatprep.subr.bf16.mxu1 %v6094_v34 }
 0x1e6   :  { %755 = vmatpush1.bf16.msra.mxu1 %v6099_v35 }
 0x1e7   :  { %756 = vmatprep.subr.bf16.mxu1 %v6105_v36 }
 0x1ea   :  { %757 = vmatpush1.bf16.msra.mxu1 %v6111_v37 }
 0x1eb   :  { %1013 = vmatprep.subr.bf16.mxu1 %v6069_v30 }
 0x2a0   :  { %v400_v63 = vpop.f32.mrb[0].mxu1 }
 0x2a1   :  { %v402_v2 = vpop.f32.mrb[1].mxu1  ;;  %v6172_v8 = vadd.f32 %v400_v63, %v333_v1 }
 0x2a2   :  { %v404_v3 = vpop.f32.mrb[2].mxu1  ;;  %v6166_v4 = vadd.f32 %v402_v2, %v337_v62 }
 0x2a3   :  { %v405_v15 = vadd.f32 %v404_v3, %v333_v1  ;;  %v406_v5 = vpop.f32.mrb[3].mxu1 }
 0x2a4   :  { %v6170_v7 = vadd.f32 %v406_v5, %v337_v62  ;;  %v445_v9 = vrot.slane %v6166_v4, 7  ;;  %v594_v10 = vrot.slane %v6166_v4, 5  ;;  %v723_v13 = vrot.slane %v6166_v4, 3 }
 0x2a5   :  { %v6168_v6 = vrot.slane %v405_v15, 7  ;;  %v858_v14 = vrot.slane %v6166_v4, 1 }
 0x2a6   :  { %v446_v11 = vrot.slane %v6170_v7, 6  ;;  %v595_v12 = vrot.slane %v6170_v7, 4  ;;  %v724_v17 = vrot.slane %v6170_v7, 2 }
 0x2a7   :  { %v433_v21 = vsel %vm432_vm7, %v6168_v6, %v6172_v8  ;;  %v589_v26 = vsel %vm435_vm9, %v6168_v6, %v6172_v8  ;;  %v718_v40 = vsel %vm438_vm10, %v6168_v6, %v6172_v8  ;;  %v853_v55 = vsel %vm7682_vm8, %v6168_v6, %v6172_v8 }
 0x2a8   :  { %v410_v16 = vpop.f32.mrb[4].mxu1  ;;  %v447_v22 = vsel %vm432_vm7, %v446_v11, %v445_v9  ;;  %v596_v23 = vsel %vm435_vm9, %v595_v12, %v594_v10  ;;  %v725_v27 = vsel %vm438_vm10, %v724_v17, %v723_v13  ;;  %v988_v28 = vsel %vm720_vm11, %v446_v11, %v445_v9 }
 0x2a9   :  { %v411_v18 = vadd.f32 %v410_v16, %v333_v1  ;;  %v412_v20 = vpop.f32.mrb[5].mxu1  ;;  %v1120_v41 = vsel %vm855_vm12, %v595_v12, %v594_v10  ;;  %v983_v9 = vsel %vm720_vm11, %v6168_v6, %v6172_v8 }
 0x2aa   :  { %v413_v24 = vadd.f32 %v412_v20, %v337_v62  ;;  %v414_v25 = vpop.f32.mrb[6].mxu1 }
 0x2ab   :  { %v6191_v29 = vrot.slane %v411_v18, 6  ;;  %v415_v38 = vadd.f32 %v414_v25, %v333_v1  ;;  %v416_v39 = vpop.f32.mrb[7].mxu1  ;;  %v859_v1 = vsel %vm7682_vm8, %v6170_v7, %v858_v14 }
 0x2ac   :  { %v597_v42 = vrot.slane %v413_v24, 3  ;;  %v726_v43 = vrot.slane %v413_v24, 1  ;;  %v860_v44 = vrot.slane %v413_v24, 7  ;;  %v6197_v45 = vadd.f32 %v416_v39, %v337_v62 }
 0x2ad   :  { %v6199_v46 = vrot.slane %v415_v38, 5  ;;  %v436_v47 = vsel %vm435_vm9, %v6191_v29, %v433_v21  ;;  %v448_v48 = vrot.slane %v413_v24, 5  ;;  %v6205_v49 = vsel %vm438_vm10, %v6191_v29, %v589_v26 }
 0x2ae   :  { %v450_v50 = vrot.slane %v6197_v45, 4  ;;  %v6209_v51 = vsel %vm438_vm10, %v597_v42, %v596_v23  ;;  %v6213_v52 = vsel %vm7682_vm8, %v6191_v29, %v718_v40  ;;  %v727_v62 = vsel %vm7682_vm8, %v726_v43, %v725_v27 }
 0x2af   :  { %v439_v53 = vsel %vm438_vm10, %v6199_v46, %v436_v47  ;;  %v449_v54 = vsel %vm435_vm9, %v448_v48, %v447_v22  ;;  %v6225_v63 = vsel %vm720_vm11, %v6191_v29, %v853_v55  ;;  %v6233_v15 = vsel %vm720_vm11, %v6197_v45, %v727_v62 }
 0x2b0   :  { %v532_v56 = vpop.f32.mrb[8].mxu1  ;;  %v451_v60 = vsel %vm438_vm10, %v450_v50, %v449_v54  ;;  %v861_v5 = vsel %vm720_vm11, %v860_v44, %v859_v1  ;;  %v862_v12 = vrot.slane %v6197_v45, 6  ;;  %v6242_v16 = vsel %vm855_vm12, %v6191_v29, %v983_v9 }
 0x2b1   :  { %v539_v2 = vadd.f32 %v532_v56, %v439_v53  ;;  %v534_v3 = vpop.f32.mrb[9].mxu1  ;;  %v989_v18 = vsel %vm855_vm12, %v448_v48, %v988_v28  ;;  %v1116_v22 = vsel %vm855_vm12, %v6168_v6, %v6172_v8  ;;  %v6259_v25 = vsel %vm985_vm13, %v597_v42, %v1120_v41 }
 0x2b2   :  { %v540_v10 = vadd.f32 %v534_v3, %v451_v60  ;;  %v536_v11 = vpop.f32.mrb[10].mxu1  ;;  %v6246_v21 = vsel %vm985_vm13, %v450_v50, %v989_v18  ;;  %v6252_v23 = vsel %vm855_vm12, %v862_v12, %v861_v5  ;;  %v6256_v24 = vsel %vm985_vm13, %v6191_v29, %v1116_v22 }
 0x2b3   :  { %5405 = vtanh.f32 %v539_v2  ;;  %v537_v20 = vpop.f32.mrb[11].mxu1  ;;  %v6262_v26 = vsel %vm985_vm13, %v724_v17, %v723_v13  ;;  %v6266_v27 = vsel %vm432_vm7, %v6197_v45, %v726_v43  ;;  %v6271_v28 = vsel %vm432_vm7, %v6191_v29, %v6168_v6 }
 0x2b4   :  { %5407 = vtanh.f32 %v540_v10  ;;  %v1496_v38 = vsel %vm432_vm7, %v860_v44, %v6170_v7  ;;  %v4932_v13 = vmul.f32 -1.442695, %v539_v2  ;;  %v4933_v17 = vmul.f32 -1.442695, %v540_v10 }
 0x2b5   :  { %v6276_v39 = vsel %vm435_vm9, %v862_v12, %v1496_v38 }
 0x2b6   :  { %5409 = vpow2.f32 %v4932_v13 }
 0x2b7   :  { %5411 = vpow2.f32 %v4933_v17 }
 0x2bd   :  { %v5406_v40 = vpop.eup %5405 }
 0x2be   :  { %v5408_v41 = vpop.eup %5407  ;;  %556 = vrot.lane.b32.xlu0 %v5406_v40, %s5845_s3 }
 0x2bf   :  { %574 = vrot.lane.b32.xlu1 %v5408_v41, %s5845_s3  ;;  %v599_v41 = vrot.slane %v6197_v45, 2 }
 0x2c0   :  { %v5410_v42 = vpop.eup %5409 }
 0x2c1   :  { %v5412_v43 = vpop.eup %5411  ;;  %v547_v47 = vadd.f32 1.0, %v5410_v42 }
 0x2c2   :  { %v548_v48 = vadd.f32 1.0, %v5412_v43  ;;  %v592_v43 = vsel %vm7682_vm8, %v6199_v46, %v6205_v49 }
 0x2c3   :  { %5413 = vrcp.f32 %v547_v47 }
 0x2c4   :  { %5415 = vrcp.f32 %v548_v48 }
 0x2cd   :  { %v5414_v7 = vpop.eup %5413 }
 0x2ce   :  { %v5416_v50 = vpop.eup %5415  ;;  %v553_v56 = vmul.f32 0.0, %v5414_v7 }
 0x2cf   :  { %v571_v62 = vmul.f32 0.0, %v5416_v50 }
 0x330   :  { %v557_v44 = vpop.permute.xlu0 %556 }
 0x331   :  { %v559_v53 = vmul.f32 %v5414_v7, %v557_v44  ;;  %v575_v54 = vpop.permute.xlu1 %574  ;;  %v600_v44 = vsel %vm7682_vm8, %v599_v41, %v6209_v51  ;;  %vm2228_vm8 = vcmask 1046528  }
 0x332   :  { %v577_v55 = vmul.f32 %v5416_v50, %v575_v54 }
 0x333   :  { %561 = vrot.lane.b32.xlu0 %v559_v53, %s5851_s30 }
 0x334   :  { %579 = vrot.lane.b32.xlu1 %v577_v55, %s5851_s30 }
 0x3a5   :  { %v562_v60 = vpop.permute.xlu0 %561 }
 0x3a6   :  { %v6282_v1 = vadd.f32 %v562_v60, %v553_v56  ;;  %v580_v2 = vpop.permute.xlu1 %579 }
 0x3a7   :  { %v6284_v3 = vadd.f32 %v580_v2, %v571_v62 }
 0x3a8   :  { %5417 = vtanh.f32 %v6282_v1 }
 0x3a9   :  { %5419 = vtanh.f32 %v6284_v3 }
 0x3b2   :  { %v5418_v5 = vpop.eup %5417 }
 0x3b3   :  { %v5420_v9 = vpop.eup %5419  ;;  %567 = vrot.lane.b32.xlu0 %v5418_v5, %s5845_s3 }
 0x3b4   :  { %585 = vrot.lane.b32.xlu1 %v5420_v9, %s5845_s3 }
 0x425   :  { %v568_v10 = vpop.permute.xlu0 %567 }
 0x426   :  { %v570_v11 = vmul.f32 %v5414_v7, %v568_v10  ;;  %v586_v12 = vpop.permute.xlu1 %585 }
 0x427   :  { %v6290_v18 = vmul.f32 %v5416_v50, %v586_v12 }
 0x428   :  { %603 = vrot.lane.b32.xlu0 %v570_v11, %s5851_s30 }
 0x429   :  { %607 = vrot.lane.b32.xlu1 %v6290_v18, %s5845_s3 }
 0x49a   :  { %v6295_v20 = vpop.permute.xlu0 %603 }
 0x49b   :  { %v608_v22 = vpop.permute.xlu1 %607 }
 0x49c   :  { %v610_v38 = vsel %vm243_vm6, %v6295_v20, %v608_v22 }
 0x49d   :  { %v611_v40 = vpack.c.bf16 %v610_v38, %v610_v38  ;;  %v677_v38 = vrot.slane %v6282_v1, 7 }
 0x49f   :  { %4934 = vmatmul.mubr.msk.bf16.vlgmr.msra.gmra.mrb[4].mxu0 %vm494_vm14, %v611_v40  ;;  %v698_v40 = vrot.slane %v6284_v3, 7 }
 0x4a0   :  { %881 = vmatpush1.bf16.msra.mxu0 %v6074_v31  ;;  %912 = vmatprep.mubr.bf16.mxu0 %v5848_v0 }
 0x4a1   :  { %882 = vmatprep.subr.bf16.mxu0 %v6081_v32 }
 0x4a4   :  { %883 = vmatpush1.bf16.msra.mxu0 %v6087_v33 }
 0x4a5   :  { %884 = vmatprep.subr.bf16.mxu0 %v6094_v34 }
 0x4a8   :  { %885 = vmatpush1.bf16.msra.mxu0 %v6099_v35 }
 0x4a9   :  { %886 = vmatprep.subr.bf16.mxu0 %v6105_v36 }
 0x4ac   :  { %887 = vmatpush1.bf16.msra.mxu0 %v6111_v37 }
 0x4ad   :  { %1139 = vmatprep.subr.bf16.mxu0 %v6069_v30 }
 0x572   :  { %v649_v13 = vpop.f32.mrb[4].mxu0 }
 0x573   :  { %v658_v17 = vrot.slane %v649_v13, 7  ;;  %v651_v42 = vpop.f32.mrb[5].mxu0 }
 0x574   :  { %v659_v47 = vrot.slane %v651_v42, 7  ;;  %v653_v48 = vpop.f32.mrb[6].mxu0 }
 0x575   :  { %v662_v7 = vadd.f32 %v658_v17, %v592_v43  ;;  %v654_v50 = vpop.f32.mrb[7].mxu0 }
 0x576   :  { %v663_v53 = vadd.f32 %v659_v47, %v600_v44 }
 0x577   :  { %5421 = vtanh.f32 %v662_v7  ;;  %v4935_v56 = vmul.f32 -1.442695, %v662_v7 }
 0x578   :  { %5423 = vtanh.f32 %v663_v53  ;;  %v4936_v49 = vmul.f32 -1.442695, %v663_v53 }
 0x579   :  { %5425 = vpow2.f32 %v4935_v56 }
 0x57a   :  { %5427 = vpow2.f32 %v4936_v49 }
 0x581   :  { %v5422_v54 = vpop.eup %5421 }
 0x582   :  { %v5424_v55 = vpop.eup %5423  ;;  %682 = vrot.lane.b32.xlu0 %v5422_v54, %s5845_s3 }
 0x583   :  { %703 = vrot.lane.b32.xlu1 %v5424_v55, %s5845_s3  ;;  %v5426_v60 = vpop.eup %5425 }
 0x584   :  { %v5428_v62 = vpop.eup %5427  ;;  %v670_v2 = vadd.f32 1.0, %v5426_v60 }
 0x585   :  { %v671_v5 = vadd.f32 1.0, %v5428_v62 }
 0x586   :  { %5429 = vrcp.f32 %v670_v2 }
 0x587   :  { %5431 = vrcp.f32 %v671_v5 }
 0x590   :  { %v5430_v51 = vpop.eup %5429 }
 0x591   :  { %v5432_v10 = vpop.eup %5431  ;;  %v679_v13 = vmul.f32 %v5430_v51, %v677_v38 }
 0x592   :  { %v700_v42 = vmul.f32 %v5432_v10, %v698_v40 }
 0x5f4   :  { %v683_v9 = vpop.permute.xlu0 %682 }
 0x5f5   :  { %v685_v11 = vmul.f32 %v5430_v51, %v683_v9  ;;  %v704_v12 = vpop.permute.xlu1 %703 }
 0x5f6   :  { %v706_v22 = vmul.f32 %v5432_v10, %v704_v12 }
 0x5f7   :  { %687 = vrot.lane.b32.xlu0 %v685_v11, %s5851_s30  ;;  %v721_v11 = vsel %vm720_vm11, %v6199_v46, %v6213_v52 }
 0x5f8   :  { %708 = vrot.lane.b32.xlu1 %v706_v22, %s5851_s30 }
 0x669   :  { %v688_v17 = vpop.permute.xlu0 %687 }
 0x66a   :  { %v6323_v43 = vadd.f32 %v688_v17, %v679_v13  ;;  %v709_v47 = vpop.permute.xlu1 %708 }
 0x66b   :  { %v6325_v48 = vadd.f32 %v709_v47, %v700_v42 }
 0x66c   :  { %5433 = vtanh.f32 %v6323_v43 }
 0x66d   :  { %5435 = vtanh.f32 %v6325_v48 }
 0x676   :  { %v5434_v7 = vpop.eup %5433 }
 0x677   :  { %v5436_v44 = vpop.eup %5435  ;;  %693 = vrot.lane.b32.xlu0 %v5434_v7, %s5845_s3 }
 0x678   :  { %714 = vrot.lane.b32.xlu1 %v5436_v44, %s5845_s3 }
 0x6e9   :  { %v694_v1 = vpop.permute.xlu0 %693 }
 0x6ea   :  { %v696_v3 = vmul.f32 %v5430_v51, %v694_v1  ;;  %v715_v50 = vpop.permute.xlu1 %714 }
 0x6eb   :  { %v6331_v53 = vmul.f32 %v5432_v10, %v715_v50 }
 0x6ec   :  { %731 = vrot.lane.b32.xlu0 %v696_v3, %s5851_s30 }
 0x6ed   :  { %735 = vrot.lane.b32.xlu1 %v6331_v53, %s5845_s3 }
 0x75e   :  { %v6336_v54 = vpop.permute.xlu0 %731 }
 0x75f   :  { %v736_v55 = vpop.permute.xlu1 %735 }
 0x760   :  { %v738_v56 = vsel %vm243_vm6, %v6336_v54, %v736_v55 }
 0x761   :  { %v739_v49 = vpack.c.bf16 %v738_v56, %v738_v56 }
 0x763   :  { %v743_v60 = vshll.u32 %v739_v49, 16  ;;  %v741_v62 = vshrl.u32 %v739_v49, 16 }
 0x765   :  { %v745_v2 = vrot.slane %v743_v60, 1 }
 0x767   :  { %v746_v5 = vor.u32 %v745_v2, %v741_v62  ;;  %v812_v62 = vrot.slane %v6323_v43, 7  ;;  %v833_v2 = vrot.slane %v6325_v48, 7 }
 0x769   :  { %4937 = vmatmul.mubr.msk.bf16.vlgmr.msra.gmra.mrb[12].mxu1 %vm494_vm14, %v746_v5 }
 0x76a   :  { %1014 = vmatpush1.bf16.msra.mxu1 %v6074_v31  ;;  %1045 = vmatprep.mubr.bf16.mxu1 %v5848_v0 }
 0x76b   :  { %1015 = vmatprep.subr.bf16.mxu1 %v6081_v32 }
 0x76e   :  { %1016 = vmatpush1.bf16.msra.mxu1 %v6087_v33 }
 0x76f   :  { %1017 = vmatprep.subr.bf16.mxu1 %v6094_v34 }
 0x772   :  { %1018 = vmatpush1.bf16.msra.mxu1 %v6099_v35 }
 0x773   :  { %1019 = vmatprep.subr.bf16.mxu1 %v6105_v36 }
 0x776   :  { %1020 = vmatpush1.bf16.msra.mxu1 %v6111_v37 }
 0x777   :  { %1330 = vmatprep.subr.bf16.mxu1 %v6069_v30 }
 0x83c   :  { %v784_v51 = vpop.f32.mrb[12].mxu1 }
 0x83d   :  { %v793_v9 = vrot.slane %v784_v51, 6  ;;  %v786_v10 = vpop.f32.mrb[13].mxu1 }
 0x83e   :  { %v794_v12 = vrot.slane %v786_v10, 6  ;;  %v788_v22 = vpop.f32.mrb[14].mxu1 }
 0x83f   :  { %v797_v38 = vadd.f32 %v793_v9, %v721_v11  ;;  %v789_v40 = vpop.f32.mrb[15].mxu1 }
 0x840   :  { %v798_v13 = vadd.f32 %v794_v12, %v6233_v15 }
 0x841   :  { %5437 = vtanh.f32 %v797_v38  ;;  %v4938_v47 = vmul.f32 -1.442695, %v797_v38 }
 0x842   :  { %5439 = vtanh.f32 %v798_v13  ;;  %v4939_v7 = vmul.f32 -1.442695, %v798_v13 }
 0x843   :  { %5441 = vpow2.f32 %v4938_v47 }
 0x844   :  { %5443 = vpow2.f32 %v4939_v7 }
 0x84b   :  { %v5438_v17 = vpop.eup %5437 }
 0x84c   :  { %v5440_v42 = vpop.eup %5439  ;;  %817 = vrot.lane.b32.xlu0 %v5438_v17, %s5845_s3 }
 0x84d   :  { %838 = vrot.lane.b32.xlu1 %v5440_v42, %s5845_s3  ;;  %v5442_v44 = vpop.eup %5441 }
 0x84e   :  { %v5444_v52 = vpop.eup %5443  ;;  %v805_v1 = vadd.f32 1.0, %v5442_v44 }
 0x84f   :  { %v806_v3 = vadd.f32 1.0, %v5444_v52 }
 0x850   :  { %5445 = vrcp.f32 %v805_v1 }
 0x851   :  { %5447 = vrcp.f32 %v806_v3 }
 0x85a   :  { %v5446_v50 = vpop.eup %5445 }
 0x85b   :  { %v5448_v55 = vpop.eup %5447  ;;  %v814_v5 = vmul.f32 %v5446_v50, %v812_v62 }
 0x85c   :  { %v835_v9 = vmul.f32 %v5448_v55, %v833_v2 }
 0x8be   :  { %v818_v15 = vpop.permute.xlu0 %817 }
 0x8bf   :  { %v820_v56 = vmul.f32 %v5446_v50, %v818_v15  ;;  %v839_v49 = vpop.permute.xlu1 %838 }
 0x8c0   :  { %v841_v60 = vmul.f32 %v5448_v55, %v839_v49 }
 0x8c1   :  { %822 = vrot.lane.b32.xlu0 %v820_v56, %s5851_s30 }
 0x8c2   :  { %843 = vrot.lane.b32.xlu1 %v841_v60, %s5851_s30 }
 0x933   :  { %v823_v51 = vpop.permute.xlu0 %822 }
 0x934   :  { %v6360_v10 = vadd.f32 %v823_v51, %v814_v5  ;;  %v844_v11 = vpop.permute.xlu1 %843 }
 0x935   :  { %v6362_v12 = vadd.f32 %v844_v11, %v835_v9 }
 0x936   :  { %5449 = vtanh.f32 %v6360_v10 }
 0x937   :  { %5451 = vtanh.f32 %v6362_v12 }
 0x940   :  { %v5450_v22 = vpop.eup %5449 }
 0x941   :  { %v5452_v38 = vpop.eup %5451  ;;  %828 = vrot.lane.b32.xlu0 %v5450_v22, %s5845_s3 }
 0x942   :  { %849 = vrot.lane.b32.xlu1 %v5452_v38, %s5845_s3 }
 0x9b3   :  { %v829_v43 = vpop.permute.xlu0 %828 }
 0x9b4   :  { %v831_v48 = vmul.f32 %v5446_v50, %v829_v43  ;;  %v850_v40 = vpop.permute.xlu1 %849  ;;  %v856_v50 = vsel %vm855_vm12, %v6199_v46, %v6225_v63 }
 0x9b5   :  { %v6368_v13 = vmul.f32 %v5448_v55, %v850_v40 }
 0x9b6   :  { %866 = vrot.lane.b32.xlu0 %v831_v48, %s5851_s30 }
 0x9b7   :  { %870 = vrot.lane.b32.xlu1 %v6368_v13, %s5845_s3 }
 0xa28   :  { %v6373_v17 = vpop.permute.xlu0 %866 }
 0xa29   :  { %v871_v42 = vpop.permute.xlu1 %870 }
 0xa2a   :  { %v873_v47 = vsel %vm243_vm6, %v6373_v17, %v871_v42  ;;  %v942_v42 = vrot.slane %v6360_v10, 7 }
 0xa2b   :  { %v874_v7 = vpack.c.bf16 %v873_v47, %v873_v47  ;;  %v963_v47 = vrot.slane %v6362_v12, 7 }
 0xa2d   :  { %v876_v44 = vrot.slane %v874_v7, 1 }
 0xa2f   :  { %4940 = vmatmul.mubr.msk.bf16.vlgmr.msra.gmra.mrb[8].mxu0 %vm494_vm14, %v876_v44 }
 0xa30   :  { %1140 = vmatpush1.bf16.msra.mxu0 %v6074_v31  ;;  %1171 = vmatprep.mubr.bf16.mxu0 %v5848_v0 }
 0xa31   :  { %1141 = vmatprep.subr.bf16.mxu0 %v6081_v32 }
 0xa34   :  { %1142 = vmatpush1.bf16.msra.mxu0 %v6087_v33 }
 0xa35   :  { %1143 = vmatprep.subr.bf16.mxu0 %v6094_v34 }
 0xa38   :  { %1144 = vmatpush1.bf16.msra.mxu0 %v6099_v35 }
 0xa39   :  { %1145 = vmatprep.subr.bf16.mxu0 %v6105_v36 }
 0xa3c   :  { %1146 = vmatpush1.bf16.msra.mxu0 %v6111_v37 }
 0xa3d   :  { %1524 = vmatprep.subr.bf16.mxu0 %v6069_v30 }
 0xb02   :  { %v914_v52 = vpop.f32.mrb[8].mxu0 }
 0xb03   :  { %v923_v1 = vrot.slane %v914_v52, 5  ;;  %v916_v3 = vpop.f32.mrb[9].mxu0 }
 0xb04   :  { %v924_v15 = vrot.slane %v916_v3, 5  ;;  %v918_v55 = vpop.f32.mrb[10].mxu0 }
 0xb05   :  { %v927_v56 = vadd.f32 %v923_v1, %v856_v50  ;;  %v919_v49 = vpop.f32.mrb[11].mxu0 }
 0xb06   :  { %v928_v60 = vadd.f32 %v924_v15, %v6252_v23 }
 0xb07   :  { %5453 = vtanh.f32 %v927_v56  ;;  %v4941_v30 = vmul.f32 -1.442695, %v927_v56 }
 0xb08   :  { %5455 = vtanh.f32 %v928_v60  ;;  %v4942_v5 = vmul.f32 -1.442695, %v928_v60 }
 0xb09   :  { %5457 = vpow2.f32 %v4941_v30 }
 0xb0a   :  { %5459 = vpow2.f32 %v4942_v5 }
 0xb11   :  { %v5454_v62 = vpop.eup %5453 }
 0xb12   :  { %v5456_v2 = vpop.eup %5455  ;;  %947 = vrot.lane.b32.xlu0 %v5454_v62, %s5845_s3 }
 0xb13   :  { %968 = vrot.lane.b32.xlu1 %v5456_v2, %s5845_s3  ;;  %v5458_v51 = vpop.eup %5457 }
 0xb14   :  { %v5460_v63 = vpop.eup %5459  ;;  %v935_v9 = vadd.f32 1.0, %v5458_v51 }
 0xb15   :  { %v936_v11 = vadd.f32 1.0, %v5460_v63 }
 0xb16   :  { %5461 = vrcp.f32 %v935_v9 }
 0xb17   :  { %5463 = vrcp.f32 %v936_v11 }
 0xb20   :  { %v5462_v22 = vpop.eup %5461 }
 0xb21   :  { %v5464_v38 = vpop.eup %5463  ;;  %v944_v7 = vmul.f32 %v5462_v22, %v942_v42 }
 0xb22   :  { %v965_v52 = vmul.f32 %v5464_v38, %v963_v47 }
 0xb84   :  { %v948_v23 = vpop.permute.xlu0 %947 }
 0xb85   :  { %v950_v43 = vmul.f32 %v5462_v22, %v948_v23  ;;  %v969_v48 = vpop.permute.xlu1 %968 }
 0xb86   :  { %v971_v40 = vmul.f32 %v5464_v38, %v969_v48 }
 0xb87   :  { %952 = vrot.lane.b32.xlu0 %v950_v43, %s5851_s30 }
 0xb88   :  { %973 = vrot.lane.b32.xlu1 %v971_v40, %s5851_s30 }
 0xbf9   :  { %v953_v44 = vpop.permute.xlu0 %952 }
 0xbfa   :  { %v6397_v1 = vadd.f32 %v953_v44, %v944_v7  ;;  %v974_v3 = vpop.permute.xlu1 %973 }
 0xbfb   :  { %v6399_v50 = vadd.f32 %v974_v3, %v965_v52 }
 0xbfc   :  { %5465 = vtanh.f32 %v6397_v1 }
 0xbfd   :  { %5467 = vtanh.f32 %v6399_v50 }
 0xc06   :  { %v5466_v15 = vpop.eup %5465 }
 0xc07   :  { %v5468_v55 = vpop.eup %5467  ;;  %958 = vrot.lane.b32.xlu0 %v5466_v15, %s5845_s3 }
 0xc08   :  { %979 = vrot.lane.b32.xlu1 %v5468_v55, %s5845_s3 }
 0xc79   :  { %v959_v10 = vpop.permute.xlu0 %958 }
 0xc7a   :  { %v961_v12 = vmul.f32 %v5462_v22, %v959_v10  ;;  %v980_v56 = vpop.permute.xlu1 %979  ;;  %v1075_v10 = vrot.slane %v6397_v1, 7 }
 0xc7b   :  { %v6405_v49 = vmul.f32 %v5464_v38, %v980_v56 }
 0xc7c   :  { %993 = vrot.lane.b32.xlu0 %v961_v12, %s5851_s30  ;;  %v1096_v12 = vrot.slane %v6399_v50, 7 }
 0xc7d   :  { %997 = vrot.lane.b32.xlu1 %v6405_v49, %s5845_s3 }
 0xcee   :  { %v6410_v60 = vpop.permute.xlu0 %993 }
 0xcef   :  { %v998_v62 = vpop.permute.xlu1 %997 }
 0xcf0   :  { %v1000_v2 = vsel %vm243_vm6, %v6410_v60, %v998_v62 }
 0xcf1   :  { %v1001_v30 = vpack.c.bf16 %v1000_v2, %v1000_v2 }
 0xcf3   :  { %v1003_v5 = vshrl.u32 %v1001_v30, 16  ;;  %v1006_v51 = vshll.u32 %v1001_v30, 16 }
 0xcf5   :  { %v1005_v63 = vrot.slane %v1003_v5, 1  ;;  %v1008_v9 = vrot.slane %v1006_v51, 2 }
 0xcf7   :  { %v1009_v11 = vor.u32 %v1008_v9, %v1005_v63 }
 0xcf9   :  { %4943 = vmatmul.mubr.msk.bf16.vlgmr.msra.gmra.mrb[16].mxu1 %vm494_vm14, %v1009_v11 }
 0xcfa   :  { %1331 = vmatpush1.bf16.msra.mxu1 %v6074_v31  ;;  %1362 = vmatprep.mubr.bf16.mxu1 %v5848_v0  ;;  %v986_v31 = vsel %vm985_vm13, %v6199_v46, %v6242_v16 }
 0xcfb   :  { %1332 = vmatprep.subr.bf16.mxu1 %v6081_v32 }
 0xcfe   :  { %1333 = vmatpush1.bf16.msra.mxu1 %v6087_v33 }
 0xcff   :  { %1334 = vmatprep.subr.bf16.mxu1 %v6094_v34 }
 0xd02   :  { %1335 = vmatpush1.bf16.msra.mxu1 %v6099_v35 }
 0xd03   :  { %1336 = vmatprep.subr.bf16.mxu1 %v6105_v36 }
 0xd06   :  { %1337 = vmatpush1.bf16.msra.mxu1 %v6111_v37 }
 0xd07   :  { %5152 = vmatprep.subr.bf16.mxu1 %v5849_v19 }
 0xdcc   :  { %v1047_v22 = vpop.f32.mrb[16].mxu1 }
 0xdcd   :  { %v1056_v23 = vrot.slane %v1047_v22, 4  ;;  %v1049_v38 = vpop.f32.mrb[17].mxu1 }
 0xdce   :  { %v1057_v32 = vrot.slane %v1049_v38, 4  ;;  %v1051_v43 = vpop.f32.mrb[18].mxu1 }
 0xdcf   :  { %v1060_v33 = vadd.f32 %v1056_v23, %v986_v31  ;;  %v1052_v48 = vpop.f32.mrb[19].mxu1 }
 0xdd0   :  { %v1061_v34 = vadd.f32 %v1057_v32, %v6246_v21  ;;  %v5790_v48 = vld [vmem:[%s7695_s28 + $0x14] ss:$8 sps:$4 sm:$0xff]  }
 0xdd1   :  { %5469 = vtanh.f32 %v1060_v33  ;;  %v4944_v37 = vmul.f32 -1.442695, %v1060_v33  ;;  %v5789_v33 = vld [vmem:[%s7695_s28] ss:$8 sps:$4 sm:$0xff]  }
 0xdd2   :  { %5471 = vtanh.f32 %v1061_v34  ;;  %v4945_v40 = vmul.f32 -1.442695, %v1061_v34  ;;  %v5791_v34 = vld [vmem:[%s7695_s28 + $0x10] ss:$8 sps:$4 sm:$0xff]  }
 0xdd3   :  { %5473 = vpow2.f32 %v4944_v37  ;;  %v5794_v37 = vld [vmem:[%s7695_s28 + $0x34] ss:$8 sps:$4 sm:$0xff]  }
 0xdd4   :  { %5475 = vpow2.f32 %v4945_v40  ;;  %v5795_v40 = vld [vmem:[%s7695_s28 + $0x30] ss:$8 sps:$4 sm:$0xff]  }
 0xddb   :  { %v5470_v35 = vpop.eup %5469 }
 0xddc   :  { %v5472_v36 = vpop.eup %5471  ;;  %1080 = vrot.lane.b32.xlu0 %v5470_v35, %s5845_s3  ;;  %v5792_v35 = vld [vmem:[%s7695_s28 + $0x24] ss:$8 sps:$4 sm:$0xff]  }
 0xddd   :  { %1101 = vrot.lane.b32.xlu1 %v5472_v36, %s5845_s3  ;;  %v5474_v42 = vpop.eup %5473  ;;  %v5793_v36 = vld [vmem:[%s7695_s28 + $0x20] ss:$8 sps:$4 sm:$0xff]  }
 0xdde   :  { %v5476_v16 = vpop.eup %5475  ;;  %v1068_v47 = vadd.f32 1.0, %v5474_v42 }
 0xddf   :  { %v1069_v7 = vadd.f32 1.0, %v5476_v16 }
 0xde0   :  { %5477 = vrcp.f32 %v1068_v47 }
 0xde1   :  { %5479 = vrcp.f32 %v1069_v7 }
 0xdea   :  { %v5478_v44 = vpop.eup %5477 }
 0xdeb   :  { %v5480_v52 = vpop.eup %5479  ;;  %v1077_v56 = vmul.f32 %v5478_v44, %v1075_v10 }
 0xdec   :  { %v1098_v2 = vmul.f32 %v5480_v52, %v1096_v12 }
 0xe4e   :  { %v1081_v21 = vpop.permute.xlu0 %1080 }
 0xe4f   :  { %v1083_v3 = vmul.f32 %v5478_v44, %v1081_v21  ;;  %v1102_v15 = vpop.permute.xlu1 %1101 }
 0xe50   :  { %v1104_v55 = vmul.f32 %v5480_v52, %v1102_v15 }
 0xe51   :  { %1085 = vrot.lane.b32.xlu0 %v1083_v3, %s5851_s30 }
 0xe52   :  { %1106 = vrot.lane.b32.xlu1 %v1104_v55, %s5851_s30 }
 0xec3   :  { %v1086_v62 = vpop.permute.xlu0 %1085 }
 0xec4   :  { %v6434_v30 = vadd.f32 %v1086_v62, %v1077_v56  ;;  %v1107_v5 = vpop.permute.xlu1 %1106 }
 0xec5   :  { %v6436_v51 = vadd.f32 %v1107_v5, %v1098_v2 }
 0xec6   :  { %5481 = vtanh.f32 %v6434_v30 }
 0xec7   :  { %5483 = vtanh.f32 %v6436_v51 }
 0xed0   :  { %v5482_v63 = vpop.eup %5481 }
 0xed1   :  { %v5484_v9 = vpop.eup %5483  ;;  %1091 = vrot.lane.b32.xlu0 %v5482_v63, %s5845_s3 }
 0xed2   :  { %1112 = vrot.lane.b32.xlu1 %v5484_v9, %s5845_s3 }
 0xf43   :  { %v1092_v1 = vpop.permute.xlu0 %1091 }
 0xf44   :  { %v1094_v50 = vmul.f32 %v5478_v44, %v1092_v1  ;;  %v1113_v11 = vpop.permute.xlu1 %1112 }
 0xf45   :  { %v6442_v22 = vmul.f32 %v5480_v52, %v1113_v11 }
 0xf46   :  { %1125 = vrot.lane.b32.xlu0 %v1094_v50, %s5851_s30 }
 0xf47   :  { %1129 = vrot.lane.b32.xlu1 %v6442_v22, %s5845_s3 }
 0xfb8   :  { %v6447_v23 = vpop.permute.xlu0 %1125 }
 0xfb9   :  { %v1130_v38 = vpop.permute.xlu1 %1129 }
 0xfba   :  { %v1132_v31 = vsel %vm243_vm6, %v6447_v23, %v1130_v38 }
 0xfbb   :  { %v1133_v32 = vpack.c.bf16 %v1132_v31, %v1132_v31 }
 0xfbd   :  { %v1135_v43 = vrot.slane %v1133_v32, 2 }
 0xfbf   :  { %4946 = vmatmul.mubr.msk.bf16.vlgmr.msra.gmra.mrb[12].mxu0 %vm494_vm14, %v1135_v43 }
 0xfc0   :  { %1525 = vmatpush1.bf16.msra.mxu0 %v5789_v33  ;;  %1556 = vmatprep.mubr.bf16.mxu0 %v5848_v0 }
 0xfc1   :  { %1526 = vmatprep.subr.bf16.mxu0 %v5790_v48 }
 0xfc4   :  { %1527 = vmatpush1.bf16.msra.mxu0 %v5791_v34 }
 0xfc5   :  { %1528 = vmatprep.subr.bf16.mxu0 %v5792_v35 }
 0xfc8   :  { %1529 = vmatpush1.bf16.msra.mxu0 %v5793_v36 }
 0xfc9   :  { %1530 = vmatprep.subr.bf16.mxu0 %v5794_v37 }
 0xfcc   :  { %1531 = vmatpush1.bf16.msra.mxu0 %v5795_v40 }
 0xfcd   :  { %5158 = vmatprep.subr.bf16.mxu0 %v5849_v19 }
0x1092   :  { %v1173_v42 = vpop.f32.mrb[12].mxu0 }
0x1093   :  { %v1182_v16 = vrot.slane %v1173_v42, 3  ;;  %v1175_v47 = vpop.f32.mrb[13].mxu0 }
0x1094   :  { %v1183_v7 = vrot.slane %v1175_v47, 3  ;;  %v1177_v44 = vpop.f32.mrb[14].mxu0  ;;  %v1215_v47 = vrot.slane %v6434_v30, 7 }
0x1095   :  { %v1186_v21 = vadd.f32 %v1182_v16, %v6256_v24  ;;  %v1188_v52 = vadd.f32 %v1182_v16, %v6199_v46  ;;  %v1178_v3 = vpop.f32.mrb[15].mxu0 }
0x1096   :  { %v1187_v15 = vadd.f32 %v1183_v7, %v6259_v25  ;;  %v1189_v55 = vadd.f32 %v1183_v7, %v599_v41 }
0x1097   :  { %5485 = vtanh.f32 %v1186_v21  ;;  %v4947_v25 = vmul.f32 -1.442695, %v1186_v21  ;;  %v4949_v62 = vmul.f32 -1.442695, %v1188_v52 }
0x1098   :  { %5487 = vtanh.f32 %v1188_v52  ;;  %v4948_v45 = vmul.f32 -1.442695, %v1187_v15  ;;  %v4950_v41 = vmul.f32 -1.442695, %v1189_v55 }
0x1099   :  { %5489 = vtanh.f32 %v1187_v15 }
0x109a   :  { %5491 = vtanh.f32 %v1189_v55  ;;  %v1254_v55 = vrot.slane %v6436_v51, 7 }
0x109b   :  { %5493 = vpow2.f32 %v4947_v25 }
0x109c   :  { %5495 = vpow2.f32 %v4949_v62 }
0x109d   :  { %5497 = vpow2.f32 %v4948_v45 }
0x109e   :  { %5499 = vpow2.f32 %v4950_v41 }
0x10a1   :  { %v5486_v10 = vpop.eup %5485 }
0x10a2   :  { %v5488_v12 = vpop.eup %5487  ;;  %1223 = vrot.lane.b32.xlu0 %v5486_v10, %s5845_s3 }
0x10a3   :  { %1225 = vrot.lane.b32.xlu1 %v5488_v12, %s5845_s3  ;;  %v5490_v56 = vpop.eup %5489 }
0x10a4   :  { %v5492_v24 = vpop.eup %5491 }
0x10a5   :  { %v5494_v2 = vpop.eup %5493 }
0x10a6   :  { %1262 = vrot.lane.b32.xlu0 %v5490_v56, %s5845_s3  ;;  %v5496_v5 = vpop.eup %5495  ;;  %v1202_v63 = vadd.f32 1.0, %v5494_v2 }
0x10a7   :  { %1264 = vrot.lane.b32.xlu1 %v5492_v24, %s5845_s3  ;;  %v1204_v9 = vadd.f32 1.0, %v5496_v5  ;;  %v5498_v1 = vpop.eup %5497 }
0x10a8   :  { %v5500_v50 = vpop.eup %5499  ;;  %5501 = vrcp.f32 %v1202_v63  ;;  %v1203_v11 = vadd.f32 1.0, %v5498_v1 }
0x10a9   :  { %5503 = vrcp.f32 %v1204_v9  ;;  %v1205_v38 = vadd.f32 1.0, %v5500_v50 }
0x10aa   :  { %5505 = vrcp.f32 %v1203_v11 }
0x10ab   :  { %5507 = vrcp.f32 %v1205_v38 }
0x10b2   :  { %v5502_v31 = vpop.eup %5501 }
0x10b3   :  { %v5504_v43 = vpop.eup %5503  ;;  %v1217_v7 = vmul.f32 %v5502_v31, %v1215_v47 }
0x10b4   :  { %v5506_v35 = vpop.eup %5505  ;;  %v1218_v44 = vmul.f32 %v5504_v43, %v1215_v47 }
0x10b5   :  { %v5508_v37 = vpop.eup %5507  ;;  %v1256_v56 = vmul.f32 %v5506_v35, %v1254_v55 }
0x10b6   :  { %v1257_v24 = vmul.f32 %v5508_v37, %v1254_v55 }
0x1114   :  { %v1224_v32 = vpop.permute.xlu0 %1223 }
0x1115   :  { %v1226_v33 = vpop.permute.xlu1 %1225  ;;  %v1229_v48 = vmul.f32 %v5502_v31, %v1224_v32 }
0x1116   :  { %v1230_v34 = vmul.f32 %v5504_v43, %v1226_v33 }
0x1117   :  { %1233 = vrot.lane.b32.xlu0 %v1229_v48, %s5851_s30 }
0x1118   :  { %1235 = vrot.lane.b32.xlu1 %v1230_v34, %s5851_s30  ;;  %v1263_v36 = vpop.permute.xlu0 %1262 }
0x1119   :  { %v1265_v40 = vpop.permute.xlu1 %1264  ;;  %v1268_v42 = vmul.f32 %v5506_v35, %v1263_v36 }
0x111a   :  { %v1269_v16 = vmul.f32 %v5508_v37, %v1265_v40 }
0x111b   :  { %1272 = vrot.lane.b32.xlu0 %v1268_v42, %s5851_s30 }
0x111c   :  { %1274 = vrot.lane.b32.xlu1 %v1269_v16, %s5851_s30 }
0x1189   :  { %v1234_v21 = vpop.permute.xlu0 %1233 }
0x118a   :  { %v1236_v52 = vpop.permute.xlu1 %1235  ;;  %v6489_v3 = vadd.f32 %v1234_v21, %v1217_v7 }
0x118b   :  { %v1240_v15 = vadd.f32 %v1236_v52, %v1218_v44 }
0x118c   :  { %5509 = vtanh.f32 %v6489_v3  ;;  %v1408_v10 = vrot.slane %v6489_v3, 7 }
0x118d   :  { %5511 = vtanh.f32 %v1240_v15  ;;  %v1409_v12 = vrot.slane %v1240_v15, 7  ;;  %v1273_v25 = vpop.permute.xlu0 %1272 }
0x118e   :  { %v1275_v62 = vpop.permute.xlu1 %1274  ;;  %v6499_v45 = vadd.f32 %v1273_v25, %v1256_v56 }
0x118f   :  { %v6497_v30 = vsel %vm1407_vm15, %v1408_v10, %v1409_v12  ;;  %v1279_v41 = vadd.f32 %v1275_v62, %v1257_v24 }
0x1190   :  { %5513 = vtanh.f32 %v6499_v45  ;;  %v1451_v51 = vrot.slane %v6499_v45, 7 }
0x1191   :  { %5515 = vtanh.f32 %v1279_v41  ;;  %v1452_v2 = vrot.slane %v1279_v41, 7 }
0x1193   :  { %v6506_v5 = vsel %vm1407_vm15, %v1451_v51, %v1452_v2 }
0x1196   :  { %v5510_v63 = vpop.eup %5509 }
0x1197   :  { %v5512_v9 = vpop.eup %5511  ;;  %1245 = vrot.lane.b32.xlu0 %v5510_v63, %s5845_s3  ;;  %v1292_v63 = vsel %vm985_vm13, %v6168_v6, %v6172_v8 }
0x1198   :  { %1247 = vrot.lane.b32.xlu1 %v5512_v9, %s5845_s3  ;;  %v1293_v9 = vsel %vm432_vm7, %v6199_v46, %v6191_v29 }
0x119a   :  { %v5514_v1 = vpop.eup %5513 }
0x119b   :  { %v5516_v50 = vpop.eup %5515  ;;  %1284 = vrot.lane.b32.xlu0 %v5514_v1, %s5845_s3 }
0x119c   :  { %1286 = vrot.lane.b32.xlu1 %v5516_v50, %s5845_s3 }
0x1209   :  { %v1246_v11 = vpop.permute.xlu0 %1245 }
0x120a   :  { %v1248_v38 = vpop.permute.xlu1 %1247  ;;  %v1251_v32 = vmul.f32 %v5502_v31, %v1246_v11 }
0x120b   :  { %v1252_v33 = vmul.f32 %v5504_v43, %v1248_v38 }
0x120c   :  { %1302 = vrot.lane.b32.xlu0 %v1251_v32, %s5851_s30 }
0x120d   :  { %1304 = vrot.lane.b32.xlu1 %v1252_v33, %s5851_s30  ;;  %v1285_v48 = vpop.permute.xlu0 %1284 }
0x120e   :  { %v1287_v34 = vpop.permute.xlu1 %1286  ;;  %v1290_v36 = vmul.f32 %v5506_v35, %v1285_v48 }
0x120f   :  { %v1291_v40 = vmul.f32 %v5508_v37, %v1287_v34 }
0x1210   :  { %v1772_v42 = vrot.slane %v1290_v36, 3 }
0x1211   :  { %v1773_v16 = vrot.slane %v1291_v40, 3  ;;  %v5249_v47 = vpack.i.bf16 %v1291_v40, %v1290_v36 }
0x1213   :  { %5250 = vrot.lane.b32.xlu0 %v5249_v47, %s5845_s3  ;;  %v6516_v7 = vsel %vm1771_vm1, %v1772_v42, %v1773_v16 }
0x127e   :  { %v6518_v44 = vpop.permute.xlu0 %1302 }
0x127f   :  { %v6520_v52 = vpop.permute.xlu1 %1304 }
0x1285   :  { %v5251_v31 = vpop.permute.xlu0 %5250 }
0x1286   :  { %v5253_v43 = vunpack.i.h.bf16 %v5251_v31  ;;  %v5252_v21 = vunpack.i.l.bf16 %v5251_v31 }
0x1288   :  { %v1317_v35 = vsel %vm243_vm6, %v6520_v52, %v5253_v43  ;;  %v1316_v37 = vsel %vm243_vm6, %v6518_v44, %v5252_v21 }
0x1289   :  { %v1318_v15 = vpack.c.bf16 %v1317_v35, %v1316_v37 }
0x128b   :  { %v1320_v55 = vshrl.u32 %v1318_v15, 16  ;;  %v1323_v12 = vshll.u32 %v1318_v15, 16 }
0x128d   :  { %v1322_v56 = vrot.slane %v1320_v55, 2  ;;  %v1325_v24 = vrot.slane %v1323_v12, 3 }
0x128f   :  { %v1326_v25 = vor.u32 %v1325_v24, %v1322_v56 }
0x1291   :  { %4951 = vmatmul.mubr.msk.bf16.vlgmr.msra.gmra.mrb[20].mxu1 %vm494_vm14, %v1326_v25 }
0x1292   :  { %5154 = vmatprep.mubr.msk.bf16.mxu1 %vm5852_vm3, %v5849_v19 }
0x1364   :  { %v1364_v62 = vpop.f32.mrb[20].mxu1 }
0x1365   :  { %v1373_v41 = vrot.slane %v1364_v62, 2  ;;  %v1366_v2 = vpop.f32.mrb[21].mxu1 }
0x1366   :  { %v1374_v1 = vrot.slane %v1366_v2, 2  ;;  %v1368_v50 = vpop.f32.mrb[22].mxu1 }
0x1367   :  { %v1377_v11 = vadd.f32 %v1373_v41, %v1292_v63  ;;  %v1379_v38 = vadd.f32 %v1373_v41, %v1293_v9  ;;  %v1369_v32 = vpop.f32.mrb[23].mxu1 }
0x1368   :  { %v1378_v33 = vadd.f32 %v1374_v1, %v6262_v26  ;;  %v1380_v48 = vadd.f32 %v1374_v1, %v6266_v27 }
0x1369   :  { %5517 = vtanh.f32 %v1377_v11  ;;  %v4952_v40 = vmul.f32 -1.442695, %v1377_v11  ;;  %v4954_v26 = vmul.f32 -1.442695, %v1379_v38 }
0x136a   :  { %5519 = vtanh.f32 %v1379_v38  ;;  %v4953_v27 = vmul.f32 -1.442695, %v1378_v33  ;;  %v4955_v42 = vmul.f32 -1.442695, %v1380_v48 }
0x136b   :  { %5521 = vtanh.f32 %v1378_v33 }
0x136c   :  { %5523 = vtanh.f32 %v1380_v48 }
0x136d   :  { %5525 = vpow2.f32 %v4952_v40 }
0x136e   :  { %5527 = vpow2.f32 %v4954_v26 }
0x136f   :  { %5529 = vpow2.f32 %v4953_v27 }
0x1370   :  { %5531 = vpow2.f32 %v4955_v42 }
0x1373   :  { %v5518_v34 = vpop.eup %5517 }
0x1374   :  { %v5520_v36 = vpop.eup %5519  ;;  %1419 = vrot.lane.b32.xlu1 %v5518_v34, %s5845_s3 }
0x1375   :  { %1421 = vrot.lane.b32.xlu0 %v5520_v36, %s5845_s3  ;;  %v5522_v6 = vpop.eup %5521 }
0x1376   :  { %v5524_v29 = vpop.eup %5523 }
0x1377   :  { %v5526_v16 = vpop.eup %5525 }
0x1378   :  { %1462 = vrot.lane.b32.xlu1 %v5522_v6, %s5845_s3  ;;  %v5528_v47 = vpop.eup %5527  ;;  %v1393_v31 = vadd.f32 1.0, %v5526_v16 }
0x1379   :  { %1464 = vrot.lane.b32.xlu0 %v5524_v29, %s5845_s3  ;;  %v1395_v43 = vadd.f32 1.0, %v5528_v47  ;;  %v5530_v21 = vpop.eup %5529 }
0x137a   :  { %v5532_v35 = vpop.eup %5531  ;;  %5533 = vrcp.f32 %v1393_v31  ;;  %v1394_v37 = vadd.f32 1.0, %v5530_v21 }
0x137b   :  { %5535 = vrcp.f32 %v1395_v43  ;;  %v1396_v15 = vadd.f32 1.0, %v5532_v35 }
0x137c   :  { %5537 = vrcp.f32 %v1394_v37 }
0x137d   :  { %5539 = vrcp.f32 %v1396_v15 }
0x1384   :  { %v5534_v55 = vpop.eup %5533 }
0x1385   :  { %v5536_v56 = vpop.eup %5535  ;;  %v1413_v11 = vmul.f32 %v5534_v55, %v1408_v10 }
0x1386   :  { %v5538_v41 = vpop.eup %5537  ;;  %v1414_v38 = vmul.f32 %v5536_v56, %v6497_v30 }
0x1387   :  { %v5540_v63 = vpop.eup %5539  ;;  %v1456_v29 = vmul.f32 %v5538_v41, %v1451_v51 }
0x1388   :  { %v1457_v40 = vmul.f32 %v5540_v63, %v6506_v5 }
0x13e6   :  { %v1420_v12 = vpop.permute.xlu1 %1419 }
0x13e7   :  { %v1422_v24 = vpop.permute.xlu0 %1421  ;;  %v1425_v25 = vmul.f32 %v5534_v55, %v1420_v12 }
0x13e8   :  { %v1426_v62 = vmul.f32 %v5536_v56, %v1422_v24 }
0x13e9   :  { %1429 = vrot.lane.b32.xlu1 %v1425_v25, %s5851_s30 }
0x13ea   :  { %1431 = vrot.lane.b32.xlu0 %v1426_v62, %s5851_s30  ;;  %v1463_v2 = vpop.permute.xlu1 %1462 }
0x13eb   :  { %v1465_v9 = vpop.permute.xlu0 %1464  ;;  %v1468_v1 = vmul.f32 %v5538_v41, %v1463_v2 }
0x13ec   :  { %v1469_v50 = vmul.f32 %v5540_v63, %v1465_v9 }
0x13ed   :  { %1472 = vrot.lane.b32.xlu1 %v1468_v1, %s5851_s30 }
0x13ee   :  { %1474 = vrot.lane.b32.xlu0 %v1469_v50, %s5851_s30 }
0x145b   :  { %v1430_v32 = vpop.permute.xlu1 %1429 }
0x145c   :  { %v1432_v33 = vpop.permute.xlu0 %1431  ;;  %v6546_v48 = vadd.f32 %v1430_v32, %v1413_v11 }
0x145d   :  { %v1436_v34 = vadd.f32 %v1432_v33, %v1414_v38 }
0x145e   :  { %5541 = vtanh.f32 %v6546_v48  ;;  %v1601_v36 = vrot.slane %v6546_v48, 7  ;;  %v1873_v48 = vrot.slane %v6405_v49, 7 }
0x145f   :  { %5543 = vtanh.f32 %v1436_v34  ;;  %v1602_v6 = vrot.slane %v1436_v34, 7  ;;  %v1473_v3 = vpop.permute.xlu1 %1472 }
0x1460   :  { %v1475_v30 = vpop.permute.xlu0 %1474  ;;  %v6558_v26 = vadd.f32 %v1473_v3, %v1456_v29 }
0x1461   :  { %v6556_v10 = vsel %vm1407_vm15, %v1601_v36, %v1602_v6  ;;  %v1479_v27 = vadd.f32 %v1475_v30, %v1457_v40  ;;  %v1493_v40 = vsel %vm435_vm9, %v6199_v46, %v6271_v28 }
0x1462   :  { %5545 = vtanh.f32 %v6558_v26  ;;  %v1644_v42 = vrot.slane %v6558_v26, 7 }
0x1463   :  { %5547 = vtanh.f32 %v1479_v27  ;;  %v1645_v16 = vrot.slane %v1479_v27, 7 }
0x1465   :  { %v6565_v45 = vsel %vm1407_vm15, %v1644_v42, %v1645_v16 }
0x1468   :  { %v5542_v51 = vpop.eup %5541 }
0x1469   :  { %v5544_v5 = vpop.eup %5543  ;;  %1441 = vrot.lane.b32.xlu1 %v5542_v51, %s5845_s3 }
0x146a   :  { %1443 = vrot.lane.b32.xlu0 %v5544_v5, %s5845_s3 }
0x146c   :  { %v5546_v47 = vpop.eup %5545 }
0x146d   :  { %v5548_v31 = vpop.eup %5547  ;;  %1484 = vrot.lane.b32.xlu1 %v5546_v47, %s5845_s3 }
0x146e   :  { %1486 = vrot.lane.b32.xlu0 %v5548_v31, %s5845_s3 }
0x14db   :  { %v1442_v43 = vpop.permute.xlu1 %1441 }
0x14dc   :  { %v1444_v21 = vpop.permute.xlu0 %1443  ;;  %v1447_v35 = vmul.f32 %v5534_v55, %v1442_v43 }
0x14dd   :  { %v1448_v37 = vmul.f32 %v5536_v56, %v1444_v21 }
0x14de   :  { %1502 = vrot.lane.b32.xlu1 %v1447_v35, %s5851_s30 }
0x14df   :  { %1504 = vrot.lane.b32.xlu0 %v1448_v37, %s5851_s30  ;;  %v1485_v15 = vpop.permute.xlu1 %1484 }
0x14e0   :  { %v1487_v12 = vpop.permute.xlu0 %1486  ;;  %v1490_v24 = vmul.f32 %v5538_v41, %v1485_v15 }
0x14e1   :  { %v1491_v25 = vmul.f32 %v5540_v63, %v1487_v12 }
0x14e2   :  { %v1724_v62 = vrot.slane %v1490_v24, 5 }
0x14e3   :  { %v1725_v2 = vrot.slane %v1491_v25, 5  ;;  %v5254_v9 = vpack.i.bf16 %v1491_v25, %v1490_v24 }
0x14e5   :  { %5255 = vrot.lane.b32.xlu1 %v5254_v9, %s5845_s3  ;;  %v6575_v1 = vsel %vm1723_vm2, %v1724_v62, %v1725_v2 }
0x1550   :  { %v6577_v50 = vpop.permute.xlu1 %1502 }
0x1551   :  { %v6579_v38 = vpop.permute.xlu0 %1504 }
0x1557   :  { %v5256_v55 = vpop.permute.xlu1 %5255 }
0x1558   :  { %v5258_v56 = vunpack.i.h.bf16 %v5256_v55  ;;  %v5257_v11 = vunpack.i.l.bf16 %v5256_v55 }
0x155a   :  { %v1517_v41 = vsel %vm243_vm6, %v6579_v38, %v5258_v56  ;;  %v1516_v63 = vsel %vm243_vm6, %v6577_v50, %v5257_v11 }
0x155b   :  { %v1518_v32 = vpack.c.bf16 %v1517_v41, %v1516_v63 }
0x155d   :  { %v1520_v33 = vrot.slane %v1518_v32, 3 }
0x155f   :  { %4956 = vmatmul.mubr.msk.bf16.vlgmr.msra.gmra.mrb[16].mxu0 %vm494_vm14, %v1520_v33 }
0x1560   :  { %5160 = vmatprep.mubr.msk.bf16.mxu0 %vm5852_vm3, %v5849_v19 }
0x1632   :  { %v1558_v34 = vpop.f32.mrb[16].mxu0 }
0x1633   :  { %v1567_v6 = vrot.slane %v1558_v34, 1  ;;  %v1560_v29 = vpop.f32.mrb[17].mxu0 }
0x1634   :  { %v1568_v3 = vrot.slane %v1560_v29, 1  ;;  %v1562_v30 = vpop.f32.mrb[18].mxu0 }
0x1635   :  { %v1573_v27 = vadd.f32 %v1567_v6, %v1493_v40  ;;  %v1563_v16 = vpop.f32.mrb[19].mxu0  ;;  %v1571_v47 = vadd.f32 %v1567_v6, %v6172_v8 }
0x1636   :  { %v1574_v51 = vadd.f32 %v1568_v3, %v6276_v39  ;;  %v1572_v5 = vadd.f32 %v1568_v3, %v858_v14 }
0x1637   :  { %v4959_v39 = vmul.f32 -1.442695, %v1573_v27  ;;  %v4957_v8 = vmul.f32 -1.442695, %v1571_v47 }
0x1638   :  { %5549 = vtanh.f32 %v1572_v5  ;;  %v4958_v4 = vmul.f32 -1.442695, %v1572_v5  ;;  %v4960_v14 = vmul.f32 -1.442695, %v1574_v51 }
0x1639   :  { %5551 = vtanh.f32 %v1574_v51 }
0x163a   :  { %5553 = vtanh.f32 %v1573_v27 }
0x163b   :  { %5555 = vtanh.f32 %v1571_v47 }
0x163c   :  { %5557 = vpow2.f32 %v4958_v4 }
0x163d   :  { %5559 = vpow2.f32 %v4960_v14  ;;  %v2014_v14 = vrot.slane %v6290_v18, 1 }
0x163e   :  { %5561 = vpow2.f32 %v4959_v39 }
0x163f   :  { %5563 = vpow2.f32 %v4957_v8 }
0x1642   :  { %v5550_v31 = vpop.eup %5549 }
0x1643   :  { %v5552_v43 = vpop.eup %5551  ;;  %1655 = vrot.lane.b32.xlu0 %v5550_v31, %s5845_s3 }
0x1644   :  { %1657 = vrot.lane.b32.xlu1 %v5552_v43, %s5845_s3  ;;  %v5554_v46 = vpop.eup %5553 }
0x1645   :  { %v5556_v28 = vpop.eup %5555 }
0x1646   :  { %v5558_v21 = vpop.eup %5557 }
0x1647   :  { %1614 = vrot.lane.b32.xlu0 %v5554_v46, %s5845_s3  ;;  %v5560_v35 = vpop.eup %5559  ;;  %v1588_v37 = vadd.f32 1.0, %v5558_v21 }
0x1648   :  { %1612 = vrot.lane.b32.xlu1 %v5556_v28, %s5845_s3  ;;  %v5562_v15 = vpop.eup %5561  ;;  %v1590_v12 = vadd.f32 1.0, %v5560_v35 }
0x1649   :  { %v5564_v24 = vpop.eup %5563  ;;  %v1589_v25 = vadd.f32 1.0, %v5562_v15  ;;  %5565 = vrcp.f32 %v1588_v37 }
0x164a   :  { %v1587_v62 = vadd.f32 1.0, %v5564_v24  ;;  %5567 = vrcp.f32 %v1590_v12  ;;  %v5853_v24 = vmov 1966171168  }
0x164b   :  { %5569 = vrcp.f32 %v1589_v25 }
0x164c   :  { %5571 = vrcp.f32 %v1587_v62 }
0x1653   :  { %v5566_v2 = vpop.eup %5565 }
0x1654   :  { %v5568_v55 = vpop.eup %5567  ;;  %v1649_v40 = vmul.f32 %v5566_v2, %v1644_v42 }
0x1655   :  { %v5570_v63 = vpop.eup %5569  ;;  %v1650_v3 = vmul.f32 %v5568_v55, %v6565_v45 }
0x1656   :  { %v5572_v33 = vpop.eup %5571  ;;  %v1607_v5 = vmul.f32 %v5570_v63, %v6556_v10  ;;  %v1951_v10 = vrot.slane %v6331_v53, 3 }
0x1657   :  { %v1606_v47 = vmul.f32 %v5572_v33, %v1601_v36  ;;  %v1827_v36 = vrot.slane %v6442_v22, 1  ;;  %v1904_v22 = vrot.slane %v6368_v13, 5  ;;  %v1696_v13 = vunpack.c.l.s4 %v5853_v24 }
0x1659   :  { %v1697_v25 = vunpack.c.0.s8 %v1696_v13 }
0x16b5   :  { %v1656_v9 = vpop.permute.xlu0 %1655 }
0x16b6   :  { %v1658_v56 = vpop.permute.xlu1 %1657  ;;  %v1661_v11 = vmul.f32 %v5566_v2, %v1656_v9  ;;  %v6634_v9 = vsub.s32 %v1697_v25, %v6153_v58 }
0x16b7   :  { %v1662_v41 = vmul.f32 %v5568_v55, %v1658_v56 }
0x16b8   :  { %1665 = vrot.lane.b32.xlu0 %v1661_v11, %s5851_s30 }
0x16b9   :  { %1667 = vrot.lane.b32.xlu1 %v1662_v41, %s5851_s30  ;;  %v1615_v32 = vpop.permute.xlu0 %1614 }
0x16ba   :  { %v1613_v34 = vpop.permute.xlu1 %1612  ;;  %v1619_v6 = vmul.f32 %v5570_v63, %v1615_v32 }
0x16bb   :  { %v1618_v29 = vmul.f32 %v5572_v33, %v1613_v34 }
0x16bc   :  { %1624 = vrot.lane.b32.xlu0 %v1619_v6, %s5851_s30 }
0x16bd   :  { %1622 = vrot.lane.b32.xlu1 %v1618_v29, %s5851_s30 }
0x172a   :  { %v1666_v30 = vpop.permute.xlu0 %1665 }
0x172b   :  { %v1668_v27 = vpop.permute.xlu1 %1667  ;;  %v1671_v16 = vadd.f32 %v1666_v30, %v1649_v40 }
0x172c   :  { %v1672_v51 = vadd.f32 %v1668_v27, %v1650_v3 }
0x172d   :  { %5573 = vtanh.f32 %v1671_v16 }
0x172e   :  { %5575 = vtanh.f32 %v1672_v51  ;;  %v1625_v31 = vpop.permute.xlu0 %1624 }
0x172f   :  { %v1623_v43 = vpop.permute.xlu1 %1622  ;;  %v1629_v46 = vadd.f32 %v1625_v31, %v1607_v5 }
0x1730   :  { %v1628_v28 = vadd.f32 %v1623_v43, %v1606_v47 }
0x1731   :  { %5577 = vtanh.f32 %v1629_v46 }
0x1732   :  { %5579 = vtanh.f32 %v1628_v28 }
0x1737   :  { %v5574_v26 = vpop.eup %5573 }
0x1738   :  { %v5576_v42 = vpop.eup %5575  ;;  %1677 = vrot.lane.b32.xlu0 %v5574_v26, %s5845_s3 }
0x1739   :  { %1679 = vrot.lane.b32.xlu1 %v5576_v42, %s5845_s3 }
0x173b   :  { %v5578_v45 = vpop.eup %5577 }
0x173c   :  { %v5580_v4 = vpop.eup %5579  ;;  %1636 = vrot.lane.b32.xlu0 %v5578_v45, %s5845_s3 }
0x173d   :  { %1634 = vrot.lane.b32.xlu1 %v5580_v4, %s5845_s3 }
0x1740   :  { %1727 = vrot.lane.b32.xlu0 %v6575_v1, %s5845_s3 }
0x1741   :  { %1775 = vrot.lane.b32.xlu1 %v6516_v7, %s5845_s3 }
0x1744   :  { %1874 = vrot.lane.b32.xlu0 %v1873_v48, %s5845_s3 }
0x1748   :  { %1828 = vrot.lane.b32.xlu0 %v1827_v36, %s5845_s3 }
0x174c   :  { %1952 = vrot.lane.b32.xlu0 %v1951_v10, %s5845_s3 }
0x1750   :  { %2015 = vrot.lane.b32.xlu0 %v2014_v14, %s5845_s3 }
0x17aa   :  { %v1678_v1 = vpop.permute.xlu0 %1677 }
0x17ab   :  { %v1680_v39 = vpop.permute.xlu1 %1679  ;;  %v1683_v8 = vmul.f32 %v5566_v2, %v1678_v1 }
0x17ac   :  { %v1684_v7 = vmul.f32 %v5568_v55, %v1680_v39 }
0x17ad   :  { %v1687_v21 = vrot.slane %v1683_v8, 7 }
0x17ae   :  { %v1688_v49 = vrot.slane %v1684_v7, 7  ;;  %v1637_v37 = vpop.permute.xlu0 %1636 }
0x17af   :  { %v1641_v53 = vmul.f32 %v5570_v63, %v1637_v37  ;;  %v1635_v15 = vpop.permute.xlu1 %1634 }
0x17b0   :  { %v1689_v35 = vsel %vm1407_vm15, %v1687_v21, %v1688_v49  ;;  %v1640_v18 = vmul.f32 %v5572_v33, %v1635_v15 }
0x17b1   :  { %1690 = vrot.lane.b32.xlu1 %v1689_v35, %s5845_s3 }
0x17b2   :  { %v1728_v12 = vpop.permute.xlu0 %1727 }
0x17b3   :  { %v1776_v2 = vpop.permute.xlu1 %1775  ;;  %v1730_v55 = vsel %vm243_vm6, %v6336_v54, %v1728_v12 }
0x17b4   :  { %v1778_v56 = vsel %vm243_vm6, %v6373_v17, %v1776_v2  ;;  %v1739_v63 = vrot.slane %v1730_v55, %v6634_v9  ;;  %v1732_v6 = vcombine.high %v1730_v55, %v1730_v55 }
0x17b5   :  { %1905 = vrot.lane.b32.xlu1 %v1904_v22, %s5845_s3  ;;  %v1780_v32 = vcombine.high %v1778_v56, %v1778_v56  ;;  %v1787_v33 = vrot.slane %v1778_v56, %v6634_v9 }
0x17b6   :  { %v1875_v62 = vpop.permute.xlu0 %1874  ;;  %v1747_v29 = vcombine.high %v1739_v63, %v1739_v63  ;;  %v1754_v30 = vrot.slane %v1739_v63, %v6634_v9 }
0x17b7   :  { %v1877_v11 = vsel %vm243_vm6, %v6447_v23, %v1875_v62  ;;  %v1794_v54 = vrot.slane %v1780_v32, %v6634_v9  ;;  %v1795_v3 = vcombine.high %v1787_v33, %v1787_v33  ;;  %v1746_v23 = vrot.slane %v1732_v6, %v6634_v9 }
0x17b8   :  { %v1879_v34 = vcombine.high %v1877_v11, %v1877_v11  ;;  %v1803_v5 = vrot.slane %v1787_v33, %v6634_v9  ;;  %v1769_v28 = vcombine.high %v1754_v30, %v1754_v30 }
0x17b9   :  { %2010 = vrot.lane.b32.xlu1 %v1641_v53, %s5851_s30  ;;  %v1796_v47 = vcombine.high %v1794_v54, %v1794_v54  ;;  %v1817_v31 = vrot.slane %v1795_v3, %v6634_v9  ;;  %v1761_v46 = vrot.slane %v1746_v23, %v6634_v9 }
0x17ba   :  { %v1829_v41 = vpop.permute.xlu0 %1828  ;;  %v1886_v17 = vrot.slane %v1879_v34, %v6634_v9  ;;  %v1825_v48 = vcombine.high %v1803_v5, %v1803_v5  ;;  %v2069_v7 = vrot.slane %v1769_v28, %v6162_v61 }
0x17bb   :  { %v1831_v58 = vsel %vm243_vm6, %v6410_v60, %v1829_v41  ;;  %v6655_v60 = vrot.slane %v1747_v29, %v6634_v9  ;;  %v6667_v10 = vrot.slane %v1796_v47, %v6634_v9  ;;  %v1826_v14 = vcombine.high %v1817_v31, %v1817_v31 }
0x17bc   :  { %v1833_v27 = vcombine.high %v1831_v58, %v1831_v58  ;;  %v1840_v16 = vrot.slane %v1831_v58, %v6634_v9  ;;  %v1887_v43 = vcombine.high %v1886_v17, %v1886_v17  ;;  %v6660_v42 = vrot.slane %v1886_v17, %v6634_v9 }
0x17bd   :  { %2008 = vrot.lane.b32.xlu1 %v1640_v18, %s5851_s30  ;;  %v1770_v36 = vcombine.high %v6655_v60, %v6655_v60  ;;  %v2065_v8 = vrot.slane %v6655_v60, %v6162_v61  ;;  %v2077_v21 = vrot.slane %v1761_v46, %v6162_v61  ;;  %v6684_v15 = vrot.slane %v1825_v48, %v6162_v61 }
0x17be   :  { %v1953_v40 = vpop.permute.xlu0 %1952  ;;  %v1847_v45 = vrot.slane %v1833_v27, %v6634_v9  ;;  %v1848_v4 = vcombine.high %v1840_v16, %v1840_v16  ;;  %v6670_v1 = vrot.slane %v1887_v43, %v6634_v9  ;;  %v1902_v35 = vcombine.high %v6660_v42, %v6660_v42 }
0x17bf   :  { %v1955_v51 = vsel %vm243_vm6, %v6577_v50, %v1953_v40  ;;  %v1810_v50 = vrot.slane %v1794_v54, %v6634_v9  ;;  %v1956_v39 = vsel %vm243_vm6, %v6579_v38, %v1953_v40  ;;  %v2073_v18 = vrot.slane %v1770_v36, %v6162_v61 }
0x17c0   :  { %v1959_v26 = vcombine.high %v1955_v51, %v1955_v51  ;;  %v1849_v22 = vcombine.high %v1847_v45, %v1847_v45  ;;  %v1856_v37 = vrot.slane %v1847_v45, %v6634_v9  ;;  %v1863_v53 = vrot.slane %v1848_v4, %v6634_v9 }
0x17c1   :  { %v2093_v38 = vrot.slane %v1810_v50, %v6162_v61  ;;  %v1990_v12 = vrot.slane %v1956_v39, %v6634_v9  ;;  %v2089_v13 = vrot.slane %v1826_v14, %v6162_v61  ;;  %v2097_v25 = vrot.slane %v6667_v10, %v6162_v61 }
0x17c2   :  { %v1966_v49 = vrot.slane %v1959_v26, %v6634_v9  ;;  %v1903_v62 = vcombine.high %v6670_v1, %v6670_v1  ;;  %v2125_v55 = vrot.slane %v6660_v42, %v6162_v61  ;;  %v2129_v56 = vrot.slane %v6670_v1, %v6162_v61  ;;  %v2016_v39 = vpop.permute.xlu0 %2015 }
0x17c3   :  { %v2133_v63 = vrot.slane %v1902_v35, %v6162_v61  ;;  %v1870_v32 = vrot.slane %v1849_v22, %v6634_v9  ;;  %v1871_v33 = vcombine.high %v1856_v37, %v1856_v37  ;;  %v1872_v34 = vcombine.high %v1863_v53, %v1863_v53 }
0x17c4   :  { %v1967_v11 = vcombine.high %v1966_v49, %v1966_v49  ;;  %v2109_v6 = vrot.slane %v1856_v37, %v6162_v61  ;;  %v1991_v29 = vcombine.high %v1990_v12, %v1990_v12  ;;  %v2137_v54 = vrot.slane %v1903_v62, %v6162_v61 }
0x17c5   :  { %v1998_v3 = vrot.slane %v1990_v12, %v6634_v9  ;;  %v2105_v5 = vrot.slane %v1872_v34, %v6162_v61  ;;  %v2113_v60 = vrot.slane %v1870_v32, %v6162_v61  ;;  %v6716_v47 = vrot.slane %v1966_v49, %v6634_v9 }
0x17c6   :  { %v1981_v30 = vrot.slane %v1967_v11, %v6634_v9  ;;  %v2117_v26 = vrot.slane %v1871_v33, %v6162_v61 }
0x17c7   :  { %v2173_v45 = vrot.slane %v1998_v3, %v6162_v61 }
0x17c8   :  { %v1983_v48 = vcombine.high %v1981_v30, %v1981_v30 }
0x1823   :  { %v1691_v24 = vpop.permute.xlu1 %1690 }
0x1824   :  { %v1693_v2 = vsel %vm243_vm6, %v6295_v20, %v1691_v24 }
0x1825   :  { %v1701_v41 = vrot.slane %v1693_v2, %v6634_v9 }
0x1827   :  { %v1702_v58 = vcombine.high %v1701_v41, %v1701_v41  ;;  %v1709_v20 = vrot.slane %v1701_v41, %v6634_v9  ;;  %v1906_v40 = vpop.permute.xlu1 %1905 }
0x1828   :  { %v1908_v17 = vsel %vm243_vm6, %v6518_v44, %v1906_v40  ;;  %v1909_v23 = vsel %vm243_vm6, %v6520_v52, %v1906_v40  ;;  %v2005_v44 = vrot.slane %v1991_v29, %v6634_v9 }
0x1829   :  { %v1716_v27 = vrot.slane %v1702_v58, %v6634_v9  ;;  %v1717_v16 = vcombine.high %v1709_v20, %v1709_v20  ;;  %v1912_v51 = vcombine.high %v1908_v17, %v1908_v17  ;;  %v1943_v31 = vrot.slane %v1909_v23, %v6634_v9 }
0x182a   :  { %v2202_v36 = vsel %vm1407_vm15, %v1709_v20, %v2065_v8  ;;  %v2177_v37 = vrot.slane %v2005_v44, %v6162_v61 }
0x182b   :  { %v1718_v43 = vcombine.high %v1716_v27, %v1716_v27  ;;  %v2203_v52 = vsel %vm1407_vm15, %v1716_v27, %v2069_v7  ;;  %v2204_v46 = vsel %vm1407_vm15, %v1717_v16, %v2073_v18  ;;  %v2011_v28 = vpop.permute.xlu1 %2010  ;;  %v1919_v50 = vrot.slane %v1912_v51, %v6634_v9 }
0x182c   :  { %v2207_v4 = vsel %vm154_vm0, %v2203_v52, %v2089_v13  ;;  %v2208_v14 = vsel %vm154_vm0, %v2204_v46, %v2093_v38  ;;  %v1950_v22 = vrot.slane %v1943_v31, %v6634_v9  ;;  %v2019_v8 = vsel %vm243_vm6, %v2011_v28, %v2016_v39 }
0x182d   :  { %v2205_v10 = vsel %vm1407_vm15, %v1718_v43, %v2077_v21  ;;  %v1920_v49 = vcombine.high %v1919_v50, %v1919_v50  ;;  %v1927_v35 = vrot.slane %v1919_v50, %v6634_v9  ;;  %v2211_v53 = vsel %vm1723_vm2, %v2207_v4, %v2109_v6 }
0x182e   :  { %v2209_v7 = vsel %vm154_vm0, %v2205_v10, %v2097_v25  ;;  %v2212_v21 = vsel %vm1723_vm2, %v2208_v14, %v2113_v60  ;;  %v2045_v13 = vrot.slane %v2019_v8, %v6634_v9  ;;  %v2169_v25 = vrot.slane %v1983_v48, %v6162_v61  ;;  %v2236_v8 = vld [vmem:[%s7699_s26] sm:$0x3] }
0x182f   :  { %v2213_v18 = vsel %vm1723_vm2, %v2209_v7, %v2117_v26  ;;  %v2009_v12 = vpop.permute.xlu1 %2008  ;;  %v1934_v38 = vrot.slane %v1920_v49, %v6634_v9  ;;  %v1935_v24 = vcombine.high %v1927_v35, %v1927_v35  ;;  %v2206_v62 = vsel %vm154_vm0, %v2202_v36, %v6684_v15 }
0x1830   :  { %v2218_v2 = vsel %vm2214_vm4, %v2213_v18, %v2137_v54  ;;  %v2018_v11 = vsel %vm243_vm6, %v2009_v12, %v2016_v39  ;;  %v2157_v33 = vrot.slane %v1950_v22, %v6162_v61  ;;  %v2046_v34 = vcombine.high %v2045_v13, %v2045_v13 }
0x1831   :  { %v1936_v41 = vcombine.high %v1934_v38, %v1934_v38  ;;  %v2149_v32 = vrot.slane %v1935_v24, %v6162_v61  ;;  %v2217_v6 = vsel %vm2214_vm4, %v2212_v21, %v2133_v63  ;;  %v2216_v29 = vsel %vm2214_vm4, %v2211_v53, %v2129_v56 }
0x1832   :  { %v2053_v58 = vrot.slane %v2045_v13, %v6634_v9  ;;  %v2022_v15 = vcombine.high %v2018_v11, %v2018_v11  ;;  %v2222_v54 = vsel %vm1771_vm1, %v2218_v2, %v2157_v33  ;;  %v2060_v3 = vrot.slane %v2046_v34, %v6634_v9 }
0x1833   :  { %v2153_v20 = vrot.slane %v1936_v41, %v6162_v61  ;;  %v2220_v40 = vsel %vm1771_vm1, %v2216_v29, %v2149_v32  ;;  %v2210_v56 = vsel %vm1723_vm2, %v2206_v62, %v2105_v5  ;;  %v2145_v30 = vrot.slane %v1934_v38, %v6162_v61  ;;  %v2233_v38 = vld [vmem:[%s7700_s4] sm:$0x3] }
0x1834   :  { %v2061_v17 = vcombine.high %v2053_v58, %v2053_v58  ;;  %v2189_v23 = vrot.slane %v2053_v58, %v6162_v61  ;;  %v2225_v63 = vsel %vm2223_vm5, %v2220_v40, %v2169_v25  ;;  %v2029_v1 = vrot.slane %v2022_v15, %v6634_v9 }
0x1835   :  { %v2193_v27 = vrot.slane %v2060_v3, %v6162_v61  ;;  %v2221_v16 = vsel %vm1771_vm1, %v2217_v6, %v2153_v20  ;;  %v1982_v43 = vcombine.high %v6716_v47, %v6716_v47  ;;  %v2227_v52 = vsel %vm2223_vm5, %v2222_v54, %v2177_v37 }
0x1836   :  { %v2197_v51 = vrot.slane %v2061_v17, %v6162_v61  ;;  %v6765_v60 = vsel %vm2228_vm8, %v2225_v63, %v2189_v23  ;;  %v2030_v31 = vcombine.high %v2029_v1, %v2029_v1  ;;  %v2226_v44 = vsel %vm2223_vm5, %v2221_v16, %v2173_v45 }
0x1837   :  { %v6772_v5 = vsel %vm2228_vm8, %v2226_v44, %v2193_v27  ;;  %v2240_v46 = vpack.c.bf16 %v6765_v60, %v6765_v60  ;;  %v2215_v47 = vsel %vm2214_vm4, %v2210_v56, %v2125_v55  ;;  %v2165_v14 = vrot.slane %v1982_v43, %v6162_v61 }
0x1838   :  { %v2037_v28 = vrot.slane %v2030_v31, %v6634_v9  ;;  %v6778_v26 = vsel %vm2228_vm8, %v2227_v52, %v2197_v51  ;;  %v2241_v4 = vpack.c.bf16 %v6772_v5, %v6772_v5  ;;  %v2219_v48 = vsel %vm1771_vm1, %v2215_v47, %v2145_v30 }
0x1839   :  { %v2242_v45 = vpack.c.bf16 %v6778_v26, %v6778_v26  ;;  %v6789_v50 = vsel %vm2214_vm4, %v2240_v46, 0  ;;  %v2224_v55 = vsel %vm2223_vm5, %v2219_v48, %v2165_v14  ;;  %v2323_v37 = vsel %vm494_vm14, %v2240_v46, 0 }
0x183a   :  { %v2038_v36 = vcombine.high %v2037_v28, %v2037_v28  ;;  %v2280_v10 = vsel %vm494_vm14, %v2241_v4, 0  ;;  %v2531_v53 = vsel %vm2214_vm4, %v2241_v4, 0  ;;  %vm2234_vm1 = vcmp.eq.s32.totalorder %v2233_v38, 0 }
0x183b   :  { %v2326_v39 = vsel %vm494_vm14, %v2242_v45, 0  ;;  %5153 = vmatpush3.bf16.xpose.msra.mxu1 %v2280_v10  ;;  %v2576_v18 = vsel %vm2214_vm4, %v2242_v45, 0  ;;  %v2235_v13 = vsel %vm2234_vm1, -1e+09, %v5849_v19  ;;  %vm7701_vm5 = vcmask 1044484  }
0x183c   :  { %v2185_v42 = vrot.slane %v2038_v36, %v6162_v61  ;;  %5159 = vmatpush3.bf16.xpose.msra.mxu0 %v2326_v39  ;;  %5164 = vmatprep.subr.bf16.mxu1 %v5849_v19  ;;  %v2398_v2 = vrot.slane %v2235_v13, %v6634_v9  ;;  %vm7703_vm1 = vmmov %vm7701_vm5 }
0x183d   :  { %5170 = vmatprep.subr.bf16.mxu0 %v5849_v19 }
0x183e   :  { %v6800_v7 = vsel %vm2228_vm8, %v2224_v55, %v2185_v42  ;;  %vm2237_vm8 = vcmp.eq.s32.totalorder %v2236_v8, 0  ;;  %v2399_v32 = vcombine.high %v2398_v2, %v2398_v2  ;;  %v2406_v58 = vrot.slane %v2398_v2, %v6634_v9 }
0x183f   :  { %v2239_v49 = vpack.c.bf16 %v6800_v7, %v6800_v7  ;;  %v2238_v12 = vsel %vm2237_vm8, -1e+09, %v5849_v19  ;;  %vm7702_vm8 = vmmov %vm7701_vm5 }
0x1840   :  { %v2250_v21 = vrot.slane %v2238_v12, %v6634_v9  ;;  %v2413_v23 = vrot.slane %v2399_v32, %v6634_v9  ;;  %v2417_v56 = vrot.slane %v2406_v58, %v6162_v61 }
0x1841   :  { %v6805_v35 = vsel %vm2214_vm4, %v2239_v49, 0  ;;  %v2277_v22 = vsel %vm494_vm14, %v2239_v49, 0  ;;  %vm2368_vm4 = vcmask 64512  }
0x1842   :  { %5155 = vmatmul.mubr.msk.bf16.vlgmr.msra.gmra.mrb[24].mxu1 %vm494_vm14, %v2239_v49  ;;  %v2251_v24 = vcombine.high %v2250_v21, %v2250_v21  ;;  %v2258_v25 = vrot.slane %v2250_v21, %v6634_v9  ;;  %v2421_v30 = vrot.slane %v2413_v23, %v6162_v61  ;;  %v5322_v23 = vld [vmem:[%s7662_s9 + $0x14] ss:$8 sps:$4 sm:$0xff]  }
0x1843   :  { %5161 = vmatmul.mubr.msk.bf16.vlgmr.msra.gmra.mrb[20].mxu0 %vm494_vm14, %v2240_v46  ;;  %5165 = vmatpush3.bf16.xpose.msra.mxu1 %v2277_v22 }
0x1844   :  { %5171 = vmatpush3.bf16.xpose.msra.mxu0 %v2323_v37  ;;  %5172 = vmatprep.mubr.msk.bf16.mxu0 %vm5852_vm3, %v5849_v19  ;;  %v2265_v62 = vrot.slane %v2251_v24, %v6634_v9  ;;  %v2269_v11 = vrot.slane %v2258_v25, %v6162_v61 }
0x1845   :  { %5182 = vmatprep.subr.bf16.mxu0 %v5849_v19  ;;  %5166 = vmatprep.mubr.msk.bf16.mxu1 %vm5852_vm3, %v5849_v19 }
0x1846   :  { %5176 = vmatprep.subr.bf16.mxu1 %v5849_v19  ;;  %v2273_v41 = vrot.slane %v2265_v62, %v6162_v61 }
0x184a   :  { %5167 = vmatmul.mubr.msk.bf16.vlgmr.msra.gmra.mrb[28].mxu1 %vm494_vm14, %v2241_v4 }
0x184b   :  { %5173 = vmatmul.mubr.msk.bf16.vlgmr.msra.gmra.mrb[24].mxu0 %vm494_vm14, %v2242_v45  ;;  %5177 = vmatpush3.bf16.msra.mxu1 %v2531_v53 }
0x184c   :  { %5183 = vmatpush3.bf16.msra.mxu0 %v2576_v18  ;;  %5184 = vmatprep.mubr.msk.bf16.mxu0 %vm5852_vm3, %v5849_v19 }
0x184d   :  { %5194 = vmatprep.subr.bf16.mxu0 %v5849_v19  ;;  %5178 = vmatprep.mubr.msk.bf16.mxu1 %vm5852_vm3, %v5849_v19 }
0x184e   :  { %5188 = vmatprep.subr.bf16.mxu1 %v5849_v19 }
0x1915   :  { %v2316_v33 = vpop.f32.mrb[24].mxu1 }
0x1916   :  { %v2362_v34 = vpop.f32.mrb[20].mxu0  ;;  %v2317_v6 = vadd.f32 %v2316_v33, %v2269_v11  ;;  %v5156_v29 = vpop.f32.mrb[25].mxu1 }
0x1917   :  { %v2363_v15 = vadd.f32 %v2362_v34, %v2273_v41  ;;  %v5162_v20 = vpop.f32.mrb[21].mxu0  ;;  %v2319_v40 = vpop.f32.mrb[26].mxu1 }
0x1918   :  { %v2365_v54 = vpop.f32.mrb[22].mxu0  ;;  %v5157_v3 = vpop.f32.mrb[27].mxu1  ;;  %v2369_v17 = vsel %vm2368_vm4, %v2317_v6, -inf }
0x1919   :  { %v5163_v63 = vpop.f32.mrb[23].mxu0  ;;  %v2372_v1 = vsel %vm2368_vm4, %v2363_v15, -inf  ;;  %2370 = vmax.xlane.f32.xlu0 %v2369_v17 }
0x191a   :  { %2373 = vmax.xlane.f32.xlu1 %v2372_v1  ;;  %v5320_v63 = vld [vmem:[%s7662_s9 + $0x10] ss:$8 sps:$4 sm:$0xff]   ;;  %v5325_v1 = vld [vmem:[%s7662_s9 + $0x24] ss:$8 sps:$4 sm:$0xff]  }
0x191d   :  { %v2458_v27 = vpop.f32.mrb[28].mxu1 }
0x191e   :  { %v2498_v16 = vpop.f32.mrb[24].mxu0  ;;  %v2459_v51 = vadd.f32 %v2458_v27, %v2417_v56  ;;  %v5168_v31 = vpop.f32.mrb[29].mxu1  ;;  %v5323_v56 = vld [vmem:[%s7662_s9 + $0x20] ss:$8 sps:$4 sm:$0xff]   ;;  %v5326_v27 = vld [vmem:[%s7662_s9 + $0x30] ss:$8 sps:$4 sm:$0xff]  }
0x191f   :  { %v5174_v44 = vpop.f32.mrb[25].mxu0  ;;  %v2461_v43 = vpop.f32.mrb[30].mxu1  ;;  %v2499_v52 = vadd.f32 %v2498_v16, %v2421_v30  ;;  %v5328_v30 = vld [vmem:[%s7662_s9 + $0x34] ss:$8 sps:$4 sm:$0xff]   ;;  %v5331_v16 = vld [vmem:[%s7662_s9 + $0x44] ss:$8 sps:$4 sm:$0xff]  }
0x1920   :  { %v2501_v46 = vpop.f32.mrb[26].mxu0  ;;  %v5169_v28 = vpop.f32.mrb[31].mxu1  ;;  %v2504_v9 = vsel %vm2368_vm4, %v2459_v51, -inf  ;;  %v5334_v31 = vld [vmem:[%s7662_s9 + $0x54] ss:$8 sps:$4 sm:$0xff]  }
0x1921   :  { %v5175_v4 = vpop.f32.mrb[27].mxu0  ;;  %2505 = vmax.xlane.f32.xlu0 %v2504_v9  ;;  %v2507_v47 = vsel %vm2368_vm4, %v2499_v52, -inf  ;;  %v5332_v44 = vld [vmem:[%s7662_s9 + $0x50] ss:$8 sps:$4 sm:$0xff]   ;;  %v5337_v43 = vld [vmem:[%s7662_s9 + $0x64] ss:$8 sps:$4 sm:$0xff]  }
0x1922   :  { %v5340_v46 = vld [vmem:[%s7662_s9 + $0x74] ss:$8 sps:$4 sm:$0xff]   ;;  %v5338_v28 = vld [vmem:[%s7662_s9 + $0x70] ss:$8 sps:$4 sm:$0xff]   ;;  %v5343_v9 = vld [vmem:[%s7662_s9 + $0x84] ss:$8 sps:$4 sm:$0xff]  }
0x1923   :  { %v5341_v4 = vld [vmem:[%s7662_s9 + $0x80] ss:$8 sps:$4 sm:$0xff]  }
0x1925   :  { %2508 = vmax.xlane.f32.xlu0 %v2507_v47  ;;  %v5346_v47 = vld [vmem:[%s7662_s9 + $0x94] ss:$8 sps:$4 sm:$0xff]  }
0x19a6   :  { %v2371_v45 = vpop.xlane.xlu0 %2370 }
0x19a7   :  { %v2374_v48 = vpop.xlane.xlu1 %2373  ;;  %v2375_v36 = vsub.f32 %v2317_v6, %v2371_v45  ;;  %v5344_v45 = vld [vmem:[%s7662_s9 + $0x90] ss:$8 sps:$4 sm:$0xff]  }
0x19a8   :  { %v2376_v10 = vsub.f32 %v2363_v15, %v2374_v48  ;;  %v5349_v48 = vld [vmem:[%s7662_s9 + $0xa4] ss:$8 sps:$4 sm:$0xff]  }
0x19a9   :  { %v2377_v14 = vmul.f32 1.442695, %v2375_v36  ;;  %v5347_v36 = vld [vmem:[%s7662_s9 + $0xa0] ss:$8 sps:$4 sm:$0xff]  }
0x19aa   :  { %v2379_v39 = vmul.f32 1.442695, %v2376_v10  ;;  %v5352_v10 = vld [vmem:[%s7662_s9 + $0xb4] ss:$8 sps:$4 sm:$0xff]  }
0x19ab   :  { %5581 = vpow2.f32 %v2377_v14  ;;  %v5350_v14 = vld [vmem:[%s7662_s9 + $0xb0] ss:$8 sps:$4 sm:$0xff]  }
0x19ac   :  { %5583 = vpow2.f32 %v2379_v39  ;;  %v5355_v39 = vld [vmem:[%s7662_s9 + $0xc4] ss:$8 sps:$4 sm:$0xff]  }
0x19ae   :  { %v2506_v42 = vpop.xlane.xlu0 %2505 }
0x19af   :  { %v2510_v55 = vsub.f32 %v2459_v51, %v2506_v42  ;;  %v5329_v51 = vld [vmem:[%s7662_s9 + $0x40] ss:$8 sps:$4 sm:$0xff]  }
0x19b0   :  { %v5353_v42 = vld [vmem:[%s7662_s9 + $0xc0] ss:$8 sps:$4 sm:$0xff]  }
0x19b1   :  { %v2512_v49 = vmul.f32 1.442695, %v2510_v55  ;;  %v5358_v55 = vld [vmem:[%s7662_s9 + $0xd4] ss:$8 sps:$4 sm:$0xff]  }
0x19b2   :  { %v2509_v22 = vpop.xlane.xlu0 %2508 }
0x19b3   :  { %5585 = vpow2.f32 %v2512_v49  ;;  %v2511_v37 = vsub.f32 %v2499_v52, %v2509_v22  ;;  %v5335_v52 = vld [vmem:[%s7662_s9 + $0x60] ss:$8 sps:$4 sm:$0xff]   ;;  %v5356_v49 = vld [vmem:[%s7662_s9 + $0xd0] ss:$8 sps:$4 sm:$0xff]   ;;  %v5361_v22 = vld [vmem:[%s7662_s9 + $0xe4] ss:$8 sps:$4 sm:$0xff]  }
0x19b5   :  { %v5582_v53 = vpop.eup %5581  ;;  %v2514_v18 = vmul.f32 1.442695, %v2511_v37  ;;  %v5359_v37 = vld [vmem:[%s7662_s9 + $0xe0] ss:$8 sps:$4 sm:$0xff]  }
0x19b6   :  { %v5584_v8 = vpop.eup %5583  ;;  %v2381_v12 = vsel %vm2368_vm4, %v5582_v53, 0.0 }
0x19b7   :  { %5587 = vpow2.f32 %v2514_v18  ;;  %v2384_v21 = vsel %vm2368_vm4, %v5584_v8, 0.0  ;;  %2382 = vadd.xlane.f32.xlu1 %v2381_v12  ;;  %v5362_v18 = vld [vmem:[%s7662_s9 + $0xf0] ss:$8 sps:$4 sm:$0xff]   ;;  %v6968_v12 = vld [vmem:[%s7663_s10] ss:$8 sps:$4 sm:$0xff]  }
0x19b8   :  { %2385 = vadd.xlane.f32.xlu0 %v2384_v21 }
0x19bd   :  { %v5586_v38 = vpop.eup %5585 }
0x19be   :  { %v2516_v24 = vsel %vm2368_vm4, %v5586_v38, 0.0 }
0x19bf   :  { %2517 = vadd.xlane.f32.xlu1 %v2516_v24 }
0x19c1   :  { %v5588_v13 = vpop.eup %5587 }
0x19c2   :  { %v2519_v25 = vsel %vm2368_vm4, %v5588_v13, 0.0 }
0x19c3   :  { %2520 = vadd.xlane.f32.xlu0 %v2519_v25 }
0x1a44   :  { %v2383_v62 = vpop.xlane.xlu1 %2382 }
0x1a45   :  { %v2386_v2 = vpop.xlane.xlu0 %2385  ;;  %5589 = vrcp.f32 %v2383_v62 }
0x1a46   :  { %5591 = vrcp.f32 %v2386_v2 }
0x1a4c   :  { %v2518_v11 = vpop.xlane.xlu1 %2517 }
0x1a4d   :  { %5593 = vrcp.f32 %v2518_v11 }
0x1a4f   :  { %v5590_v41 = vpop.eup %5589 }
0x1a50   :  { %v5592_v32 = vpop.eup %5591  ;;  %v2389_v33 = vmul.f32 %v5590_v41, %v5582_v53  ;;  %v2521_v34 = vpop.xlane.xlu0 %2520  ;;  %v5364_v53 = vld [vmem:[%s7662_s9 + $0xf4] ss:$8 sps:$4 sm:$0xff]  }
0x1a51   :  { %v2390_v6 = vmul.f32 %v5592_v32, %v5584_v8  ;;  %5595 = vrcp.f32 %v2521_v34  ;;  %v6963_v8 = vld [vmem:[%s7663_s10 + $0x4] ss:$8 sps:$4 sm:$0xff]  }
0x1a52   :  { %v2526_v29 = vpack.c.bf16 %v2389_v33, %v2389_v33 }
0x1a53   :  { %v2527_v58 = vpack.c.bf16 %v2390_v6, %v2390_v6  ;;  %v6987_v6 = vld [vmem:[%s7663_s10 + $0x14] ss:$8 sps:$4 sm:$0xff]  }
0x1a54   :  { %5179 = vmatmul.mubr.msk.bf16.vlgmr.msra.gmra.mrb[32].mxu1 %vm2368_vm4, %v2526_v29  ;;  %v6992_v29 = vld [vmem:[%s7663_s10 + $0x10] ss:$8 sps:$4 sm:$0xff]  }
0x1a55   :  { %5185 = vmatmul.mubr.msk.bf16.vlgmr.msra.gmra.mrb[28].mxu0 %vm2368_vm4, %v2527_v58  ;;  %5189 = vmatpush3.bf16.msra.mxu1 %v6805_v35  ;;  %v5319_v35 = vld [vmem:[%s7662_s9 + $0x4] ss:$8 sps:$4 sm:$0xff]  }
0x1a56   :  { %5195 = vmatpush3.bf16.msra.mxu0 %v6789_v50  ;;  %5190 = vmatprep.mubr.msk.bf16.mxu1 %vm5852_vm3, %v5849_v19  ;;  %v5317_v50 = vld [vmem:[%s7662_s9] ss:$8 sps:$4 sm:$0xff]  }
0x1a57   :  { %v5594_v15 = vpop.eup %5593  ;;  %5196 = vmatprep.mubr.msk.bf16.mxu0 %vm5852_vm3, %v5849_v19  ;;  %2966 = vmatprep.subr.bf16.mxu1 %v5319_v35 }
0x1a58   :  { %v2524_v20 = vmul.f32 %v5594_v15, %v5586_v38  ;;  %3090 = vmatprep.subr.bf16.mxu0 %v6963_v8 }
0x1a5a   :  { %v2618_v40 = vpack.c.bf16 %v2524_v20, %v2524_v20  ;;  %v7000_v20 = vld [vmem:[%s7663_s10 + $0x24] ss:$8 sps:$4 sm:$0xff]  }
0x1a5b   :  { %v5596_v54 = vpop.eup %5595 }
0x1a5c   :  { %v2525_v3 = vmul.f32 %v5596_v54, %v5588_v13  ;;  %5191 = vmatmul.mubr.msk.bf16.vlgmr.msra.gmra.mrb[36].mxu1 %vm2368_vm4, %v2618_v40  ;;  %v7005_v40 = vld [vmem:[%s7663_s10 + $0x20] ss:$8 sps:$4 sm:$0xff]  }
0x1a5d   :  { %2967 = vmatpush1.bf16.msra.mxu1 %v5317_v50 }
0x1a5e   :  { %v2619_v17 = vpack.c.bf16 %v2525_v3, %v2525_v3  ;;  %2968 = vmatprep.subr.bf16.mxu1 %v5322_v23 }
0x1a60   :  { %5197 = vmatmul.mubr.msk.bf16.vlgmr.msra.gmra.mrb[32].mxu0 %vm2368_vm4, %v2619_v17  ;;  %vm7704_vm4 = vmmov %vm7703_vm1 }
0x1a61   :  { %3122 = vmatprep.mubr.bf16.mxu0 %v5848_v0  ;;  %2969 = vmatpush1.bf16.msra.mxu1 %v5320_v63 }
0x1a62   :  { %2970 = vmatprep.subr.bf16.mxu1 %v5325_v1  ;;  %3091 = vmatpush1.bf16.msra.mxu0 %v6968_v12  ;;  %v7014_v1 = vld [vmem:[%s7663_s10 + $0x34] ss:$8 sps:$4 sm:$0xff]  }
0x1a63   :  { %3092 = vmatprep.subr.bf16.mxu0 %v6987_v6 }
0x1a65   :  { %2971 = vmatpush1.bf16.msra.mxu1 %v5323_v56  ;;  %v7019_v56 = vld [vmem:[%s7663_s10 + $0x30] ss:$8 sps:$4 sm:$0xff]  }
0x1a66   :  { %2972 = vmatprep.subr.bf16.mxu1 %v5328_v30  ;;  %3093 = vmatpush1.bf16.msra.mxu0 %v6992_v29 }
0x1a67   :  { %3094 = vmatprep.subr.bf16.mxu0 %v7000_v20 }
0x1a69   :  { %2973 = vmatpush1.bf16.msra.mxu1 %v5326_v27 }
0x1a6a   :  { %2974 = vmatprep.subr.bf16.mxu1 %v5331_v16  ;;  %3095 = vmatpush1.bf16.msra.mxu0 %v7005_v40 }
0x1a6b   :  { %3096 = vmatprep.subr.bf16.mxu0 %v7014_v1 }
0x1a6d   :  { %2975 = vmatpush1.bf16.msra.mxu1 %v5329_v51 }
0x1a6e   :  { %2976 = vmatprep.subr.bf16.mxu1 %v5334_v31  ;;  %3097 = vmatpush1.bf16.msra.mxu0 %v7019_v56 }
0x1a6f   :  { %3206 = vmatprep.subr.bf16.mxu0 %v6963_v8 }
0x1a71   :  { %2977 = vmatpush1.bf16.msra.mxu1 %v5332_v44  ;;  %3123 = vmatmul.mubr.bf16.vlgmr.msra.gmra.mrb[36].mxu0 %v5850_v57 }
0x1a72   :  { %2978 = vmatprep.subr.bf16.mxu1 %v5337_v43  ;;  %3207 = vmatpush1.bf16.msra.mxu0 %v6968_v12 }
0x1a73   :  { %3238 = vmatprep.mubr.bf16.mxu0 %v5848_v0  ;;  %3208 = vmatprep.subr.bf16.mxu0 %v6987_v6 }
0x1a75   :  { %2979 = vmatpush1.bf16.msra.mxu1 %v5335_v52 }
0x1a76   :  { %2980 = vmatprep.subr.bf16.mxu1 %v5340_v46  ;;  %3209 = vmatpush1.bf16.msra.mxu0 %v6992_v29 }
0x1a77   :  { %3210 = vmatprep.subr.bf16.mxu0 %v7000_v20 }
0x1a79   :  { %2981 = vmatpush1.bf16.msra.mxu1 %v5338_v28 }
0x1a7a   :  { %2982 = vmatprep.subr.bf16.mxu1 %v5343_v9  ;;  %3211 = vmatpush1.bf16.msra.mxu0 %v7005_v40 }
0x1a7b   :  { %3212 = vmatprep.subr.bf16.mxu0 %v7014_v1 }
0x1a7d   :  { %2983 = vmatpush1.bf16.msra.mxu1 %v5341_v4 }
0x1a7e   :  { %2984 = vmatprep.subr.bf16.mxu1 %v5346_v47  ;;  %3213 = vmatpush1.bf16.msra.mxu0 %v7019_v56 }
0x1a7f   :  { %3340 = vmatprep.subr.bf16.mxu0 %v6963_v8 }
0x1a81   :  { %2985 = vmatpush1.bf16.msra.mxu1 %v5344_v45 }
0x1a82   :  { %2986 = vmatprep.subr.bf16.mxu1 %v5349_v48 }
0x1a85   :  { %2987 = vmatpush1.bf16.msra.mxu1 %v5347_v36 }
0x1a86   :  { %2988 = vmatprep.subr.bf16.mxu1 %v5352_v10 }
0x1a89   :  { %2989 = vmatpush1.bf16.msra.mxu1 %v5350_v14 }
0x1a8a   :  { %2990 = vmatprep.subr.bf16.mxu1 %v5355_v39 }
0x1a8d   :  { %2991 = vmatpush1.bf16.msra.mxu1 %v5353_v42 }
0x1a8e   :  { %2992 = vmatprep.subr.bf16.mxu1 %v5358_v55 }
0x1a91   :  { %2993 = vmatpush1.bf16.msra.mxu1 %v5356_v49 }
0x1a92   :  { %2994 = vmatprep.subr.bf16.mxu1 %v5361_v22 }
0x1a95   :  { %2995 = vmatpush1.bf16.msra.mxu1 %v5359_v37 }
0x1a96   :  { %2996 = vmatprep.subr.bf16.mxu1 %v5364_v53 }
0x1a99   :  { %2997 = vmatpush1.bf16.msra.mxu1 %v5362_v18 }
0x1a9a   :  { %3601 = vmatprep.subr.bf16.mxu1 %v6963_v8 }
0x1b27   :  { %v6970_v21 = vpop.f32.mrb[32].mxu1 }
0x1b28   :  { %v6972_v38 = vpop.f32.mrb[28].mxu0  ;;  %v2714_v24 = vmul.f32 %v6970_v21, %v6800_v7  ;;  %v5180_v13 = vpop.f32.mrb[33].mxu1  ;;  %v2710_v52 = vsub.f32 %v6800_v7, %v6970_v21 }
0x1b29   :  { %v2715_v25 = vmul.f32 %v6972_v38, %v6765_v60  ;;  %v5186_v62 = vpop.f32.mrb[29].mxu0  ;;  %v5264_v2 = vpack.i.bf16 %v6972_v38, %v6970_v21  ;;  %v2570_v11 = vpop.f32.mrb[34].mxu1  ;;  %v2711_v43 = vsub.f32 %v6765_v60, %v6972_v38 }
0x1b2a   :  { %v2615_v41 = vpop.f32.mrb[30].mxu0  ;;  %v5181_v32 = vpop.f32.mrb[35].mxu1 }
0x1b2b   :  { %v5187_v33 = vpop.f32.mrb[31].mxu0  ;;  %5265 = vrot.lane.b32.xlu0 %v5264_v2, %s5845_s3  ;;  %v5259_v34 = vpack.i.bf16 %v2715_v25, %v2714_v24  ;;  %v2794_v2 = vld [vmem:[%s7664_s11] sm:$0x3]  ;;  %s5854_s11 = smov 96  }
0x1b2d   :  { %5260 = vrot.lane.b32.xlu1 %v5259_v34, %s5845_s3 }
0x1b2f   :  { %v2659_v58 = vpop.f32.mrb[36].mxu1 }
0x1b30   :  { %v5192_v15 = vpop.f32.mrb[37].mxu1  ;;  %v2716_v50 = vmul.f32 %v2659_v58, %v6772_v5  ;;  %v2712_v14 = vsub.f32 %v6772_v5, %v2659_v58 }
0x1b31   :  { %v2662_v54 = vpop.f32.mrb[38].mxu1 }
0x1b32   :  { %v5193_v3 = vpop.f32.mrb[39].mxu1 }
0x1b33   :  { %v2704_v17 = vpop.f32.mrb[32].mxu0 }
0x1b34   :  { %v5274_v35 = vpack.i.bf16 %v2704_v17, %v2659_v58  ;;  %v2717_v23 = vmul.f32 %v2704_v17, %v6778_v26  ;;  %v5198_v63 = vpop.f32.mrb[33].mxu0  ;;  %v2799_v58 = vrot.slane %v2794_v2, %v6162_v61 }
0x1b35   :  { %v2707_v30 = vpop.f32.mrb[34].mxu0 }
0x1b36   :  { %v5199_v27 = vpop.f32.mrb[35].mxu0  ;;  %v5269_v16 = vpack.i.bf16 %v2717_v23, %v2716_v50 }
0x1b38   :  { %5270 = vrot.lane.b32.xlu1 %v5269_v16, %s5845_s3 }
0x1b3c   :  { %5275 = vrot.lane.b32.xlu1 %v5274_v35, %s5845_s3 }
0x1b44   :  { %v3124_v24 = vpop.f32.mrb[36].mxu0 }
0x1b45   :  { %v3126_v13 = vpop.f32.mrb[37].mxu0 }
0x1b46   :  { %v3128_v25 = vpop.f32.mrb[38].mxu0 }
0x1b47   :  { %v3129_v62 = vpop.f32.mrb[39].mxu0 }
0x1b9d   :  { %v5266_v57 = vpop.permute.xlu0 %5265 }
0x1b9e   :  { %v5268_v51 = vunpack.i.h.bf16 %v5266_v57  ;;  %v5267_v31 = vunpack.i.l.bf16 %v5266_v57 }
0x1b9f   :  { %v5261_v44 = vpop.permute.xlu1 %5260 }
0x1ba0   :  { %v5263_v46 = vunpack.i.h.bf16 %v5261_v44  ;;  %v5262_v28 = vunpack.i.l.bf16 %v5261_v44  ;;  %v2751_v9 = vsel %vm494_vm14, %v6765_v60, %v5268_v51  ;;  %v2750_v4 = vsel %vm494_vm14, %v6800_v7, %v5267_v31 }
0x1ba1   :  { %v2758_v36 = vpack.c.bf16 %v2751_v9, %v2750_v4  ;;  %v2713_v60 = vsub.f32 %v6778_v26, %v2704_v17 }
0x1ba2   :  { %v2754_v47 = vsel %vm494_vm14, %v2710_v52, %v5262_v28  ;;  %v2755_v45 = vsel %vm494_vm14, %v2711_v43, %v5263_v46 }
0x1ba3   :  { %v2759_v48 = vpack.c.bf16 %v2755_v45, %v2754_v47 }
0x1ba5   :  { %2998 = vmatprep.mubr.bf16.mxu1 %v2759_v48 }
0x1ba6   :  { %2999 = vmatmul.mubr.bf16.vlgmr.msra.gmra.mrb[40].mxu1 %v2758_v36 }
0x1ba7   :  { %3602 = vmatpush1.bf16.msra.mxu1 %v6968_v12 }
0x1ba8   :  { %3603 = vmatprep.subr.bf16.mxu1 %v6987_v6 }
0x1baa   :  { %v5271_v10 = vpop.permute.xlu1 %5270 }
0x1bab   :  { %v5273_v39 = vunpack.i.h.bf16 %v5271_v10  ;;  %v5272_v42 = vunpack.i.l.bf16 %v5271_v10  ;;  %3604 = vmatpush1.bf16.msra.mxu1 %v6992_v29 }
0x1bac   :  { %3605 = vmatprep.subr.bf16.mxu1 %v7000_v20 }
0x1bad   :  { %v2756_v7 = vsel %vm494_vm14, %v2712_v14, %v5272_v42  ;;  %v2757_v55 = vsel %vm494_vm14, %v2713_v60, %v5273_v39 }
0x1bae   :  { %v5276_v49 = vpop.permute.xlu1 %5275  ;;  %v2761_v22 = vpack.c.bf16 %v2757_v55, %v2756_v7 }
0x1baf   :  { %v5278_v37 = vunpack.i.h.bf16 %v5276_v49  ;;  %v5277_v53 = vunpack.i.l.bf16 %v5276_v49  ;;  %3606 = vmatpush1.bf16.msra.mxu1 %v7005_v40 }
0x1bb0   :  { %3008 = vmatprep.mubr.bf16.mxu1 %v2761_v22  ;;  %3607 = vmatprep.subr.bf16.mxu1 %v7014_v1 }
0x1bb1   :  { %v2752_v18 = vsel %vm494_vm14, %v6772_v5, %v5277_v53  ;;  %v2753_v21 = vsel %vm494_vm14, %v6778_v26, %v5278_v37  ;;  %v2803_v5 = vrot.slane %v2794_v2, %v6156_v59 }
0x1bb2   :  { %v2760_v38 = vpack.c.bf16 %v2753_v21, %v2752_v18 }
0x1bb3   :  { %3608 = vmatpush1.bf16.msra.mxu1 %v7019_v56 }
0x1bb4   :  { %3009 = vmatmul.mubr.bf16.gmra.mrb[44].mxu1 %v2760_v38  ;;  %3918 = vmatprep.subr.bf16.mxu1 %v6963_v8 }
0x1bb5   :  { %3633 = vmatprep.mubr.bf16.mxu1 %v5848_v0 }
0x1c79   :  { %v3000_v11 = vpop.f32.mrb[40].mxu1 }
0x1c7a   :  { %v3002_v26 = vpop.f32.mrb[41].mxu1  ;;  %v7088_v44 = vadd.f32 %v3000_v11, %v2799_v58 }
0x1c7b   :  { %v3004_v41 = vpop.f32.mrb[42].mxu1  ;;  %v7067_v32 = vadd.f32 %v3002_v26, %v2803_v5 }
0x1c7c   :  { %v3006_v33 = vpop.f32.mrb[43].mxu1  ;;  %v3005_v35 = vadd.f32 %v3004_v41, %v2799_v58 }
0x1c7d   :  { %v7069_v34 = vadd.f32 %v3006_v33, %v2803_v5  ;;  %v3042_v15 = vrot.slane %v7067_v32, 7  ;;  %v3185_v54 = vrot.slane %v7067_v32, 5  ;;  %v3313_v50 = vrot.slane %v7067_v32, 3 }
0x1c7e   :  { %v7086_v31 = vrot.slane %v3005_v35, 7  ;;  %v3447_v28 = vrot.slane %v7067_v32, 1 }
0x1c7f   :  { %v3043_v3 = vrot.slane %v7069_v34, 6  ;;  %v3186_v17 = vrot.slane %v7069_v34, 4  ;;  %v3314_v23 = vrot.slane %v7069_v34, 2 }
0x1c80   :  { %v3032_v47 = vsel %vm432_vm7, %v7086_v31, %v7088_v44  ;;  %v3181_v10 = vsel %vm435_vm9, %v7086_v31, %v7088_v44  ;;  %v3309_v14 = vsel %vm438_vm10, %v7086_v31, %v7088_v44  ;;  %v3443_v62 = vsel %vm7702_vm8, %v7086_v31, %v7088_v44 }
0x1c81   :  { %v3044_v63 = vsel %vm432_vm7, %v3043_v3, %v3042_v15  ;;  %v3187_v30 = vsel %vm435_vm9, %v3186_v17, %v3185_v54  ;;  %v3576_v27 = vsel %vm720_vm11, %v3043_v3, %v3042_v15  ;;  %v3315_v16 = vsel %vm438_vm10, %v3314_v23, %v3313_v50 }
0x1c82   :  { %v3708_v57 = vsel %vm855_vm12, %v3186_v17, %v3185_v54  ;;  %v7084_v51 = vsel %vm985_vm13, %v3314_v23, %v3313_v50  ;;  %v3448_v26 = vsel %vm7704_vm4, %v7069_v34, %v3447_v28  ;;  %v3572_v54 = vsel %vm720_vm11, %v7086_v31, %v7088_v44 }
0x1c83   :  { %v3704_v35 = vsel %vm855_vm12, %v7086_v31, %v7088_v44 }
0x1c87   :  { %v3010_v43 = vpop.f32.mrb[44].mxu1 }
0x1c88   :  { %v3011_v52 = vadd.f32 %v3010_v43, %v2799_v58  ;;  %v3012_v46 = vpop.f32.mrb[45].mxu1 }
0x1c89   :  { %v3013_v9 = vadd.f32 %v3012_v46, %v2803_v5  ;;  %v3014_v4 = vpop.f32.mrb[46].mxu1 }
0x1c8a   :  { %v7094_v45 = vrot.slane %v3011_v52, 6  ;;  %v3015_v48 = vadd.f32 %v3014_v4, %v2799_v58  ;;  %v3016_v36 = vpop.f32.mrb[47].mxu1 }
0x1c8b   :  { %v3188_v60 = vrot.slane %v3013_v9, 3  ;;  %v3316_v39 = vrot.slane %v3013_v9, 1  ;;  %v3449_v42 = vrot.slane %v3013_v9, 7  ;;  %v7102_v7 = vadd.f32 %v3016_v36, %v2803_v5 }
0x1c8c   :  { %v7104_v55 = vrot.slane %v3015_v48, 5  ;;  %v3034_v49 = vsel %vm435_vm9, %v7094_v45, %v3032_v47  ;;  %v3045_v22 = vrot.slane %v3013_v9, 5  ;;  %v7110_v37 = vsel %vm438_vm10, %v7094_v45, %v3181_v10 }
0x1c8d   :  { %v3047_v53 = vrot.slane %v7102_v7, 4  ;;  %v7114_v18 = vsel %vm438_vm10, %v3188_v60, %v3187_v30  ;;  %v7118_v21 = vsel %vm7701_vm5, %v7094_v45, %v3309_v14  ;;  %v3317_v11 = vsel %vm7703_vm1, %v3316_v39, %v3315_v16  ;;  %vm7706_vm5 = vmmov %vm7703_vm1 }
0x1c8e   :  { %v3036_v38 = vsel %vm438_vm10, %v7104_v55, %v3034_v49  ;;  %v3046_v25 = vsel %vm435_vm9, %v3045_v22, %v3044_v63  ;;  %v7134_v33 = vsel %vm720_vm11, %v7102_v7, %v3317_v11  ;;  %v7138_v58 = vsel %vm720_vm11, %v7094_v45, %v3443_v62 }
0x1c8f   :  { %v3131_v2 = vadd.f32 %v3124_v24, %v3036_v38  ;;  %v3048_v5 = vsel %vm438_vm10, %v3047_v53, %v3046_v25  ;;  %v3450_v24 = vsel %vm720_vm11, %v3449_v42, %v3448_v26  ;;  %v3451_v15 = vrot.slane %v7102_v7, 6  ;;  %vm7705_vm10 = vmmov %vm7703_vm1 }
0x1c90   :  { %v3132_v41 = vadd.f32 %v3126_v13, %v3048_v5  ;;  %v7147_v13 = vsel %vm855_vm12, %v7094_v45, %v3572_v54  ;;  %v3577_v3 = vsel %vm855_vm12, %v3045_v22, %v3576_v27  ;;  %v7161_v23 = vsel %vm985_vm13, %v7094_v45, %v3704_v35 }
0x1c91   :  { %5597 = vtanh.f32 %v3131_v2  ;;  %v7151_v17 = vsel %vm855_vm12, %v3451_v15, %v3450_v24  ;;  %v7154_v50 = vsel %vm985_vm13, %v3047_v53, %v3577_v3  ;;  %v7164_v63 = vsel %vm985_vm13, %v3188_v60, %v3708_v57 }
0x1c92   :  { %5599 = vtanh.f32 %v3132_v41  ;;  %v7168_v30 = vsel %vm432_vm7, %v7102_v7, %v3316_v39  ;;  %v7173_v27 = vsel %vm432_vm7, %v7094_v45, %v7086_v31  ;;  %v4083_v16 = vsel %vm432_vm7, %v3449_v42, %v7069_v34 }
0x1c93   :  { %v7178_v43 = vsel %vm435_vm9, %v3451_v15, %v4083_v16  ;;  %v5009_v57 = vmul.f32 -1.442695, %v3131_v2  ;;  %v5010_v9 = vmul.f32 -1.442695, %v3132_v41  ;;  %v3190_v16 = vrot.slane %v7102_v7, 2 }
0x1c95   :  { %5601 = vpow2.f32 %v5009_v57 }
0x1c96   :  { %5603 = vpow2.f32 %v5010_v9  ;;  %v3183_v9 = vsel %vm7705_vm10, %v7104_v55, %v7110_v37 }
0x1c9b   :  { %v5598_v52 = vpop.eup %5597 }
0x1c9c   :  { %v5600_v46 = vpop.eup %5599  ;;  %3148 = vrot.lane.b32.xlu0 %v5598_v52, %s5845_s3 }
0x1c9d   :  { %3166 = vrot.lane.b32.xlu1 %v5600_v46, %s5845_s3 }
0x1c9f   :  { %v5602_v4 = vpop.eup %5601 }
0x1ca0   :  { %v5604_v47 = vpop.eup %5603  ;;  %v3139_v48 = vadd.f32 1.0, %v5602_v4 }
0x1ca1   :  { %v3140_v36 = vadd.f32 1.0, %v5604_v47 }
0x1ca2   :  { %5605 = vrcp.f32 %v3139_v48 }
0x1ca3   :  { %5607 = vrcp.f32 %v3140_v36  ;;  %v3191_v36 = vsel %vm7706_vm5, %v3190_v16, %v7114_v18 }
0x1cac   :  { %v5606_v34 = vpop.eup %5605 }
0x1cad   :  { %v5608_v14 = vpop.eup %5607  ;;  %v3145_v49 = vmul.f32 0.0, %v5606_v34 }
0x1cae   :  { %v3163_v53 = vmul.f32 0.0, %v5608_v14 }
0x1d0e   :  { %v3149_v10 = vpop.permute.xlu0 %3148 }
0x1d0f   :  { %v3151_v60 = vmul.f32 %v5606_v34, %v3149_v10  ;;  %v3167_v39 = vpop.permute.xlu1 %3166 }
0x1d10   :  { %v3169_v42 = vmul.f32 %v5608_v14, %v3167_v39 }
0x1d11   :  { %3153 = vrot.lane.b32.xlu0 %v3151_v60, %s5851_s30 }
0x1d12   :  { %3171 = vrot.lane.b32.xlu1 %v3169_v42, %s5851_s30 }
0x1d83   :  { %v3154_v22 = vpop.permute.xlu0 %3153 }
0x1d84   :  { %v7184_v38 = vadd.f32 %v3154_v22, %v3145_v49  ;;  %v3172_v25 = vpop.permute.xlu1 %3171 }
0x1d85   :  { %v7186_v62 = vadd.f32 %v3172_v25, %v3163_v53 }
0x1d86   :  { %5609 = vtanh.f32 %v7184_v38 }
0x1d87   :  { %5611 = vtanh.f32 %v7186_v62 }
0x1d90   :  { %v5610_v2 = vpop.eup %5609 }
0x1d91   :  { %v5612_v5 = vpop.eup %5611  ;;  %3159 = vrot.lane.b32.xlu0 %v5610_v2, %s5845_s3 }
0x1d92   :  { %3177 = vrot.lane.b32.xlu1 %v5612_v5, %s5845_s3 }
0x1e03   :  { %v3160_v11 = vpop.permute.xlu0 %3159 }
0x1e04   :  { %v7192_v26 = vmul.f32 %v5606_v34, %v3160_v11  ;;  %v3178_v41 = vpop.permute.xlu1 %3177 }
0x1e05   :  { %v7194_v24 = vmul.f32 %v5608_v14, %v3178_v41 }
0x1e06   :  { %3194 = vrot.lane.b32.xlu0 %v7192_v26, %s5851_s30 }
0x1e07   :  { %3198 = vrot.lane.b32.xlu1 %v7194_v24, %s5845_s3 }
0x1e78   :  { %v3195_v15 = vpop.permute.xlu0 %3194 }
0x1e79   :  { %v3199_v54 = vpop.permute.xlu1 %3198 }
0x1e7a   :  { %v3201_v3 = vsel %vm243_vm6, %v3195_v15, %v3199_v54  ;;  %v3268_v15 = vrot.slane %v7184_v38, 7  ;;  %v3289_v54 = vrot.slane %v7186_v62, 7 }
0x1e7b   :  { %v3202_v35 = vpack.c.bf16 %v3201_v3, %v3201_v3 }
0x1e7d   :  { %5011 = vmatmul.mubr.msk.bf16.vlgmr.msra.gmra.mrb[40].mxu0 %vm494_vm14, %v3202_v35 }
0x1e7e   :  { %3341 = vmatpush1.bf16.msra.mxu0 %v6968_v12  ;;  %3372 = vmatprep.mubr.bf16.mxu0 %v5848_v0 }
0x1e7f   :  { %3342 = vmatprep.subr.bf16.mxu0 %v6987_v6 }
0x1e82   :  { %3343 = vmatpush1.bf16.msra.mxu0 %v6992_v29 }
0x1e83   :  { %3344 = vmatprep.subr.bf16.mxu0 %v7000_v20 }
0x1e86   :  { %3345 = vmatpush1.bf16.msra.mxu0 %v7005_v40 }
0x1e87   :  { %3346 = vmatprep.subr.bf16.mxu0 %v7014_v1 }
0x1e8a   :  { %3347 = vmatpush1.bf16.msra.mxu0 %v7019_v56 }
0x1e8b   :  { %3469 = vmatprep.subr.bf16.mxu0 %v6963_v8 }
0x1f50   :  { %v3240_v52 = vpop.f32.mrb[40].mxu0 }
0x1f51   :  { %v3249_v46 = vrot.slane %v3240_v52, 7  ;;  %v3242_v57 = vpop.f32.mrb[41].mxu0 }
0x1f52   :  { %v3250_v4 = vrot.slane %v3242_v57, 7  ;;  %v3244_v47 = vpop.f32.mrb[42].mxu0 }
0x1f53   :  { %v3253_v48 = vadd.f32 %v3249_v46, %v3183_v9  ;;  %v3245_v34 = vpop.f32.mrb[43].mxu0 }
0x1f54   :  { %v3254_v10 = vadd.f32 %v3250_v4, %v3191_v36 }
0x1f55   :  { %5613 = vtanh.f32 %v3253_v48  ;;  %v5012_v39 = vmul.f32 -1.442695, %v3253_v48 }
0x1f56   :  { %5615 = vtanh.f32 %v3254_v10  ;;  %v5013_v37 = vmul.f32 -1.442695, %v3254_v10 }
0x1f57   :  { %5617 = vpow2.f32 %v5012_v39 }
0x1f58   :  { %5619 = vpow2.f32 %v5013_v37 }
0x1f5f   :  { %v5614_v14 = vpop.eup %5613 }
0x1f60   :  { %v5616_v60 = vpop.eup %5615  ;;  %3273 = vrot.lane.b32.xlu0 %v5614_v14, %s5845_s3 }
0x1f61   :  { %3294 = vrot.lane.b32.xlu1 %v5616_v60, %s5845_s3  ;;  %v5618_v42 = vpop.eup %5617 }
0x1f62   :  { %v5620_v49 = vpop.eup %5619  ;;  %v3261_v22 = vadd.f32 1.0, %v5618_v42 }
0x1f63   :  { %v3262_v53 = vadd.f32 1.0, %v5620_v49 }
0x1f64   :  { %5621 = vrcp.f32 %v3261_v22 }
0x1f65   :  { %5623 = vrcp.f32 %v3262_v53 }
0x1f6e   :  { %v5622_v18 = vpop.eup %5621 }
0x1f6f   :  { %v5624_v2 = vpop.eup %5623  ;;  %v3270_v3 = vmul.f32 %v5622_v18, %v3268_v15 }
0x1f70   :  { %v3291_v52 = vmul.f32 %v5624_v2, %v3289_v54 }
0x1fd2   :  { %v3274_v25 = vpop.permute.xlu0 %3273 }
0x1fd3   :  { %v3276_v5 = vmul.f32 %v5622_v18, %v3274_v25  ;;  %v3295_v11 = vpop.permute.xlu1 %3294  ;;  %v3311_v25 = vsel %vm720_vm11, %v7104_v55, %v7118_v21  ;;  %vm4888_vm11 = vcmask 9216  }
0x1fd4   :  { %v3297_v41 = vmul.f32 %v5624_v2, %v3295_v11 }
0x1fd5   :  { %3278 = vrot.lane.b32.xlu0 %v3276_v5, %s5851_s30 }
0x1fd6   :  { %3299 = vrot.lane.b32.xlu1 %v3297_v41, %s5851_s30 }
0x2047   :  { %v3279_v35 = vpop.permute.xlu0 %3278 }
0x2048   :  { %v7225_v46 = vadd.f32 %v3279_v35, %v3270_v3  ;;  %v3300_v57 = vpop.permute.xlu1 %3299 }
0x2049   :  { %v7227_v9 = vadd.f32 %v3300_v57, %v3291_v52 }
0x204a   :  { %5625 = vtanh.f32 %v7225_v46 }
0x204b   :  { %5627 = vtanh.f32 %v7227_v9 }
0x2054   :  { %v5626_v4 = vpop.eup %5625 }
0x2055   :  { %v5628_v47 = vpop.eup %5627  ;;  %3284 = vrot.lane.b32.xlu0 %v5626_v4, %s5845_s3 }
0x2056   :  { %3305 = vrot.lane.b32.xlu1 %v5628_v47, %s5845_s3 }
0x20c7   :  { %v3285_v38 = vpop.permute.xlu0 %3284 }
0x20c8   :  { %v7233_v62 = vmul.f32 %v5622_v18, %v3285_v38  ;;  %v3306_v48 = vpop.permute.xlu1 %3305 }
0x20c9   :  { %v7235_v36 = vmul.f32 %v5624_v2, %v3306_v48 }
0x20ca   :  { %3321 = vrot.lane.b32.xlu0 %v7233_v62, %s5851_s30 }
0x20cb   :  { %3325 = vrot.lane.b32.xlu1 %v7235_v36, %s5845_s3 }
0x213c   :  { %v3322_v34 = vpop.permute.xlu0 %3321 }
0x213d   :  { %v3326_v10 = vpop.permute.xlu1 %3325 }
0x213e   :  { %v3328_v14 = vsel %vm243_vm6, %v3322_v34, %v3326_v10 }
0x213f   :  { %v3329_v60 = vpack.c.bf16 %v3328_v14, %v3328_v14 }
0x2141   :  { %v3333_v39 = vshll.u32 %v3329_v60, 16  ;;  %v3331_v37 = vshrl.u32 %v3329_v60, 16  ;;  %v3402_v60 = vrot.slane %v7225_v46, 7  ;;  %v4272_v46 = vrot.slane %v7233_v62, 1 }
0x2143   :  { %v3335_v42 = vrot.slane %v3333_v39, 1  ;;  %v3423_v39 = vrot.slane %v7227_v9, 7 }
0x2145   :  { %v3336_v49 = vor.u32 %v3335_v42, %v3331_v37 }
0x2147   :  { %5014 = vmatmul.mubr.msk.bf16.vlgmr.msra.gmra.mrb[44].mxu0 %vm494_vm14, %v3336_v49 }
0x2148   :  { %3470 = vmatpush1.bf16.msra.mxu0 %v6968_v12  ;;  %3501 = vmatprep.mubr.bf16.mxu0 %v5848_v0 }
0x2149   :  { %3471 = vmatprep.subr.bf16.mxu0 %v6987_v6 }
0x214c   :  { %3472 = vmatpush1.bf16.msra.mxu0 %v6992_v29 }
0x214d   :  { %3473 = vmatprep.subr.bf16.mxu0 %v7000_v20 }
0x2150   :  { %3474 = vmatpush1.bf16.msra.mxu0 %v7005_v40 }
0x2151   :  { %3475 = vmatprep.subr.bf16.mxu0 %v7014_v1 }
0x2154   :  { %3476 = vmatpush1.bf16.msra.mxu0 %v7019_v56 }
0x2155   :  { %3727 = vmatprep.subr.bf16.mxu0 %v6963_v8 }
0x221a   :  { %v3374_v22 = vpop.f32.mrb[44].mxu0 }
0x221b   :  { %v3383_v53 = vrot.slane %v3374_v22, 6  ;;  %v3376_v18 = vpop.f32.mrb[45].mxu0 }
0x221c   :  { %v3384_v2 = vrot.slane %v3376_v18, 6  ;;  %v3378_v5 = vpop.f32.mrb[46].mxu0 }
0x221d   :  { %v3387_v11 = vadd.f32 %v3383_v53, %v3311_v25  ;;  %v3379_v41 = vpop.f32.mrb[47].mxu0 }
0x221e   :  { %v3388_v15 = vadd.f32 %v3384_v2, %v7134_v33 }
0x221f   :  { %5629 = vtanh.f32 %v3387_v11  ;;  %v5015_v35 = vmul.f32 -1.442695, %v3387_v11 }
0x2220   :  { %5631 = vtanh.f32 %v3388_v15  ;;  %v5016_v52 = vmul.f32 -1.442695, %v3388_v15  ;;  %v4274_v15 = vadd.f32 %v4272_v46, %v7192_v26 }
0x2221   :  { %5633 = vpow2.f32 %v5015_v35 }
0x2222   :  { %5635 = vpow2.f32 %v5016_v52 }
0x2229   :  { %v5630_v54 = vpop.eup %5629 }
0x222a   :  { %v5632_v3 = vpop.eup %5631  ;;  %3407 = vrot.lane.b32.xlu0 %v5630_v54, %s5845_s3  ;;  %v4275_v54 = vmax.f32 %v7192_v26, %v4272_v46 }
0x222b   :  { %3428 = vrot.lane.b32.xlu1 %v5632_v3, %s5845_s3  ;;  %v5634_v57 = vpop.eup %5633 }
0x222c   :  { %v5636_v21 = vpop.eup %5635  ;;  %v3395_v4 = vadd.f32 1.0, %v5634_v57 }
0x222d   :  { %v3396_v47 = vadd.f32 1.0, %v5636_v21 }
0x222e   :  { %5637 = vrcp.f32 %v3395_v4 }
0x222f   :  { %5639 = vrcp.f32 %v3396_v47 }
0x2238   :  { %v5638_v38 = vpop.eup %5637 }
0x2239   :  { %v5640_v48 = vpop.eup %5639  ;;  %v3404_v37 = vmul.f32 %v5638_v38, %v3402_v60 }
0x223a   :  { %v3425_v49 = vmul.f32 %v5640_v48, %v3423_v39 }
0x229c   :  { %v3408_v33 = vpop.permute.xlu0 %3407 }
0x229d   :  { %v3410_v34 = vmul.f32 %v5638_v38, %v3408_v33  ;;  %v3429_v10 = vpop.permute.xlu1 %3428 }
0x229e   :  { %v3431_v14 = vmul.f32 %v5640_v48, %v3429_v10 }
0x229f   :  { %3412 = vrot.lane.b32.xlu0 %v3410_v34, %s5851_s30 }
0x22a0   :  { %3433 = vrot.lane.b32.xlu1 %v3431_v14, %s5851_s30 }
0x2311   :  { %v3413_v42 = vpop.permute.xlu0 %3412 }
0x2312   :  { %v7262_v22 = vadd.f32 %v3413_v42, %v3404_v37  ;;  %v3434_v53 = vpop.permute.xlu1 %3433 }
0x2313   :  { %v7264_v18 = vadd.f32 %v3434_v53, %v3425_v49 }
0x2314   :  { %5641 = vtanh.f32 %v7262_v22 }
0x2315   :  { %5643 = vtanh.f32 %v7264_v18 }
0x231e   :  { %v5642_v25 = vpop.eup %5641 }
0x231f   :  { %v5644_v2 = vpop.eup %5643  ;;  %3418 = vrot.lane.b32.xlu0 %v5642_v25, %s5845_s3 }
0x2320   :  { %3439 = vrot.lane.b32.xlu1 %v5644_v2, %s5845_s3 }
0x2391   :  { %v3419_v9 = vpop.permute.xlu0 %3418 }
0x2392   :  { %v3421_v5 = vmul.f32 %v5638_v38, %v3419_v9  ;;  %v3440_v11 = vpop.permute.xlu1 %3439 }
0x2393   :  { %v7271_v41 = vmul.f32 %v5640_v48, %v3440_v11  ;;  %v3445_v48 = vsel %vm855_vm12, %v7104_v55, %v7138_v58 }
0x2394   :  { %v4285_v3 = vrot.slane %v3421_v5, 2  ;;  %3455 = vrot.lane.b32.xlu0 %v3421_v5, %s5851_s30 }
0x2395   :  { %3459 = vrot.lane.b32.xlu1 %v7271_v41, %s5845_s3 }
0x2396   :  { %v7278_v35 = vadd.f32 %v4285_v3, %v4274_v15  ;;  %v7280_v52 = vmax.f32 %v4275_v54, %v4285_v3  ;;  %v3531_v54 = vrot.slane %v7262_v22, 7  ;;  %v3552_v3 = vrot.slane %v7264_v18, 7 }
0x2406   :  { %v3456_v62 = vpop.permute.xlu0 %3455 }
0x2407   :  { %v3460_v57 = vpop.permute.xlu1 %3459 }
0x2408   :  { %v3462_v21 = vsel %vm243_vm6, %v3456_v62, %v3460_v57 }
0x2409   :  { %v3463_v4 = vpack.c.bf16 %v3462_v21, %v3462_v21 }
0x240b   :  { %v3465_v47 = vrot.slane %v3463_v4, 1 }
0x240d   :  { %5017 = vmatmul.mubr.msk.bf16.vlgmr.msra.gmra.mrb[48].mxu0 %vm494_vm14, %v3465_v47 }
0x240e   :  { %3728 = vmatpush1.bf16.msra.mxu0 %v6968_v12  ;;  %3759 = vmatprep.mubr.bf16.mxu0 %v5848_v0 }
0x240f   :  { %3729 = vmatprep.subr.bf16.mxu0 %v6987_v6 }
0x2412   :  { %3730 = vmatpush1.bf16.msra.mxu0 %v6992_v29 }
0x2413   :  { %3731 = vmatprep.subr.bf16.mxu0 %v7000_v20 }
0x2416   :  { %3732 = vmatpush1.bf16.msra.mxu0 %v7005_v40 }
0x2417   :  { %3733 = vmatprep.subr.bf16.mxu0 %v7014_v1 }
0x241a   :  { %3734 = vmatpush1.bf16.msra.mxu0 %v7019_v56 }
0x241b   :  { %4111 = vmatprep.subr.bf16.mxu0 %v6963_v8 }
0x24e0   :  { %v3503_v26 = vpop.f32.mrb[48].mxu0 }
0x24e1   :  { %v3512_v38 = vrot.slane %v3503_v26, 5  ;;  %v3505_v33 = vpop.f32.mrb[49].mxu0 }
0x24e2   :  { %v3513_v34 = vrot.slane %v3505_v33, 5  ;;  %v3507_v10 = vpop.f32.mrb[50].mxu0 }
0x24e3   :  { %v3516_v14 = vadd.f32 %v3512_v38, %v3445_v48  ;;  %v3508_v60 = vpop.f32.mrb[51].mxu0 }
0x24e4   :  { %v3517_v39 = vadd.f32 %v3513_v34, %v7151_v17 }
0x24e5   :  { %5645 = vtanh.f32 %v3516_v14  ;;  %v5018_v8 = vmul.f32 -1.442695, %v3516_v14 }
0x24e6   :  { %5647 = vtanh.f32 %v3517_v39  ;;  %v5019_v49 = vmul.f32 -1.442695, %v3517_v39 }
0x24e7   :  { %5649 = vpow2.f32 %v5018_v8 }
0x24e8   :  { %5651 = vpow2.f32 %v5019_v49 }
0x24ef   :  { %v5646_v37 = vpop.eup %5645 }
0x24f0   :  { %v5648_v42 = vpop.eup %5647  ;;  %3536 = vrot.lane.b32.xlu0 %v5646_v37, %s5845_s3 }
0x24f1   :  { %3557 = vrot.lane.b32.xlu1 %v5648_v42, %s5845_s3  ;;  %v5650_v53 = vpop.eup %5649 }
0x24f2   :  { %v5652_v58 = vpop.eup %5651  ;;  %v3524_v25 = vadd.f32 1.0, %v5650_v53 }
0x24f3   :  { %v3525_v2 = vadd.f32 1.0, %v5652_v58 }
0x24f4   :  { %5653 = vrcp.f32 %v3524_v25 }
0x24f5   :  { %5655 = vrcp.f32 %v3525_v2 }
0x24fe   :  { %v5654_v46 = vpop.eup %5653 }
0x24ff   :  { %v5656_v9 = vpop.eup %5655  ;;  %v3533_v62 = vmul.f32 %v5654_v46, %v3531_v54 }
0x2500   :  { %v3554_v21 = vmul.f32 %v5656_v9, %v3552_v3 }
0x2562   :  { %v3537_v17 = vpop.permute.xlu0 %3536 }
0x2563   :  { %v3539_v5 = vmul.f32 %v5654_v46, %v3537_v17  ;;  %v3558_v11 = vpop.permute.xlu1 %3557  ;;  %v3574_v17 = vsel %vm985_vm13, %v7104_v55, %v7147_v13 }
0x2564   :  { %v3560_v15 = vmul.f32 %v5656_v9, %v3558_v11 }
0x2565   :  { %3541 = vrot.lane.b32.xlu0 %v3539_v5, %s5851_s30 }
0x2566   :  { %3562 = vrot.lane.b32.xlu1 %v3560_v15, %s5851_s30 }
0x25d7   :  { %v3542_v57 = vpop.permute.xlu0 %3541 }
0x25d8   :  { %v7303_v4 = vadd.f32 %v3542_v57, %v3533_v62  ;;  %v3563_v47 = vpop.permute.xlu1 %3562 }
0x25d9   :  { %v7305_v26 = vadd.f32 %v3563_v47, %v3554_v21 }
0x25da   :  { %5657 = vtanh.f32 %v7303_v4 }
0x25db   :  { %5659 = vtanh.f32 %v7305_v26 }
0x25e4   :  { %v5658_v38 = vpop.eup %5657 }
0x25e5   :  { %v5660_v33 = vpop.eup %5659  ;;  %3547 = vrot.lane.b32.xlu0 %v5658_v38, %s5845_s3 }
0x25e6   :  { %3568 = vrot.lane.b32.xlu1 %v5660_v33, %s5845_s3 }
0x2657   :  { %v3548_v22 = vpop.permute.xlu0 %3547 }
0x2658   :  { %v3550_v18 = vmul.f32 %v5654_v46, %v3548_v22  ;;  %v3569_v48 = vpop.permute.xlu1 %3568 }
0x2659   :  { %v7311_v34 = vmul.f32 %v5656_v9, %v3569_v48 }
0x265a   :  { %v4298_v10 = vrot.slane %v3550_v18, 3  ;;  %3581 = vrot.lane.b32.xlu0 %v3550_v18, %s5851_s30 }
0x265b   :  { %3585 = vrot.lane.b32.xlu1 %v7311_v34, %s5845_s3 }
0x265c   :  { %v7317_v14 = vadd.f32 %v4298_v10, %v7278_v35  ;;  %v7320_v60 = vmax.f32 %v7280_v52, %v4298_v10 }
0x26cc   :  { %v3582_v39 = vpop.permute.xlu0 %3581 }
0x26cd   :  { %v3586_v37 = vpop.permute.xlu1 %3585 }
0x26ce   :  { %v3588_v42 = vsel %vm243_vm6, %v3582_v39, %v3586_v37  ;;  %v3663_v37 = vrot.slane %v7303_v4, 7 }
0x26cf   :  { %v3589_v8 = vpack.c.bf16 %v3588_v42, %v3588_v42  ;;  %v3684_v42 = vrot.slane %v7305_v26, 7 }
0x26d1   :  { %v3591_v49 = vshrl.u32 %v3589_v8, 16  ;;  %v3594_v53 = vshll.u32 %v3589_v8, 16 }
0x26d3   :  { %v3593_v58 = vrot.slane %v3591_v49, 1  ;;  %v3596_v25 = vrot.slane %v3594_v53, 2 }
0x26d5   :  { %v3597_v2 = vor.u32 %v3596_v25, %v3593_v58 }
0x26d7   :  { %5020 = vmatmul.mubr.msk.bf16.vlgmr.msra.gmra.mrb[48].mxu1 %vm494_vm14, %v3597_v2 }
0x26d8   :  { %3919 = vmatpush1.bf16.msra.mxu1 %v6968_v12  ;;  %3950 = vmatprep.mubr.bf16.mxu1 %v5848_v0 }
0x26d9   :  { %3920 = vmatprep.subr.bf16.mxu1 %v6987_v6 }
0x26dc   :  { %3921 = vmatpush1.bf16.msra.mxu1 %v6992_v29 }
0x26dd   :  { %3922 = vmatprep.subr.bf16.mxu1 %v7000_v20 }
0x26e0   :  { %3923 = vmatpush1.bf16.msra.mxu1 %v7005_v40 }
0x26e1   :  { %3924 = vmatprep.subr.bf16.mxu1 %v7014_v1 }
0x26e4   :  { %3925 = vmatpush1.bf16.msra.mxu1 %v7019_v56 }
0x27aa   :  { %v3635_v35 = vpop.f32.mrb[48].mxu1 }
0x27ab   :  { %v3644_v52 = vrot.slane %v3635_v35, 4  ;;  %v3637_v46 = vpop.f32.mrb[49].mxu1 }
0x27ac   :  { %v3645_v9 = vrot.slane %v3637_v46, 4  ;;  %v3639_v5 = vpop.f32.mrb[50].mxu1 }
0x27ad   :  { %v3648_v11 = vadd.f32 %v3644_v52, %v3574_v17  ;;  %v3640_v15 = vpop.f32.mrb[51].mxu1 }
0x27ae   :  { %v3649_v54 = vadd.f32 %v3645_v9, %v7154_v50 }
0x27af   :  { %5661 = vtanh.f32 %v3648_v11  ;;  %v5021_v57 = vmul.f32 -1.442695, %v3648_v11 }
0x27b0   :  { %5663 = vtanh.f32 %v3649_v54  ;;  %v5022_v21 = vmul.f32 -1.442695, %v3649_v54 }
0x27b1   :  { %5665 = vpow2.f32 %v5021_v57 }
0x27b2   :  { %5667 = vpow2.f32 %v5022_v21 }
0x27b9   :  { %v5662_v3 = vpop.eup %5661 }
0x27ba   :  { %v5664_v62 = vpop.eup %5663  ;;  %3668 = vrot.lane.b32.xlu0 %v5662_v3, %s5845_s3 }
0x27bb   :  { %3689 = vrot.lane.b32.xlu1 %v5664_v62, %s5845_s3  ;;  %v5666_v47 = vpop.eup %5665 }
0x27bc   :  { %v5668_v13 = vpop.eup %5667  ;;  %v3656_v38 = vadd.f32 1.0, %v5666_v47 }
0x27bd   :  { %v3657_v33 = vadd.f32 1.0, %v5668_v13 }
0x27be   :  { %5669 = vrcp.f32 %v3656_v38 }
0x27bf   :  { %5671 = vrcp.f32 %v3657_v33 }
0x27c8   :  { %v5670_v22 = vpop.eup %5669 }
0x27c9   :  { %v5672_v18 = vpop.eup %5671  ;;  %v3665_v8 = vmul.f32 %v5670_v22, %v3663_v37 }
0x27ca   :  { %v3686_v53 = vmul.f32 %v5672_v18, %v3684_v42 }
0x282c   :  { %v3669_v50 = vpop.permute.xlu0 %3668 }
0x282d   :  { %v3671_v48 = vmul.f32 %v5670_v22, %v3669_v50  ;;  %v3690_v10 = vpop.permute.xlu1 %3689 }
0x282e   :  { %v3692_v39 = vmul.f32 %v5672_v18, %v3690_v10 }
0x282f   :  { %3673 = vrot.lane.b32.xlu0 %v3671_v48, %s5851_s30 }
0x2830   :  { %3694 = vrot.lane.b32.xlu1 %v3692_v39, %s5851_s30 }
0x28a1   :  { %v3674_v49 = vpop.permute.xlu0 %3673 }
0x28a2   :  { %v7342_v58 = vadd.f32 %v3674_v49, %v3665_v8  ;;  %v3695_v25 = vpop.permute.xlu1 %3694 }
0x28a3   :  { %v7344_v2 = vadd.f32 %v3695_v25, %v3686_v53 }
0x28a4   :  { %5673 = vtanh.f32 %v7342_v58 }
0x28a5   :  { %5675 = vtanh.f32 %v7344_v2 }
0x28ae   :  { %v5674_v35 = vpop.eup %5673 }
0x28af   :  { %v5676_v52 = vpop.eup %5675  ;;  %3679 = vrot.lane.b32.xlu0 %v5674_v35, %s5845_s3 }
0x28b0   :  { %3700 = vrot.lane.b32.xlu1 %v5676_v52, %s5845_s3 }
0x2921   :  { %v3680_v4 = vpop.permute.xlu0 %3679 }
0x2922   :  { %v3682_v26 = vmul.f32 %v5670_v22, %v3680_v4  ;;  %v3701_v46 = vpop.permute.xlu1 %3700 }
0x2923   :  { %v7350_v17 = vmul.f32 %v5672_v18, %v3701_v46 }
0x2924   :  { %v4308_v9 = vrot.slane %v3682_v26, 4  ;;  %3713 = vrot.lane.b32.xlu0 %v3682_v26, %s5851_s30 }
0x2925   :  { %3717 = vrot.lane.b32.xlu1 %v7350_v17, %s5845_s3 }
0x2926   :  { %v7356_v5 = vadd.f32 %v4308_v9, %v7317_v14  ;;  %v7359_v11 = vmax.f32 %v7320_v60, %v4308_v9 }
0x2996   :  { %v3714_v15 = vpop.permute.xlu0 %3713 }
0x2997   :  { %v3718_v54 = vpop.permute.xlu1 %3717 }
0x2998   :  { %v3720_v3 = vsel %vm243_vm6, %v3714_v15, %v3718_v54  ;;  %v3803_v54 = vrot.slane %v7342_v58, 7 }
0x2999   :  { %v3721_v62 = vpack.c.bf16 %v3720_v3, %v3720_v3 }
0x299b   :  { %v3723_v57 = vrot.slane %v3721_v62, 2 }
0x299d   :  { %5023 = vmatmul.mubr.msk.bf16.vlgmr.msra.gmra.mrb[52].mxu0 %vm494_vm14, %v3723_v57 }
0x299e   :  { %4112 = vmatpush1.bf16.msra.mxu0 %v6968_v12  ;;  %4143 = vmatprep.mubr.bf16.mxu0 %v5848_v0 }
0x299f   :  { %4113 = vmatprep.subr.bf16.mxu0 %v6987_v6 }
0x29a2   :  { %4114 = vmatpush1.bf16.msra.mxu0 %v6992_v29 }
0x29a3   :  { %4115 = vmatprep.subr.bf16.mxu0 %v7000_v20 }
0x29a6   :  { %4116 = vmatpush1.bf16.msra.mxu0 %v7005_v40 }
0x29a7   :  { %4117 = vmatprep.subr.bf16.mxu0 %v7014_v1 }
0x29aa   :  { %4118 = vmatpush1.bf16.msra.mxu0 %v7019_v56 }
0x29ab   :  { %5200 = vmatprep.subr.bf16.mxu0 %v5849_v19 }
0x2a70   :  { %v3761_v14 = vpop.f32.mrb[52].mxu0 }
0x2a71   :  { %v3770_v60 = vrot.slane %v3761_v14, 3  ;;  %v3763_v21 = vpop.f32.mrb[53].mxu0 }
0x2a72   :  { %v3771_v12 = vrot.slane %v3763_v21, 3  ;;  %v3765_v47 = vpop.f32.mrb[54].mxu0 }
0x2a73   :  { %v3774_v0 = vadd.f32 %v3770_v60, %v7161_v23  ;;  %v3776_v6 = vadd.f32 %v3770_v60, %v7104_v55  ;;  %v3766_v29 = vpop.f32.mrb[55].mxu0 }
0x2a74   :  { %v3775_v20 = vadd.f32 %v3771_v12, %v7164_v63  ;;  %v3777_v40 = vadd.f32 %v3771_v12, %v3190_v16  ;;  %v3842_v12 = vrot.slane %v7344_v2, 7 }
0x2a75   :  { %5677 = vtanh.f32 %v3774_v0  ;;  %v5024_v63 = vmul.f32 -1.442695, %v3774_v0  ;;  %v5026_v38 = vmul.f32 -1.442695, %v3776_v6 }
0x2a76   :  { %5679 = vtanh.f32 %v3776_v6  ;;  %v5025_v7 = vmul.f32 -1.442695, %v3775_v20  ;;  %v5027_v16 = vmul.f32 -1.442695, %v3777_v40 }
0x2a77   :  { %5681 = vtanh.f32 %v3775_v20 }
0x2a78   :  { %5683 = vtanh.f32 %v3777_v40 }
0x2a79   :  { %5685 = vpow2.f32 %v5024_v63 }
0x2a7a   :  { %5687 = vpow2.f32 %v5026_v38 }
0x2a7b   :  { %5689 = vpow2.f32 %v5025_v7 }
0x2a7c   :  { %5691 = vpow2.f32 %v5027_v16 }
0x2a7f   :  { %v5678_v1 = vpop.eup %5677 }
0x2a80   :  { %v5680_v56 = vpop.eup %5679  ;;  %3811 = vrot.lane.b32.xlu0 %v5678_v1, %s5845_s3 }
0x2a81   :  { %3813 = vrot.lane.b32.xlu1 %v5680_v56, %s5845_s3  ;;  %v5682_v13 = vpop.eup %5681 }
0x2a82   :  { %v5684_v23 = vpop.eup %5683 }
0x2a83   :  { %v5686_v33 = vpop.eup %5685 }
0x2a84   :  { %3850 = vrot.lane.b32.xlu0 %v5682_v13, %s5845_s3  ;;  %v5688_v22 = vpop.eup %5687  ;;  %v3790_v50 = vadd.f32 1.0, %v5686_v33 }
0x2a85   :  { %3852 = vrot.lane.b32.xlu1 %v5684_v23, %s5845_s3  ;;  %v3792_v18 = vadd.f32 1.0, %v5688_v22  ;;  %v5690_v48 = vpop.eup %5689 }
0x2a86   :  { %v5692_v10 = vpop.eup %5691  ;;  %5693 = vrcp.f32 %v3790_v50  ;;  %v3791_v39 = vadd.f32 1.0, %v5690_v48 }
0x2a87   :  { %5695 = vrcp.f32 %v3792_v18  ;;  %v3793_v37 = vadd.f32 1.0, %v5692_v10 }
0x2a88   :  { %5697 = vrcp.f32 %v3791_v39 }
0x2a89   :  { %5699 = vrcp.f32 %v3793_v37 }
0x2a90   :  { %v5694_v42 = vpop.eup %5693 }
0x2a91   :  { %v5696_v49 = vpop.eup %5695  ;;  %v3805_v3 = vmul.f32 %v5694_v42, %v3803_v54 }
0x2a92   :  { %v5698_v52 = vpop.eup %5697  ;;  %v3806_v62 = vmul.f32 %v5696_v49, %v3803_v54 }
0x2a93   :  { %v5700_v26 = vpop.eup %5699  ;;  %v3844_v6 = vmul.f32 %v5698_v52, %v3842_v12 }
0x2a94   :  { %v3845_v29 = vmul.f32 %v5700_v26, %v3842_v12 }
0x2af2   :  { %v3812_v8 = vpop.permute.xlu0 %3811 }
0x2af3   :  { %v3814_v53 = vpop.permute.xlu1 %3813  ;;  %v3817_v25 = vmul.f32 %v5694_v42, %v3812_v8 }
0x2af4   :  { %v3818_v35 = vmul.f32 %v5696_v49, %v3814_v53 }
0x2af5   :  { %3821 = vrot.lane.b32.xlu0 %v3817_v25, %s5851_s30 }
0x2af6   :  { %3823 = vrot.lane.b32.xlu1 %v3818_v35, %s5851_s30  ;;  %v3851_v4 = vpop.permute.xlu0 %3850 }
0x2af7   :  { %v3853_v46 = vpop.permute.xlu1 %3852  ;;  %v3856_v9 = vmul.f32 %v5698_v52, %v3851_v4 }
0x2af8   :  { %v3857_v15 = vmul.f32 %v5700_v26, %v3853_v46 }
0x2af9   :  { %3860 = vrot.lane.b32.xlu0 %v3856_v9, %s5851_s30 }
0x2afa   :  { %3862 = vrot.lane.b32.xlu1 %v3857_v15, %s5851_s30 }
0x2b67   :  { %v3822_v57 = vpop.permute.xlu0 %3821 }
0x2b68   :  { %v3824_v14 = vpop.permute.xlu1 %3823  ;;  %v7386_v60 = vadd.f32 %v3822_v57, %v3805_v3 }
0x2b69   :  { %v3828_v21 = vadd.f32 %v3824_v14, %v3806_v62 }
0x2b6a   :  { %5701 = vtanh.f32 %v7386_v60  ;;  %v3995_v47 = vrot.slane %v7386_v60, 7 }
0x2b6b   :  { %5703 = vtanh.f32 %v3828_v21  ;;  %v3996_v0 = vrot.slane %v3828_v21, 7  ;;  %v3861_v20 = vpop.permute.xlu0 %3860 }
0x2b6c   :  { %v3863_v40 = vpop.permute.xlu1 %3862  ;;  %v7396_v1 = vadd.f32 %v3861_v20, %v3844_v6 }
0x2b6d   :  { %v7394_v58 = vsel %vm1407_vm15, %v3995_v47, %v3996_v0  ;;  %v3867_v56 = vadd.f32 %v3863_v40, %v3845_v29  ;;  %v3880_v40 = vsel %vm985_vm13, %v7086_v31, %v7088_v44 }
0x2b6e   :  { %5705 = vtanh.f32 %v7396_v1  ;;  %v4038_v2 = vrot.slane %v7396_v1, 7 }
0x2b6f   :  { %5707 = vtanh.f32 %v3867_v56  ;;  %v4039_v13 = vrot.slane %v3867_v56, 7  ;;  %v3881_v56 = vsel %vm432_vm7, %v7104_v55, %v7094_v45  ;;  %vm4383_vm7 = vcmask 785408  }
0x2b71   :  { %v7403_v23 = vsel %vm1407_vm15, %v4038_v2, %v4039_v13 }
0x2b74   :  { %v5702_v63 = vpop.eup %5701 }
0x2b75   :  { %v5704_v38 = vpop.eup %5703  ;;  %3833 = vrot.lane.b32.xlu0 %v5702_v63, %s5845_s3 }
0x2b76   :  { %3835 = vrot.lane.b32.xlu1 %v5704_v38, %s5845_s3 }
0x2b78   :  { %v5706_v7 = vpop.eup %5705 }
0x2b79   :  { %v5708_v16 = vpop.eup %5707  ;;  %3872 = vrot.lane.b32.xlu0 %v5706_v7, %s5845_s3 }
0x2b7a   :  { %3874 = vrot.lane.b32.xlu1 %v5708_v16, %s5845_s3 }
0x2be7   :  { %v3834_v33 = vpop.permute.xlu0 %3833 }
0x2be8   :  { %v3836_v22 = vpop.permute.xlu1 %3835  ;;  %v3839_v50 = vmul.f32 %v5694_v42, %v3834_v33 }
0x2be9   :  { %v3840_v18 = vmul.f32 %v5696_v49, %v3836_v22 }
0x2bea   :  { %v4318_v48 = vrot.slane %v3839_v50, 5 }
0x2beb   :  { %v4319_v10 = vrot.slane %v3840_v18, 5  ;;  %v5279_v39 = vpack.i.bf16 %v3840_v18, %v3839_v50  ;;  %v3873_v8 = vpop.permute.xlu0 %3872 }
0x2bec   :  { %v3875_v35 = vpop.permute.xlu1 %3874  ;;  %v7419_v4 = vmul.f32 %v5698_v52, %v3873_v8 }
0x2bed   :  { %v7410_v37 = vsel %vm1723_vm2, %v4318_v48, %v4319_v10  ;;  %5280 = vrot.lane.b32.xlu0 %v5279_v39, %s5851_s30  ;;  %v7421_v42 = vmul.f32 %v5700_v26, %v3875_v35 }
0x2bee   :  { %v7415_v53 = vadd.f32 %v7410_v37, %v7356_v5  ;;  %v4323_v25 = vmax.f32 %v7359_v11, %v7410_v37 }
0x2bef   :  { %v5284_v49 = vpack.i.bf16 %v7421_v42, %v7419_v4 }
0x2bf1   :  { %5285 = vrot.lane.b32.xlu1 %v5284_v49, %s5845_s3 }
0x2c5f   :  { %v5281_v46 = vpop.permute.xlu0 %5280 }
0x2c60   :  { %v5283_v15 = vunpack.i.h.bf16 %v5281_v46  ;;  %v5282_v54 = vunpack.i.l.bf16 %v5281_v46 }
0x2c63   :  { %v5286_v9 = vpop.permute.xlu1 %5285 }
0x2c64   :  { %v5288_v3 = vunpack.i.h.bf16 %v5286_v9  ;;  %v5287_v5 = vunpack.i.l.bf16 %v5286_v9 }
0x2c66   :  { %v3904_v62 = vsel %vm243_vm6, %v5282_v54, %v5287_v5  ;;  %v3905_v57 = vsel %vm243_vm6, %v5283_v15, %v5288_v3 }
0x2c67   :  { %v3906_v14 = vpack.c.bf16 %v3905_v57, %v3904_v62 }
0x2c69   :  { %v3908_v52 = vshrl.u32 %v3906_v14, 16  ;;  %v3911_v21 = vshll.u32 %v3906_v14, 16 }
0x2c6b   :  { %v3910_v26 = vrot.slane %v3908_v52, 2  ;;  %v3913_v12 = vrot.slane %v3911_v21, 3 }
0x2c6d   :  { %v3914_v0 = vor.u32 %v3913_v12, %v3910_v26 }
0x2c6f   :  { %5028 = vmatmul.mubr.msk.bf16.vlgmr.msra.gmra.mrb[52].mxu1 %vm494_vm14, %v3914_v0 }
0x2d42   :  { %v3952_v6 = vpop.f32.mrb[52].mxu1 }
0x2d43   :  { %v3961_v29 = vrot.slane %v3952_v6, 2  ;;  %v3954_v20 = vpop.f32.mrb[53].mxu1 }
0x2d44   :  { %v3962_v13 = vrot.slane %v3954_v20, 2  ;;  %v3956_v63 = vpop.f32.mrb[54].mxu1 }
0x2d45   :  { %v3965_v38 = vadd.f32 %v3961_v29, %v3880_v40  ;;  %v3967_v7 = vadd.f32 %v3961_v29, %v3881_v56  ;;  %v3957_v16 = vpop.f32.mrb[55].mxu1 }
0x2d46   :  { %v3966_v33 = vadd.f32 %v3962_v13, %v7084_v51  ;;  %v3968_v22 = vadd.f32 %v3962_v13, %v7168_v30 }
0x2d47   :  { %5709 = vtanh.f32 %v3965_v38  ;;  %v5029_v48 = vmul.f32 -1.442695, %v3965_v38  ;;  %v5031_v51 = vmul.f32 -1.442695, %v3967_v7 }
0x2d48   :  { %5711 = vtanh.f32 %v3967_v7  ;;  %v5030_v30 = vmul.f32 -1.442695, %v3966_v33  ;;  %v5032_v10 = vmul.f32 -1.442695, %v3968_v22 }
0x2d49   :  { %5713 = vtanh.f32 %v3966_v33 }
0x2d4a   :  { %5715 = vtanh.f32 %v3968_v22 }
0x2d4b   :  { %5717 = vpow2.f32 %v5029_v48 }
0x2d4c   :  { %5719 = vpow2.f32 %v5031_v51 }
0x2d4d   :  { %5721 = vpow2.f32 %v5030_v30 }
0x2d4e   :  { %5723 = vpow2.f32 %v5032_v10 }
0x2d51   :  { %v5710_v50 = vpop.eup %5709 }
0x2d52   :  { %v5712_v18 = vpop.eup %5711  ;;  %4006 = vrot.lane.b32.xlu0 %v5710_v50, %s5845_s3 }
0x2d53   :  { %4008 = vrot.lane.b32.xlu1 %v5712_v18, %s5845_s3  ;;  %v5714_v31 = vpop.eup %5713 }
0x2d54   :  { %v5716_v45 = vpop.eup %5715 }
0x2d55   :  { %v5718_v39 = vpop.eup %5717 }
0x2d56   :  { %4049 = vrot.lane.b32.xlu0 %v5714_v31, %s5845_s3  ;;  %v5720_v8 = vpop.eup %5719  ;;  %v3981_v35 = vadd.f32 1.0, %v5718_v39 }
0x2d57   :  { %4051 = vrot.lane.b32.xlu1 %v5716_v45, %s5845_s3  ;;  %v3983_v49 = vadd.f32 1.0, %v5720_v8  ;;  %v5722_v46 = vpop.eup %5721 }
0x2d58   :  { %v5724_v9 = vpop.eup %5723  ;;  %5725 = vrcp.f32 %v3981_v35  ;;  %v3982_v15 = vadd.f32 1.0, %v5722_v46 }
0x2d59   :  { %5727 = vrcp.f32 %v3983_v49  ;;  %v3984_v54 = vadd.f32 1.0, %v5724_v9 }
0x2d5a   :  { %5729 = vrcp.f32 %v3982_v15 }
0x2d5b   :  { %5731 = vrcp.f32 %v3984_v54 }
0x2d62   :  { %v5726_v3 = vpop.eup %5725 }
0x2d63   :  { %v5728_v62 = vpop.eup %5727  ;;  %v4000_v20 = vmul.f32 %v5726_v3, %v3995_v47 }
0x2d64   :  { %v5730_v21 = vpop.eup %5729  ;;  %v4001_v40 = vmul.f32 %v5728_v62, %v7394_v58 }
0x2d65   :  { %v5732_v12 = vpop.eup %5731  ;;  %v4043_v33 = vmul.f32 %v5730_v21, %v4038_v2 }
0x2d66   :  { %v4044_v22 = vmul.f32 %v5732_v12, %v7403_v23 }
0x2dc4   :  { %v4007_v5 = vpop.permute.xlu0 %4006 }
0x2dc5   :  { %v4009_v57 = vpop.permute.xlu1 %4008  ;;  %v4012_v14 = vmul.f32 %v5726_v3, %v4007_v5 }
0x2dc6   :  { %v4013_v52 = vmul.f32 %v5728_v62, %v4009_v57 }
0x2dc7   :  { %4016 = vrot.lane.b32.xlu0 %v4012_v14, %s5851_s30 }
0x2dc8   :  { %4018 = vrot.lane.b32.xlu1 %v4013_v52, %s5851_s30  ;;  %v4050_v26 = vpop.permute.xlu0 %4049 }
0x2dc9   :  { %v4052_v0 = vpop.permute.xlu1 %4051  ;;  %v4055_v6 = vmul.f32 %v5730_v21, %v4050_v26 }
0x2dca   :  { %v4056_v29 = vmul.f32 %v5732_v12, %v4052_v0 }
0x2dcb   :  { %4059 = vrot.lane.b32.xlu0 %v4055_v6, %s5851_s30 }
0x2dcc   :  { %4061 = vrot.lane.b32.xlu1 %v4056_v29, %s5851_s30 }
0x2e39   :  { %v4017_v56 = vpop.permute.xlu0 %4016 }
0x2e3a   :  { %v4019_v13 = vpop.permute.xlu1 %4018  ;;  %v7448_v63 = vadd.f32 %v4017_v56, %v4000_v20  ;;  %v4080_v56 = vsel %vm435_vm9, %v7104_v55, %v7173_v27 }
0x2e3b   :  { %v4023_v38 = vadd.f32 %v4019_v13, %v4001_v40 }
0x2e3c   :  { %5733 = vtanh.f32 %v7448_v63  ;;  %v4188_v7 = vrot.slane %v7448_v63, 7 }
0x2e3d   :  { %5735 = vtanh.f32 %v4023_v38  ;;  %v4189_v16 = vrot.slane %v4023_v38, 7  ;;  %v4060_v60 = vpop.permute.xlu0 %4059 }
0x2e3e   :  { %v4062_v58 = vpop.permute.xlu1 %4061  ;;  %v7460_v50 = vadd.f32 %v4060_v60, %v4043_v33 }
0x2e3f   :  { %v7458_v47 = vsel %vm1407_vm15, %v4188_v7, %v4189_v16  ;;  %v4066_v18 = vadd.f32 %v4062_v58, %v4044_v22 }
0x2e40   :  { %5737 = vtanh.f32 %v7460_v50  ;;  %v4231_v31 = vrot.slane %v7460_v50, 7 }
0x2e41   :  { %5739 = vtanh.f32 %v4066_v18  ;;  %v4232_v45 = vrot.slane %v4066_v18, 7 }
0x2e43   :  { %v7467_v1 = vsel %vm1407_vm15, %v4231_v31, %v4232_v45 }
0x2e46   :  { %v5734_v2 = vpop.eup %5733 }
0x2e47   :  { %v5736_v23 = vpop.eup %5735  ;;  %4028 = vrot.lane.b32.xlu0 %v5734_v2, %s5845_s3 }
0x2e48   :  { %4030 = vrot.lane.b32.xlu1 %v5736_v23, %s5845_s3 }
0x2e4a   :  { %v5738_v48 = vpop.eup %5737 }
0x2e4b   :  { %v5740_v51 = vpop.eup %5739  ;;  %4071 = vrot.lane.b32.xlu0 %v5738_v48, %s5845_s3 }
0x2e4c   :  { %4073 = vrot.lane.b32.xlu1 %v5740_v51, %s5845_s3 }
0x2eb9   :  { %v4029_v30 = vpop.permute.xlu0 %4028 }
0x2eba   :  { %v4031_v10 = vpop.permute.xlu1 %4030  ;;  %v4034_v39 = vmul.f32 %v5726_v3, %v4029_v30 }
0x2ebb   :  { %v4035_v8 = vmul.f32 %v5728_v62, %v4031_v10 }
0x2ebc   :  { %v4330_v35 = vrot.slane %v4034_v39, 6 }
0x2ebd   :  { %v4331_v49 = vrot.slane %v4035_v8, 6  ;;  %v5289_v46 = vpack.i.bf16 %v4035_v8, %v4034_v39  ;;  %v4072_v15 = vpop.permute.xlu0 %4071 }
0x2ebe   :  { %v4074_v57 = vpop.permute.xlu1 %4073  ;;  %v7483_v14 = vmul.f32 %v5730_v21, %v4072_v15 }
0x2ebf   :  { %v4332_v9 = vsel %vm154_vm0, %v4330_v35, %v4331_v49  ;;  %5290 = vrot.lane.b32.xlu0 %v5289_v46, %s5851_s30  ;;  %v7485_v3 = vmul.f32 %v5732_v12, %v4074_v57 }
0x2ec0   :  { %v7476_v54 = vadd.f32 %v4332_v9, %v7415_v53  ;;  %v7481_v5 = vmax.f32 %v4323_v25, %v4332_v9 }
0x2ec1   :  { %v5294_v62 = vpack.i.bf16 %v7485_v3, %v7483_v14  ;;  %v4277_v63 = vrot.slane %v7485_v3, 7 }
0x2ec3   :  { %5295 = vrot.lane.b32.xlu1 %v5294_v62, %s5845_s3 }
0x2f31   :  { %v5291_v52 = vpop.permute.xlu0 %5290 }
0x2f32   :  { %v5293_v0 = vunpack.i.h.bf16 %v5291_v52  ;;  %v5292_v53 = vunpack.i.l.bf16 %v5291_v52 }
0x2f35   :  { %v5296_v26 = vpop.permute.xlu1 %5295 }
0x2f36   :  { %v5298_v6 = vunpack.i.h.bf16 %v5296_v26  ;;  %v5297_v29 = vunpack.i.l.bf16 %v5296_v26 }
0x2f38   :  { %v4103_v11 = vsel %vm243_vm6, %v5292_v53, %v5297_v29  ;;  %v4104_v37 = vsel %vm243_vm6, %v5293_v0, %v5298_v6 }
0x2f39   :  { %v4105_v25 = vpack.c.bf16 %v4104_v37, %v4103_v11 }
0x2f3b   :  { %v4107_v21 = vrot.slane %v4105_v25, 3 }
0x2f3d   :  { %5033 = vmatmul.mubr.msk.bf16.vlgmr.msra.gmra.mrb[56].mxu0 %vm494_vm14, %v4107_v21 }
0x2f3e   :  { %5208 = vmatprep.mubr.msk.bf16.mxu0 %vm5852_vm3, %v5849_v19 }
0x3010   :  { %v4145_v12 = vpop.f32.mrb[56].mxu0 }
0x3011   :  { %v4154_v20 = vrot.slane %v4145_v12, 1  ;;  %v4147_v40 = vpop.f32.mrb[57].mxu0 }
0x3012   :  { %v4155_v13 = vrot.slane %v4147_v40, 1  ;;  %v4149_v38 = vpop.f32.mrb[58].mxu0 }
0x3013   :  { %v4160_v16 = vadd.f32 %v4154_v20, %v4080_v56  ;;  %v4150_v33 = vpop.f32.mrb[59].mxu0  ;;  %v4158_v58 = vadd.f32 %v4154_v20, %v7088_v44 }
0x3014   :  { %v4161_v22 = vadd.f32 %v4155_v13, %v7178_v43  ;;  %v4159_v60 = vadd.f32 %v4155_v13, %v3447_v28 }
0x3015   :  { %v5034_v43 = vmul.f32 -1.442695, %v4158_v58  ;;  %v5036_v44 = vmul.f32 -1.442695, %v4160_v16 }
0x3016   :  { %5741 = vtanh.f32 %v4159_v60  ;;  %v5035_v32 = vmul.f32 -1.442695, %v4159_v60  ;;  %v5037_v28 = vmul.f32 -1.442695, %v4161_v22  ;;  %v4289_v60 = vrot.slane %v7419_v4, 6 }
0x3017   :  { %5743 = vtanh.f32 %v4161_v22  ;;  %v4290_v22 = vrot.slane %v7421_v42, 6 }
0x3018   :  { %5745 = vtanh.f32 %v4158_v58 }
0x3019   :  { %5747 = vtanh.f32 %v4160_v16  ;;  %v4291_v3 = vsel %vm154_vm0, %v4289_v60, %v4290_v22  ;;  %v5380_v22 = vld [vmem:[%s7667_s14 + $0x8] sm:$0xff]  }
0x301a   :  { %5749 = vpow2.f32 %v5035_v32 }
0x301b   :  { %5751 = vpow2.f32 %v5037_v28  ;;  %v4302_v28 = vrot.slane %v7350_v17, 5 }
0x301c   :  { %5753 = vpow2.f32 %v5034_v43 }
0x301d   :  { %5755 = vpow2.f32 %v5036_v44 }
0x3020   :  { %v5742_v18 = vpop.eup %5741 }
0x3021   :  { %v5744_v45 = vpop.eup %5743  ;;  %4242 = vrot.lane.b32.xlu0 %v5742_v18, %s5845_s3 }
0x3022   :  { %4244 = vrot.lane.b32.xlu1 %v5744_v45, %s5845_s3  ;;  %v5746_v55 = vpop.eup %5745 }
0x3023   :  { %v5748_v27 = vpop.eup %5747 }
0x3024   :  { %v5750_v2 = vpop.eup %5749 }
0x3025   :  { %4199 = vrot.lane.b32.xlu0 %v5746_v55, %s5845_s3  ;;  %v5752_v23 = vpop.eup %5751  ;;  %v4175_v48 = vadd.f32 1.0, %v5750_v2 }
0x3026   :  { %4201 = vrot.lane.b32.xlu1 %v5748_v27, %s5845_s3  ;;  %v5754_v51 = vpop.eup %5753  ;;  %v4177_v30 = vadd.f32 1.0, %v5752_v23 }
0x3027   :  { %v5756_v10 = vpop.eup %5755  ;;  %v4174_v39 = vadd.f32 1.0, %v5754_v51  ;;  %5757 = vrcp.f32 %v4175_v48 }
0x3028   :  { %v4176_v8 = vadd.f32 1.0, %v5756_v10  ;;  %5759 = vrcp.f32 %v4177_v30  ;;  %v4312_v10 = vrot.slane %v7311_v34, 4 }
0x3029   :  { %5761 = vrcp.f32 %v4174_v39 }
0x302a   :  { %5763 = vrcp.f32 %v4176_v8 }
0x3031   :  { %v5758_v35 = vpop.eup %5757 }
0x3032   :  { %v5760_v46 = vpop.eup %5759  ;;  %v4236_v29 = vmul.f32 %v5758_v35, %v4231_v31 }
0x3033   :  { %v5762_v62 = vpop.eup %5761  ;;  %v4237_v11 = vmul.f32 %v5760_v46, %v7467_v1 }
0x3034   :  { %v5764_v26 = vpop.eup %5763  ;;  %v4193_v20 = vmul.f32 %v5762_v62, %v4188_v7  ;;  %v4276_v7 = vrot.slane %v7483_v14, 7 }
0x3035   :  { %v4194_v40 = vmul.f32 %v5764_v26, %v7458_v47 }
0x3036   :  { %v4278_v55 = vsel %vm1407_vm15, %v4276_v7, %v4277_v63 }
0x3093   :  { %v4243_v49 = vpop.permute.xlu0 %4242 }
0x3094   :  { %v4245_v9 = vpop.permute.xlu1 %4244  ;;  %v4248_v15 = vmul.f32 %v5758_v35, %v4243_v49 }
0x3095   :  { %v4249_v57 = vmul.f32 %v5760_v46, %v4245_v9  ;;  %v4324_v9 = vrot.slane %v7271_v41, 3 }
0x3096   :  { %4252 = vrot.lane.b32.xlu0 %v4248_v15, %s5851_s30 }
0x3097   :  { %4254 = vrot.lane.b32.xlu1 %v4249_v57, %s5851_s30  ;;  %v4200_v52 = vpop.permute.xlu0 %4199 }
0x3098   :  { %v4202_v0 = vpop.permute.xlu1 %4201  ;;  %v4205_v53 = vmul.f32 %v5762_v62, %v4200_v52 }
0x3099   :  { %v4206_v6 = vmul.f32 %v5764_v26, %v4202_v0 }
0x309a   :  { %4209 = vrot.lane.b32.xlu0 %v4205_v53, %s5851_s30 }
0x309b   :  { %4211 = vrot.lane.b32.xlu1 %v4206_v6, %s5851_s30 }
0x3108   :  { %v4253_v37 = vpop.permute.xlu0 %4252 }
0x3109   :  { %v4255_v25 = vpop.permute.xlu1 %4254  ;;  %v4258_v21 = vadd.f32 %v4253_v37, %v4236_v29  ;;  %v4350_v37 = vrot.slane %v7194_v24, 1 }
0x310a   :  { %v4259_v12 = vadd.f32 %v4255_v25, %v4237_v11 }
0x310b   :  { %5765 = vtanh.f32 %v4258_v21 }
0x310c   :  { %5767 = vtanh.f32 %v4259_v12  ;;  %v4210_v56 = vpop.permute.xlu0 %4209 }
0x310d   :  { %v4212_v13 = vpop.permute.xlu1 %4211  ;;  %v4215_v38 = vadd.f32 %v4210_v56, %v4193_v20 }
0x310e   :  { %v4216_v16 = vadd.f32 %v4212_v13, %v4194_v40 }
0x310f   :  { %5769 = vtanh.f32 %v4215_v38 }
0x3110   :  { %5771 = vtanh.f32 %v4216_v16 }
0x3115   :  { %v5766_v50 = vpop.eup %5765 }
0x3116   :  { %v5768_v31 = vpop.eup %5767  ;;  %4264 = vrot.lane.b32.xlu0 %v5766_v50, %s5845_s3 }
0x3117   :  { %4266 = vrot.lane.b32.xlu1 %v5768_v31, %s5845_s3 }
0x3119   :  { %v5770_v1 = vpop.eup %5769 }
0x311a   :  { %v5772_v33 = vpop.eup %5771  ;;  %4221 = vrot.lane.b32.xlu0 %v5770_v1, %s5845_s3 }
0x311b   :  { %4223 = vrot.lane.b32.xlu1 %v5772_v33, %s5845_s3 }
0x3188   :  { %v4265_v47 = vpop.permute.xlu0 %4264 }
0x3189   :  { %v4267_v58 = vpop.permute.xlu1 %4266  ;;  %v4270_v18 = vmul.f32 %v5758_v35, %v4265_v47  ;;  %v5379_v47 = vld [vmem:[%s7667_s14 + $0x48] sm:$0xff]  }
0x318a   :  { %v4271_v45 = vmul.f32 %v5760_v46, %v4267_v58  ;;  %v5382_v58 = vld [vmem:[%s7667_s14 + $0x10] sm:$0xff]  }
0x318b   :  { %v4281_v27 = vadd.f32 %v4276_v7, %v4270_v18  ;;  %v4283_v32 = vmax.f32 %v4270_v18, %v4276_v7  ;;  %v5377_v7 = vld [vmem:[%s7667_s14 + $0x40] sm:$0xff]   ;;  %v5383_v18 = vld [vmem:[%s7667_s14 + $0x58] sm:$0xff]  }
0x318c   :  { %v4282_v43 = vadd.f32 %v4278_v55, %v4271_v45  ;;  %v4284_v44 = vmax.f32 %v4271_v45, %v4278_v55  ;;  %v4222_v2 = vpop.permute.xlu0 %4221  ;;  %5100 = vmatprep.subr.bf16.mxu1 %v5377_v7  ;;  %v5384_v45 = vld [vmem:[%s7667_s14 + $0x18] sm:$0xff]   ;;  %v5385_v55 = vld [vmem:[%s7667_s14 + $0x60] sm:$0xff]  }
0x318d   :  { %v4294_v14 = vadd.f32 %v4289_v60, %v4281_v27  ;;  %v4296_v23 = vmax.f32 %v4283_v32, %v4289_v60  ;;  %v4224_v48 = vpop.permute.xlu1 %4223  ;;  %v4227_v42 = vmul.f32 %v5762_v62, %v4222_v2  ;;  %v4336_v62 = vrot.slane %v7235_v36, 2  ;;  %v5381_v60 = vld [vmem:[%s7667_s14 + $0x50] sm:$0xff]   ;;  %v5386_v27 = vld [vmem:[%s7667_s14 + $0x20] sm:$0xff]   ;;  %v5387_v32 = vld [vmem:[%s7667_s14 + $0x68] sm:$0xff]  }
0x318e   :  { %v4295_v51 = vadd.f32 %v4291_v3, %v4282_v43  ;;  %v4297_v4 = vmax.f32 %v4284_v44, %v4291_v3  ;;  %v4228_v30 = vmul.f32 %v5764_v26, %v4224_v48  ;;  %v5389_v43 = vld [vmem:[%s7667_s14 + $0x70] sm:$0xff]   ;;  %v5391_v2 = vld [vmem:[%s7667_s14 + $0x78] sm:$0xff]   ;;  %v4430_v7 = vld [vmem:[%s7665_s12] sm:$0x3] }
0x318f   :  { %v4304_v39 = vadd.f32 %v4302_v28, %v4294_v14  ;;  %v4306_v8 = vmax.f32 %v4296_v23, %v4302_v28  ;;  %v4344_v35 = vrot.slane %v4227_v42, 7  ;;  %v5390_v44 = vld [vmem:[%s7667_s14 + $0x30] sm:$0xff]   ;;  %v5392_v3 = vld [vmem:[%s7667_s14 + $0x38] sm:$0xff]  }
0x3190   :  { %v4305_v49 = vadd.f32 %v4302_v28, %v4295_v51  ;;  %v4307_v46 = vmax.f32 %v4297_v4, %v4302_v28  ;;  %v4345_v17 = vrot.slane %v4228_v30, 7  ;;  %v5388_v28 = vld [vmem:[%s7667_s14 + $0x28] sm:$0xff]  }
0x3191   :  { %v4314_v15 = vadd.f32 %v4312_v10, %v4304_v39  ;;  %v4316_v57 = vmax.f32 %v4306_v8, %v4312_v10 }
0x3192   :  { %v4315_v52 = vadd.f32 %v4312_v10, %v4305_v49  ;;  %v4317_v0 = vmax.f32 %v4307_v46, %v4312_v10  ;;  %v4346_v53 = vsel %vm1407_vm15, %v4344_v35, %v4345_v17 }
0x3193   :  { %v4326_v6 = vadd.f32 %v4324_v9, %v4314_v15  ;;  %v4328_v26 = vmax.f32 %v4316_v57, %v4324_v9  ;;  %v4348_v34 = vadd.f32 %v4346_v53, %v7476_v54  ;;  %v4349_v36 = vmax.f32 %v7481_v5, %v4346_v53  ;;  %v5378_v5 = vld [vmem:[%s7667_s14] sm:$0xff]  }
0x3194   :  { %v4327_v29 = vadd.f32 %v4324_v9, %v4315_v52  ;;  %v4329_v11 = vmax.f32 %v4317_v0, %v4324_v9  ;;  %5101 = vmatpush3.bf16.msra.mxu1 %v5378_v5  ;;  %v4435_v5 = vrot.slane %v4430_v7, %v6162_v61 }
0x3195   :  { %v4340_v25 = vmax.f32 %v4328_v26, %v4336_v62  ;;  %v4356_v21 = vmul.f32 0.125, %v4348_v34  ;;  %v4338_v12 = vadd.f32 %v4336_v62, %v4326_v6  ;;  %5102 = vmatprep.subr.bf16.mxu1 %v5379_v47  ;;  %v4444_v47 = vld [vmem:[%s7666_s13] sm:$0x3] }
0x3196   :  { %v4341_v41 = vmax.f32 %v4329_v11, %v4336_v62  ;;  %v4339_v20 = vadd.f32 %v4336_v62, %v4327_v29 }
0x3197   :  { %4360 = vrot.lane.b32.xlu0 %v4356_v21, %s5851_s30  ;;  %v4352_v40 = vadd.f32 %v4350_v37, %v4338_v12  ;;  %v4354_v56 = vmax.f32 %v4340_v25, %v4350_v37 }
0x3198   :  { %v4353_v13 = vadd.f32 %v4350_v37, %v4339_v20  ;;  %v4355_v38 = vmax.f32 %v4341_v41, %v4350_v37  ;;  %5103 = vmatpush3.bf16.msra.mxu1 %v5380_v22 }
0x3199   :  { %v4357_v16 = vmul.f32 0.125, %v4352_v40  ;;  %v4377_v50 = vrot.slane %v4354_v56, 7  ;;  %5104 = vmatprep.subr.bf16.mxu1 %v5381_v60 }
0x319a   :  { %v4358_v54 = vmul.f32 0.125, %v4353_v13  ;;  %v4378_v31 = vrot.slane %v4355_v38, 7 }
0x319b   :  { %4372 = vrot.lane.b32.xlu0 %v4349_v36, %s5854_s11  ;;  %v4365_v24 = vrot.slane %v4357_v16, 7 }
0x319c   :  { %v4366_v1 = vrot.slane %v4358_v54, 7  ;;  %v4379_v33 = vsel %vm1407_vm15, %v4377_v50, %v4378_v31  ;;  %5105 = vmatpush3.bf16.msra.mxu1 %v5382_v58  ;;  %v4439_v58 = vrot.slane %v4430_v7, %v6156_v59 }
0x319d   :  { %5106 = vmatprep.subr.bf16.mxu1 %v5383_v18 }
0x319e   :  { %v4367_v63 = vsel %vm1407_vm15, %v4365_v24, %v4366_v1 }
0x319f   :  { %4368 = vrot.lane.b32.xlu1 %v4367_v63, %s5845_s3 }
0x31a0   :  { %5107 = vmatpush3.bf16.msra.mxu1 %v5384_v45  ;;  %v4449_v45 = vrot.slane %v4444_v47, %v6162_v61  ;;  %v5395_v61 = vld [vmem:[#allocation2 + $0x10] sm:$0xff]  }
0x31a1   :  { %5108 = vmatprep.subr.bf16.mxu1 %v5385_v55 }
0x31a4   :  { %5109 = vmatpush3.bf16.msra.mxu1 %v5386_v27  ;;  %v4453_v27 = vrot.slane %v4444_v47, %v6156_v59  ;;  %v5396_v59 = vld [vmem:[#allocation2 + $0x18] sm:$0xff]  }
0x31a5   :  { %5110 = vmatprep.subr.bf16.mxu1 %v5387_v32 }
0x31a8   :  { %5111 = vmatpush3.bf16.msra.mxu1 %v5388_v28 }
0x31a9   :  { %5112 = vmatprep.subr.bf16.mxu1 %v5389_v43 }
0x31ac   :  { %5113 = vmatpush3.bf16.msra.mxu1 %v5390_v44 }
0x31ad   :  { %5114 = vmatprep.subr.bf16.mxu1 %v5391_v2 }
0x31b0   :  { %5115 = vmatpush3.bf16.msra.mxu1 %v5392_v3 }
0x3209   :  { %v4361_v14 = vpop.permute.xlu0 %4360 }
0x320d   :  { %v4373_v48 = vpop.permute.xlu0 %4372 }
0x3211   :  { %v4369_v23 = vpop.permute.xlu1 %4368 }
0x3212   :  { %v4381_v42 = vsel %vm243_vm6, %v4361_v14, %v4369_v23  ;;  %v5393_v14 = vld [vmem:[#allocation2] sm:$0xff]   ;;  %v5394_v23 = vld [vmem:[#allocation2 + $0x8] sm:$0xff]  }
0x3213   :  { %v4382_v51 = vsel %vm494_vm14, %v4381_v42, %v4373_v48  ;;  %5201 = vmatpush3.bf16.msra.mxu0 %v5393_v14  ;;  %v5038_v42 = vld [vmem:[%s7668_s15] ss:$0 sm:$0xff] }
0x3214   :  { %v4384_v4 = vsel %vm4383_vm7, %v4382_v51, %v4379_v33  ;;  %5202 = vmatprep.subr.bf16.mxu0 %v5849_v19 }
0x3215   :  { %v4386_v30 = vrot.slane %v4384_v4, 2  ;;  %v4388_v10 = vsel %vm154_vm0, %v4384_v4, 0.0 }
0x3216   :  { %v4389_v39 = vrot.slane %v4388_v10, 4 }
0x3217   :  { %v4395_v8 = vsel %vm154_vm0, %v4386_v30, 0.0  ;;  %5203 = vmatpush3.bf16.msra.mxu0 %v5394_v23 }
0x3218   :  { %v4390_v35 = vadd.f32 %v4389_v39, %v4388_v10  ;;  %v4396_v49 = vrot.slane %v4395_v8, 4  ;;  %5204 = vmatprep.subr.bf16.mxu0 %v5849_v19 }
0x321a   :  { %v4391_v46 = vrot.slane %v4390_v35, 2  ;;  %v4397_v17 = vadd.f32 %v4396_v49, %v4395_v8 }
0x321b   :  { %5205 = vmatpush3.bf16.msra.mxu0 %v5395_v61 }
0x321c   :  { %v4392_v9 = vadd.f32 %v4391_v46, %v4390_v35  ;;  %v4398_v15 = vrot.slane %v4397_v17, 2  ;;  %5206 = vmatprep.subr.bf16.mxu0 %v5849_v19 }
0x321e   :  { %v4393_v57 = vrot.slane %v4392_v9, 1  ;;  %v4399_v52 = vadd.f32 %v4398_v15, %v4397_v17 }
0x321f   :  { %5207 = vmatpush3.bf16.msra.mxu0 %v5396_v59 }
0x3220   :  { %v4394_v0 = vadd.f32 %v4393_v57, %v4392_v9  ;;  %v4400_v53 = vrot.slane %v4399_v52, 1  ;;  %5212 = vmatprep.subr.bf16.mxu0 %v5849_v19 }
0x3222   :  { %v4402_v62 = vmul.f32 0.5, %v4394_v0  ;;  %v4401_v6 = vadd.f32 %v4400_v53, %v4399_v52 }
0x3224   :  { %v4404_v26 = vsub.f32 %v4384_v4, %v4402_v62  ;;  %v4403_v34 = vmul.f32 0.5, %v4401_v6 }
0x3226   :  { %v4406_v29 = vmul.f32 %v4404_v26, %v4404_v26  ;;  %v4405_v11 = vsub.f32 %v4386_v30, %v4403_v34 }
0x3228   :  { %v4408_v37 = vsel %vm154_vm0, %v4406_v29, 0.0  ;;  %v4407_v25 = vmul.f32 %v4405_v11, %v4405_v11 }
0x3229   :  { %v4409_v21 = vrot.slane %v4408_v37, 4 }
0x322a   :  { %v4415_v12 = vsel %vm154_vm0, %v4407_v25, 0.0  ;;  %vm4641_vm0 = vcmask 517120  }
0x322b   :  { %v4410_v41 = vadd.f32 %v4409_v21, %v4408_v37  ;;  %v4416_v20 = vrot.slane %v4415_v12, 4 }
0x322d   :  { %v4411_v40 = vrot.slane %v4410_v41, 2  ;;  %v4417_v56 = vadd.f32 %v4416_v20, %v4415_v12 }
0x322f   :  { %v4412_v13 = vadd.f32 %v4411_v40, %v4410_v41  ;;  %v4418_v38 = vrot.slane %v4417_v56, 2 }
0x3231   :  { %v4413_v36 = vrot.slane %v4412_v13, 1  ;;  %v4419_v16 = vadd.f32 %v4418_v38, %v4417_v56 }
0x3233   :  { %v4414_v50 = vadd.f32 %v4413_v36, %v4412_v13  ;;  %v4420_v54 = vrot.slane %v4419_v16, 1  ;;  %v5056_v13 = vld [vmem:[%s7669_s16] ss:$0 sm:$0xff] }
0x3234   :  { %v5057_v36 = vld [vmem:[%s7670_s17] ss:$0 sm:$0xff] }
0x3235   :  { %v4422_v31 = vmul.f32 0.5, %v4414_v50  ;;  %v4421_v24 = vadd.f32 %v4420_v54, %v4419_v16 }
0x3237   :  { %v4424_v1 = vadd.f32 1e-05, %v4422_v31  ;;  %v4423_v33 = vmul.f32 0.5, %v4421_v24  ;;  %v5397_v31 = vld [vmem:[%s7675_s22] sm:$0xff]   ;;  %v5398_v24 = vld [vmem:[%s7675_s22 + $0x8] sm:$0xff]  }
0x3239   :  { %5773 = vrsqrt.f32 %v4424_v1  ;;  %v4425_v63 = vadd.f32 1e-05, %v4423_v33  ;;  %v5399_v1 = vld [vmem:[%s7675_s22 + $0x10] sm:$0xff]   ;;  %v5400_v33 = vld [vmem:[%s7675_s22 + $0x18] sm:$0xff]  }
0x323b   :  { %5775 = vrsqrt.f32 %v4425_v63  ;;  %v5058_v63 = vld [vmem:[%s7672_s19] ss:$0 sm:$0xff] }
0x3243   :  { %v5774_v22 = vpop.eup %5773 }
0x3244   :  { %v4428_v60 = vmul.f32 %v5774_v22, %v4404_v26 }
0x3245   :  { %v5776_v18 = vpop.eup %5775 }
0x3246   :  { %v4429_v55 = vmul.f32 %v5776_v18, %v4405_v11  ;;  %v4442_v32 = vmul.f32 %v4435_v5, %v4428_v60 }
0x3248   :  { %v4443_v28 = vmul.f32 %v4439_v58, %v4429_v55  ;;  %v4456_v43 = vadd.f32 %v4449_v45, %v4442_v32 }
0x324a   :  { %v4457_v44 = vadd.f32 %v4453_v27, %v4443_v28  ;;  %v4458_v3 = vpack.c.bf16 %v4456_v43, %v4456_v43 }
0x324c   :  { %v4459_v2 = vpack.c.bf16 %v4457_v44, %v4457_v44 }
0x324e   :  { %4627 = vmatprep.mubr.bf16.mxu1 %v4459_v2 }
0x324f   :  { %4628 = vmatmul.mubr.bf16.vlgmr.msra.gmra.mrb[56].mxu1 %v4458_v3 }
0x3322   :  { %v5116_v48 = vpop.f32.mrb[56].mxu1 }
0x3323   :  { %v5117_v51 = vpop.f32.mrb[57].mxu1 }
0x3324   :  { %v5118_v4 = vadd.f32 %v5117_v51, %v5116_v48  ;;  %v5119_v30 = vpop.f32.mrb[58].mxu1 }
0x3325   :  { %v5120_v10 = vpop.f32.mrb[59].mxu1 }
0x3326   :  { %v4630_v39 = vadd.f32 %v5118_v4, %v5038_v42 }
0x3328   :  { %v4636_v8 = vmin.f32 %v4630_v39, 0.0  ;;  %vm4635_vm6 = vcmp.gt.f32.partialorder %v4630_v39, 0.0 }
0x332a   :  { %v4637_v35 = vmul.f32 1.442695, %v4636_v8 }
0x332c   :  { %5777 = vpow2.f32 %v4637_v35 }
0x3336   :  { %v5778_v49 = vpop.eup %5777 }
0x3337   :  { %v5055_v46 = vadd.f32 -1.0, %v5778_v49  ;;  %v5065_v49 = vld [vmem:[%s7673_s20] ss:$0 sm:$0xff] }
0x3339   :  { %v4640_v17 = vsel %vm4635_vm6, %v4630_v39, %v5055_v46 }
0x333a   :  { %v4642_v9 = vsel %vm4641_vm0, %v4640_v17, 0.0 }
0x333b   :  { %v4643_v15 = vrot.slane %v4642_v9, 4 }
0x333d   :  { %v4644_v57 = vadd.f32 %v4643_v15, %v4642_v9 }
0x333f   :  { %v4645_v52 = vrot.slane %v4644_v57, 2 }
0x3341   :  { %v4646_v0 = vadd.f32 %v4645_v52, %v4644_v57  ;;  %v5067_v52 = vld [vmem:[#allocation4] ss:$0 sm:$0xff] }
0x3343   :  { %v4647_v53 = vrot.slane %v4646_v0, 1 }
0x3345   :  { %v4648_v62 = vadd.f32 %v4647_v53, %v4646_v0 }
0x3347   :  { %v4649_v6 = vmul.f32 0.5, %v4648_v62 }
0x3349   :  { %v4650_v26 = vsub.f32 %v4640_v17, %v4649_v6  ;;  %v5066_v17 = vld [vmem:[%s7674_s21] ss:$0 sm:$0xff] }
0x334b   :  { %v4651_v34 = vmul.f32 %v4650_v26, %v4650_v26 }
0x334d   :  { %v4652_v29 = vsel %vm4641_vm0, %v4651_v34, 0.0 }
0x334e   :  { %v4653_v11 = vrot.slane %v4652_v29, 4 }
0x3350   :  { %v4654_v37 = vadd.f32 %v4653_v11, %v4652_v29 }
0x3352   :  { %v4655_v25 = vrot.slane %v4654_v37, 2 }
0x3354   :  { %v4656_v21 = vadd.f32 %v4655_v25, %v4654_v37 }
0x3356   :  { %v4657_v12 = vrot.slane %v4656_v21, 1 }
0x3358   :  { %v4658_v41 = vadd.f32 %v4657_v12, %v4656_v21 }
0x335a   :  { %v4659_v20 = vmul.f32 0.5, %v4658_v41 }
0x335c   :  { %v4660_v40 = vadd.f32 1e-05, %v4659_v20 }
0x335e   :  { %5779 = vrsqrt.f32 %v4660_v40 }
0x3368   :  { %v5780_v56 = vpop.eup %5779 }
0x3369   :  { %v4662_v38 = vmul.f32 %v5780_v56, %v4650_v26 }
0x336b   :  { %v4670_v16 = vmul.f32 %v5056_v13, %v4662_v38 }
0x336d   :  { %v4678_v50 = vadd.f32 %v5057_v36, %v4670_v16 }
0x336f   :  { %v4679_v54 = vpack.c.bf16 %v4678_v50, %v4678_v50 }
0x3371   :  { %5209 = vmatmul.mubr.msk.bf16.vlgmr.msra.gmra.mrb[60].mxu0 %vm494_vm14, %v4679_v54 }
0x3372   :  { %5220 = vmatprep.mubr.msk.bf16.mxu0 %vm5852_vm3, %v5849_v19  ;;  %5213 = vmatpush3.bf16.msra.mxu0 %v5397_v31 }
0x3373   :  { %5214 = vmatprep.subr.bf16.mxu0 %v5849_v19 }
0x3376   :  { %5215 = vmatpush3.bf16.msra.mxu0 %v5398_v24 }
0x3377   :  { %5216 = vmatprep.subr.bf16.mxu0 %v5849_v19 }
0x337a   :  { %5217 = vmatpush3.bf16.msra.mxu0 %v5399_v1 }
0x337b   :  { %5218 = vmatprep.subr.bf16.mxu0 %v5849_v19 }
0x337e   :  { %5219 = vmatpush3.bf16.msra.mxu0 %v5400_v33 }
0x3444   :  { %v4756_v7 = vpop.f32.mrb[60].mxu0 }
0x3445   :  { %v4757_v5 = vadd.f32 %v5058_v63, %v4756_v7  ;;  %v5210_v47 = vpop.f32.mrb[61].mxu0 }
0x3446   :  { %v4759_v22 = vpop.f32.mrb[62].mxu0 }
0x3447   :  { %v4763_v60 = vmin.f32 %v4757_v5, 0.0  ;;  %v5211_v58 = vpop.f32.mrb[63].mxu0  ;;  %vm4762_vm9 = vcmp.gt.f32.partialorder %v4757_v5, 0.0 }
0x3449   :  { %v4764_v18 = vmul.f32 1.442695, %v4763_v60 }
0x344b   :  { %5781 = vpow2.f32 %v4764_v18 }
0x3455   :  { %v5782_v45 = vpop.eup %5781 }
0x3456   :  { %v5064_v55 = vadd.f32 -1.0, %v5782_v45 }
0x3458   :  { %v4767_v19 = vsel %vm4762_vm9, %v4757_v5, %v5064_v55 }
0x3459   :  { %v4768_v27 = vsel %vm4641_vm0, %v4767_v19, 0.0 }
0x345a   :  { %v4769_v32 = vrot.slane %v4768_v27, 4 }
0x345c   :  { %v4770_v28 = vadd.f32 %v4769_v32, %v4768_v27 }
0x345e   :  { %v4771_v43 = vrot.slane %v4770_v28, 2 }
0x3460   :  { %v4772_v44 = vadd.f32 %v4771_v43, %v4770_v28 }
0x3462   :  { %v4773_v2 = vrot.slane %v4772_v44, 1 }
0x3464   :  { %v4774_v3 = vadd.f32 %v4773_v2, %v4772_v44 }
0x3466   :  { %v4775_v14 = vmul.f32 0.5, %v4774_v3 }
0x3468   :  { %v4776_v23 = vsub.f32 %v4767_v19, %v4775_v14 }
0x346a   :  { %v4777_v61 = vmul.f32 %v4776_v23, %v4776_v23 }
0x346c   :  { %v4778_v59 = vsel %vm4641_vm0, %v4777_v61, 0.0 }
0x346d   :  { %v4779_v48 = vrot.slane %v4778_v59, 4 }
0x346f   :  { %v4780_v42 = vadd.f32 %v4779_v48, %v4778_v59 }
0x3471   :  { %v4781_v51 = vrot.slane %v4780_v42, 2 }
0x3473   :  { %v4782_v4 = vadd.f32 %v4781_v51, %v4780_v42 }
0x3475   :  { %v4783_v30 = vrot.slane %v4782_v4, 1 }
0x3477   :  { %v4784_v10 = vadd.f32 %v4783_v30, %v4782_v4 }
0x3479   :  { %v4785_v39 = vmul.f32 0.5, %v4784_v10 }
0x347b   :  { %v4786_v8 = vadd.f32 1e-05, %v4785_v39 }
0x347d   :  { %5783 = vrsqrt.f32 %v4786_v8 }
0x3487   :  { %v5784_v35 = vpop.eup %5783 }
0x3488   :  { %v4788_v46 = vmul.f32 %v5784_v35, %v4776_v23 }
0x348a   :  { %v4796_v9 = vmul.f32 %v5065_v49, %v4788_v46 }
0x348c   :  { %v4804_v15 = vadd.f32 %v5066_v17, %v4796_v9 }
0x348e   :  { %v4805_v57 = vpack.c.bf16 %v4804_v15, %v4804_v15 }
0x3490   :  { %5221 = vmatmul.mubr.msk.bf16.vlgmr.msra.gmra.mrb[64].mxu0 %vm494_vm14, %v4805_v57 }
0x3563   :  { %v4882_v0 = vpop.f32.mrb[64].mxu0 }
0x3564   :  { %v4883_v53 = vadd.f32 %v5067_v52, %v4882_v0  ;;  %v5222_v62 = vpop.f32.mrb[65].mxu0 }
0x3565   :  { %v4885_v6 = vpop.f32.mrb[66].mxu0 }
0x3566   :  { %v5223_v26 = vpop.f32.mrb[67].mxu0  ;;  %v4889_v34 = vsel %vm4888_vm11, %v4883_v53, -inf }
0x3567   :  { %4890 = vmax.xlane.f32.xlu1 %v4889_v34 }
0x35f4   :  { %v4891_v29 = vpop.xlane.xlu1 %4890 }
0x35f5   :  { %v4892_v11 = vsub.f32 %v4883_v53, %v4891_v29 }
0x35f7   :  { %v4893_v37 = vmul.f32 1.442695, %v4892_v11 }
0x35f9   :  { %5785 = vpow2.f32 %v4893_v37 }
0x3603   :  { %v5786_v25 = vpop.eup %5785 }
0x3604   :  { %v4895_v21 = vsel %vm4888_vm11, %v5786_v25, 0.0 }
0x3605   :  { %4896 = vadd.xlane.f32.xlu0 %v4895_v21 }
0x3692   :  { %v4897_v12 = vpop.xlane.xlu0 %4896 }
0x3693   :  { %5787 = vrcp.f32 %v4897_v12 }
0x369d   :  { %v5788_v41 = vpop.eup %5787 }
0x369e   :  { %v4899_v20 = vmul.f32 %v5788_v41, %v5786_v25 }
0x36a0   :  { %4900 = vst.msk [vmem:[%s7677_s24] sm:$0x3] %vm4888_vm11, %v4899_v20 }
0x36a1   :  { %4905 = vsyncpa [#allocation3], 1 }
0x36a2   :  { %4906 = vsyncpa [#allocation5], 1 }

</bundles_post_ra>
